<compile_context>
chip_gen: v7x
topology: tpu7x:2x2x1
jax: 0.10.0
libtpu: 0.0.40
codegen_flags: <defaults>
</compile_context>

<pallas_src>
import functools
import math

import numpy as np
import jax
import jax.numpy as jnp
from jax.experimental import pallas as pl
from jax.experimental.pallas import tpu as pltpu


def _log_sigmoid(x):
    # log(sigmoid(x)) = min(x, 0) - log1p(exp(-|x|))
    # Single exp + single log1p (EUP ops), no dual-branch jnp.where.
    return jnp.minimum(x, 0.0) - jnp.log1p(jnp.exp(-jnp.abs(x)))


def _dice_loss_kernel(
        # --- scalar prefetch (SMEM) ---
        u_idx_ref, ip_idx_ref, in_idx_ref,           # (BN_pad,) int32 each
        # --- blocked VMEM inputs ---
        mask_ref, valid_ref,                         # (T, 1) f32
        # --- embedding tables left in HBM (pl.ANY), gathered in-kernel ---
        users_int_hbm, users_pop_hbm, items_int_hbm, items_pop_hbm,
        # --- resident VMEM blocks for the L2 discrepancy term ---
        it_int_ref, it_pop_ref, us_int_ref, us_pop_ref,
        # --- output (resident (1,1) block, written once at the last step) ---
        out_ref,
        # --- scratch ---
        ubuf_i, ubuf_p, pbuf_i, pbuf_p, nbuf_i, nbuf_p,   # (2*T, E) double-buffered gather bufs
        sems,                                             # DMA semaphores (6, 2)
        acc_ref,                                          # (1, 1) f32 accumulator
        *, tile, int_weight, pop_weight, dis_pen,
        inv_n_pair, inv_item_denom, inv_user_denom):
    step = pl.program_id(0)
    par = step & 1                                   # this step's buffer slot

    tables = (users_int_hbm, users_pop_hbm,
              items_int_hbm, items_pop_hbm,
              items_int_hbm, items_pop_hbm)
    bufs = (ubuf_i, ubuf_p, pbuf_i, pbuf_p, nbuf_i, nbuf_p)

    def issue_gather(tstep):
        # Issue the 6*tile row DMAs for tile `tstep` into its parity slot.
        tpar = tstep & 1
        base = tstep * tile
        off = tpar * tile
        for j in range(tile):
            iu = u_idx_ref[base + j]
            ipos = ip_idx_ref[base + j]
            ineg = in_idx_ref[base + j]
            idxs = (iu, iu, ipos, ipos, ineg, ineg)
            for k in range(6):
                pltpu.make_async_copy(
                    tables[k].at[pl.ds(idxs[k], 1)],
                    bufs[k].at[pl.ds(off + j, 1)],
                    sems.at[k, tpar]).start()

    # Prologue: gather for step 0's own tile.
    @pl.when(step == 0)
    def _():
        issue_gather(step)

    # Prefetch the NEXT tile's gather into the other slot / semaphore bank
    # before waiting on this tile's DMAs, so they overlap with the waits and
    # compute below (and all SMEM scalar reads happen before any wait).
    @pl.when(step + 1 < pl.num_programs(0))
    def _():
        issue_gather(step + 1)

    # Wait for this tile's 6*tile row DMAs (each wait matches one 1-row issue).
    for k in range(6):
        for _ in range(tile):
            pltpu.make_async_copy(tables[k].at[pl.ds(0, 1)],
                                  bufs[k].at[pl.ds(0, 1)],
                                  sems.at[k, par]).wait()

    @pl.when(step == 0)
    def _():
        acc_ref[...] = jnp.zeros_like(acc_ref)

    # ---- scores: only the positive-negative *differences* are needed --------
    off = pl.multiple_of(par * tile, tile)           # sublane-aligned slot base
    u_int = ubuf_i[pl.ds(off, tile), :]
    u_pop = ubuf_p[pl.ds(off, tile), :]
    diff_int = pbuf_i[pl.ds(off, tile), :] - nbuf_i[pl.ds(off, tile), :]
    diff_pop = pbuf_p[pl.ds(off, tile), :] - nbuf_p[pl.ds(off, tile), :]
    d_int = jnp.sum(u_int * diff_int, axis=-1, keepdims=True)    # (T, 1)
    d_pop = jnp.sum(u_pop * diff_pop, axis=-1, keepdims=True)    # (T, 1)
    d_tot = d_int + d_pop

    m = mask_ref[...]      # (T, 1) mask as float
    v = valid_ref[...]     # (T, 1): 1 for real pairs, 0 for padded rows

    ls_int = _log_sigmoid(d_int)
    ls_pop = _log_sigmoid(d_pop)
    ls_tot = _log_sigmoid(d_tot)

    # loss_int = -sum(m * logsig(d_int)) / n_pair
    # loss_pop = -sum(m*logsig(-d_pop) + (1-m)*logsig(d_pop)) / n_pair
    #          = (sum(m*d_pop) - sum(logsig(d_pop))) / n_pair  [logsig(-x)=logsig(x)-x]
    # loss_tot = -sum(logsig(d_tot)) / n_pair
    row = (pop_weight * (m * d_pop - v * ls_pop)
           - int_weight * (m * ls_int)
           - v * ls_tot)                                         # (T, 1)
    acc_ref[...] += jnp.sum(row, axis=0, keepdims=True)

    @pl.when(step == pl.num_programs(0) - 1)
    def _():
        # L2 discrepancy (MSELoss) over the de-duplicated embeddings; padded
        # rows are zero in both copies and the denominators are static.
        d_it = it_int_ref[...] - it_pop_ref[...]
        d_us = us_int_ref[...] - us_pop_ref[...]
        disc = (jnp.sum(d_it * d_it, keepdims=True) * inv_item_denom
                + jnp.sum(d_us * d_us, keepdims=True) * inv_user_denom)
        out_ref[...] = acc_ref[...] * inv_n_pair - dis_pen * disc


def dice_forward_pallas(params, user, item_p, item_n, mask,
                        *, int_weight, pop_weight, dis_pen, tile=8):
    assert tile % 8 == 0, "tile must be a multiple of 8 (sublane tiling)"
    users_int, users_pop, items_int, items_pop = params
    E = users_int.shape[1]
    B, N = user.shape
    n_pair = B * N

    # Pad the flattened pair axis to a multiple of the tile (multiple of 8).
    bn_pad = ((n_pair + tile - 1) // tile) * tile
    num_tiles = bn_pad // tile

    def flat_pad_idx(x):
        v = jnp.reshape(x, (-1,)).astype(jnp.int32)
        return jnp.pad(v, (0, bn_pad - n_pair))     # padded rows gather row 0 (gated by valid)

    u_idx = flat_pad_idx(user)
    ip_idx = flat_pad_idx(item_p)
    in_idx = flat_pad_idx(item_n)

    mask_col = jnp.pad(jnp.reshape(mask.astype(jnp.float32), (-1, 1)),
                       ((0, bn_pad - n_pair), (0, 0)))
    valid_col = jnp.pad(jnp.ones((n_pair, 1), jnp.float32),
                        ((0, bn_pad - n_pair), (0, 0)))

    # torch.unique equivalent (host-side, data-dependent output shape).
    item_all = np.unique(np.concatenate([np.asarray(item_p), np.asarray(item_n)], axis=0))
    user_all = np.unique(np.asarray(user))
    n_item_u = int(item_all.shape[0])
    n_user_u = int(user_all.shape[0])

    def pad_rows(x):
        r = x.shape[0]
        rp = max(8, ((r + 7) // 8) * 8)
        return jnp.pad(x, ((0, rp - r), (0, 0)))

    it_int = pad_rows(items_int[item_all])
    it_pop = pad_rows(items_pop[item_all])
    us_int = pad_rows(users_int[user_all])
    us_pop = pad_rows(users_pop[user_all])
    ui_rows = it_int.shape[0]
    uu_rows = us_int.shape[0]

    kernel = functools.partial(
        _dice_loss_kernel,
        tile=tile,
        int_weight=float(int_weight),
        pop_weight=float(pop_weight),
        dis_pen=float(dis_pen),
        inv_n_pair=1.0 / float(n_pair),
        inv_item_denom=1.0 / float(n_item_u * E),
        inv_user_denom=1.0 / float(n_user_u * E))

    grid_spec = pltpu.PrefetchScalarGridSpec(
        num_scalar_prefetch=3,               # u_idx, ip_idx, in_idx -> SMEM
        grid=(num_tiles,),
        in_specs=[
            pl.BlockSpec((tile, 1), lambda i, u, p, n: (i, 0)),     # mask
            pl.BlockSpec((tile, 1), lambda i, u, p, n: (i, 0)),     # valid
            pl.BlockSpec(memory_space=pl.ANY),                      # users_int (HBM)
            pl.BlockSpec(memory_space=pl.ANY),                      # users_pop (HBM)
            pl.BlockSpec(memory_space=pl.ANY),                      # items_int (HBM)
            pl.BlockSpec(memory_space=pl.ANY),                      # items_pop (HBM)
            pl.BlockSpec((ui_rows, E), lambda i, u, p, n: (0, 0)),  # it_int (resident)
            pl.BlockSpec((ui_rows, E), lambda i, u, p, n: (0, 0)),  # it_pop
            pl.BlockSpec((uu_rows, E), lambda i, u, p, n: (0, 0)),  # us_int
            pl.BlockSpec((uu_rows, E), lambda i, u, p, n: (0, 0)),  # us_pop
        ],
        out_specs=pl.BlockSpec((1, 1), lambda i, u, p, n: (0, 0)),
        scratch_shapes=[pltpu.VMEM((2 * tile, E), jnp.float32)] * 6   # double-buffered gathers
                       + [pltpu.SemaphoreType.DMA((6, 2)),
                          pltpu.VMEM((1, 1), jnp.float32)],           # loss accumulator
    )

    loss = pl.pallas_call(
        kernel,
        out_shape=jax.ShapeDtypeStruct((1, 1), jnp.float32),
        grid_spec=grid_spec,
        compiler_params=pltpu.CompilerParams(
            dimension_semantics=("arbitrary",)),   # grid axis is a reduction
    )(u_idx, ip_idx, in_idx,
      mask_col, valid_col,
      users_int, users_pop, items_int, items_pop,
      it_int, it_pop, us_int, us_pop)
    return loss[0, 0]


def dice_forward_ref(params, user, item_p, item_n, mask,
                     *, int_weight, pop_weight, dis_pen):
    """Plain-JAX reference matching the PyTorch forward (dis_loss='L2')."""
    users_int, users_pop, items_int, items_pop = params
    u_int = users_int[user]
    u_pop = users_pop[user]
    ip_int = items_int[item_p]
    ip_pop = items_pop[item_p]
    in_int = items_int[item_n]
    in_pop = items_pop[item_n]
    m = mask.astype(jnp.float32)

    log_sig = jax.nn.log_sigmoid

    p_int = jnp.sum(u_int * ip_int, -1)
    n_int = jnp.sum(u_int * in_int, -1)
    p_pop = jnp.sum(u_pop * ip_pop, -1)
    n_pop = jnp.sum(u_pop * in_pop, -1)
    p_tot = p_int + p_pop
    n_tot = n_int + n_pop

    loss_int = -jnp.mean(m * log_sig(p_int - n_int))
    loss_pop = (-jnp.mean(m * log_sig(n_pop - p_pop))
                - jnp.mean((1.0 - m) * log_sig(p_pop - n_pop)))
    loss_total = -jnp.mean(log_sig(p_tot - n_tot))

    item_all = np.unique(np.concatenate([np.asarray(item_p), np.asarray(item_n)], axis=0))
    user_all = np.unique(np.asarray(user))
    disc = (jnp.mean((items_int[item_all] - items_pop[item_all]) ** 2)
            + jnp.mean((users_int[user_all] - users_pop[user_all]) ** 2))
    return (int_weight * loss_int + pop_weight * loss_pop
            + loss_total - dis_pen * disc)


if __name__ == "__main__":
    num_users, num_items, E = 50, 100, 32
    B, N = 4, 8
    int_weight, pop_weight, dis_pen = 0.1, 0.1, 0.01

    key = jax.random.PRNGKey(0)
    k1, k2, k3, k4, k5, k6, k7, k8 = jax.random.split(key, 8)
    stdv = 1.0 / math.sqrt(E)
    users_int = jax.random.uniform(k1, (num_users, E), jnp.float32, -stdv, stdv)
    users_pop = jax.random.uniform(k2, (num_users, E), jnp.float32, -stdv, stdv)
    items_int = jax.random.uniform(k3, (num_items, E), jnp.float32, -stdv, stdv)
    items_pop = jax.random.uniform(k4, (num_items, E), jnp.float32, -stdv, stdv)
    params = (users_int, users_pop, items_int, items_pop)

    user = jax.random.randint(k5, (B, N), 0, num_users, dtype=jnp.int32)
    item_p = jax.random.randint(k6, (B, N), 0, num_items, dtype=jnp.int32)
    item_n = jax.random.randint(k7, (B, N), 0, num_items, dtype=jnp.int32)
    mask = jax.random.bernoulli(k8, 0.5, (B, N))

    loss = dice_forward_pallas(params, user, item_p, item_n, mask,
                               int_weight=int_weight, pop_weight=pop_weight,
                               dis_pen=dis_pen, tile=8)
    loss = jax.block_until_ready(loss)

    loss_ref = dice_forward_ref(params, user, item_p, item_n, mask,
                                int_weight=int_weight, pop_weight=pop_weight,
                                dis_pen=dis_pen)
    np.testing.assert_allclose(np.asarray(loss), np.asarray(loss_ref),
                               rtol=1e-5, atol=1e-5)
    print("KERNEL_OK")
</pallas_src>

<mosaic_0001>
module attributes {stable_mosaic.version = 11 : i64} {
  func.func @_dice_loss_kernel(%arg0: i32, %arg1: memref<32xi32, #tpu.memory_space<smem>>, %arg2: memref<32xi32, #tpu.memory_space<smem>>, %arg3: memref<32xi32, #tpu.memory_space<smem>>, %arg4: memref<8x1xf32, #tpu.memory_space<vmem>>, %arg5: memref<8x1xf32, #tpu.memory_space<vmem>>, %arg6: memref<50x32xf32, #tpu.memory_space<any>>, %arg7: memref<50x32xf32, #tpu.memory_space<any>>, %arg8: memref<100x32xf32, #tpu.memory_space<any>>, %arg9: memref<100x32xf32, #tpu.memory_space<any>>, %arg10: memref<48x32xf32, #tpu.memory_space<vmem>>, %arg11: memref<48x32xf32, #tpu.memory_space<vmem>>, %arg12: memref<32x32xf32, #tpu.memory_space<vmem>>, %arg13: memref<32x32xf32, #tpu.memory_space<vmem>>, %arg14: memref<1x1xf32, #tpu.memory_space<vmem>>, %arg15: memref<16x32xf32, #tpu.memory_space<vmem>>, %arg16: memref<16x32xf32, #tpu.memory_space<vmem>>, %arg17: memref<16x32xf32, #tpu.memory_space<vmem>>, %arg18: memref<16x32xf32, #tpu.memory_space<vmem>>, %arg19: memref<16x32xf32, #tpu.memory_space<vmem>>, %arg20: memref<16x32xf32, #tpu.memory_space<vmem>>, %arg21: memref<6x2x!tpu.dma_semaphore, #tpu.memory_space<semaphore_mem>>, %arg22: memref<1x1xf32, #tpu.memory_space<vmem>>) attributes {dimension_semantics = [#tpu.dimension_semantics<arbitrary>], iteration_bounds = array<i64: 4>, scalar_prefetch = 3 : i64, scratch_operands = 8 : i64, tpu.core_type = #tpu.core_type<tc>, window_params = [{transform_indices = @transform_0, window_bounds = array<i64: 8, 1>}, {transform_indices = @transform_1, window_bounds = array<i64: 8, 1>}, {}, {}, {}, {}, {pipeline_mode = #tpu.pipeline_mode<synchronous>, transform_indices = @transform_6, window_bounds = array<i64: 48, 32>}, {pipeline_mode = #tpu.pipeline_mode<synchronous>, transform_indices = @transform_7, window_bounds = array<i64: 48, 32>}, {pipeline_mode = #tpu.pipeline_mode<synchronous>, transform_indices = @transform_8, window_bounds = array<i64: 32, 32>}, {pipeline_mode = #tpu.pipeline_mode<synchronous>, transform_indices = @transform_9, window_bounds = array<i64: 32, 32>}, {pipeline_mode = #tpu.pipeline_mode<synchronous>, transform_indices = @transform_10, window_bounds = array<i64: 1, 1>}]} {
    %c1_i32 = arith.constant 1 : i32
    %0 = arith.andi %arg0, %c1_i32 : i32
    %c0_i32 = arith.constant 0 : i32
    %1 = arith.cmpi eq, %arg0, %c0_i32 : i32
    %2 = arith.extui %1 : i1 to i32
    %c0_i32_0 = arith.constant 0 : i32
    %3 = arith.cmpi ne, %2, %c0_i32_0 : i32
    scf.if %3 {
      %c1_i32_267 = arith.constant 1 : i32
      %271 = arith.andi %arg0, %c1_i32_267 : i32
      %c8_i32_268 = arith.constant 8 : i32
      %272 = arith.muli %arg0, %c8_i32_268 : i32
      %c8_i32_269 = arith.constant 8 : i32
      %273 = arith.muli %271, %c8_i32_269 : i32
      %c0_i32_270 = arith.constant 0 : i32
      %274 = arith.addi %272, %c0_i32_270 : i32
      %275 = arith.index_cast %274 : i32 to index
      %276 = memref.load %arg1[%275] : memref<32xi32, #tpu.memory_space<smem>>
      %c0_i32_271 = arith.constant 0 : i32
      %277 = arith.addi %272, %c0_i32_271 : i32
      %278 = arith.index_cast %277 : i32 to index
      %279 = memref.load %arg2[%278] : memref<32xi32, #tpu.memory_space<smem>>
      %c0_i32_272 = arith.constant 0 : i32
      %280 = arith.addi %272, %c0_i32_272 : i32
      %281 = arith.index_cast %280 : i32 to index
      %282 = memref.load %arg3[%281] : memref<32xi32, #tpu.memory_space<smem>>
      %c0_i32_273 = arith.constant 0 : i32
      %283 = arith.addi %273, %c0_i32_273 : i32
      %c0_i32_274 = arith.constant 0 : i32
      %c0_i32_275 = arith.constant 0 : i32
      %284 = tpu.memref_slice %arg6[%276, %c0_i32_275] : memref<50x32xf32, #tpu.memory_space<any>> -> memref<1x32xf32, #tpu.memory_space<any>>
      %c0_i32_276 = arith.constant 0 : i32
      %285 = tpu.memref_slice %arg15[%283, %c0_i32_276] : memref<16x32xf32, #tpu.memory_space<vmem>> -> memref<1x32xf32, #tpu.memory_space<vmem>>
      %286 = tpu.memref_slice %arg21[%c0_i32_274, %271] : memref<6x2x!tpu.dma_semaphore, #tpu.memory_space<semaphore_mem>> -> memref<1x1x!tpu.dma_semaphore, #tpu.memory_space<semaphore_mem>>
      %287 = tpu.memref_squeeze %286 : memref<1x1x!tpu.dma_semaphore, #tpu.memory_space<semaphore_mem>> -> memref<!tpu.dma_semaphore, #tpu.memory_space<semaphore_mem>>
      tpu.enqueue_dma source(%284 : memref<1x32xf32, #tpu.memory_space<any>>) target(%285 : memref<1x32xf32, #tpu.memory_space<vmem>>) target_semaphore(%287 : memref<!tpu.dma_semaphore, #tpu.memory_space<semaphore_mem>>)
      %c0_i32_277 = arith.constant 0 : i32
      %288 = arith.addi %273, %c0_i32_277 : i32
      %c1_i32_278 = arith.constant 1 : i32
      %c0_i32_279 = arith.constant 0 : i32
      %289 = tpu.memref_slice %arg7[%276, %c0_i32_279] : memref<50x32xf32, #tpu.memory_space<any>> -> memref<1x32xf32, #tpu.memory_space<any>>
      %c0_i32_280 = arith.constant 0 : i32
      %290 = tpu.memref_slice %arg16[%288, %c0_i32_280] : memref<16x32xf32, #tpu.memory_space<vmem>> -> memref<1x32xf32, #tpu.memory_space<vmem>>
      %291 = tpu.memref_slice %arg21[%c1_i32_278, %271] : memref<6x2x!tpu.dma_semaphore, #tpu.memory_space<semaphore_mem>> -> memref<1x1x!tpu.dma_semaphore, #tpu.memory_space<semaphore_mem>>
      %292 = tpu.memref_squeeze %291 : memref<1x1x!tpu.dma_semaphore, #tpu.memory_space<semaphore_mem>> -> memref<!tpu.dma_semaphore, #tpu.memory_space<semaphore_mem>>
      tpu.enqueue_dma source(%289 : memref<1x32xf32, #tpu.memory_space<any>>) target(%290 : memref<1x32xf32, #tpu.memory_space<vmem>>) target_semaphore(%292 : memref<!tpu.dma_semaphore, #tpu.memory_space<semaphore_mem>>)
      %c0_i32_281 = arith.constant 0 : i32
      %293 = arith.addi %273, %c0_i32_281 : i32
      %c2_i32_282 = arith.constant 2 : i32
      %c0_i32_283 = arith.constant 0 : i32
      %294 = tpu.memref_slice %arg8[%279, %c0_i32_283] : memref<100x32xf32, #tpu.memory_space<any>> -> memref<1x32xf32, #tpu.memory_space<any>>
      %c0_i32_284 = arith.constant 0 : i32
      %295 = tpu.memref_slice %arg17[%293, %c0_i32_284] : memref<16x32xf32, #tpu.memory_space<vmem>> -> memref<1x32xf32, #tpu.memory_space<vmem>>
      %296 = tpu.memref_slice %arg21[%c2_i32_282, %271] : memref<6x2x!tpu.dma_semaphore, #tpu.memory_space<semaphore_mem>> -> memref<1x1x!tpu.dma_semaphore, #tpu.memory_space<semaphore_mem>>
      %297 = tpu.memref_squeeze %296 : memref<1x1x!tpu.dma_semaphore, #tpu.memory_space<semaphore_mem>> -> memref<!tpu.dma_semaphore, #tpu.memory_space<semaphore_mem>>
      tpu.enqueue_dma source(%294 : memref<1x32xf32, #tpu.memory_space<any>>) target(%295 : memref<1x32xf32, #tpu.memory_space<vmem>>) target_semaphore(%297 : memref<!tpu.dma_semaphore, #tpu.memory_space<semaphore_mem>>)
      %c0_i32_285 = arith.constant 0 : i32
      %298 = arith.addi %273, %c0_i32_285 : i32
      %c3_i32_286 = arith.constant 3 : i32
      %c0_i32_287 = arith.constant 0 : i32
      %299 = tpu.memref_slice %arg9[%279, %c0_i32_287] : memref<100x32xf32, #tpu.memory_space<any>> -> memref<1x32xf32, #tpu.memory_space<any>>
      %c0_i32_288 = arith.constant 0 : i32
      %300 = tpu.memref_slice %arg18[%298, %c0_i32_288] : memref<16x32xf32, #tpu.memory_space<vmem>> -> memref<1x32xf32, #tpu.memory_space<vmem>>
      %301 = tpu.memref_slice %arg21[%c3_i32_286, %271] : memref<6x2x!tpu.dma_semaphore, #tpu.memory_space<semaphore_mem>> -> memref<1x1x!tpu.dma_semaphore, #tpu.memory_space<semaphore_mem>>
      %302 = tpu.memref_squeeze %301 : memref<1x1x!tpu.dma_semaphore, #tpu.memory_space<semaphore_mem>> -> memref<!tpu.dma_semaphore, #tpu.memory_space<semaphore_mem>>
      tpu.enqueue_dma source(%299 : memref<1x32xf32, #tpu.memory_space<any>>) target(%300 : memref<1x32xf32, #tpu.memory_space<vmem>>) target_semaphore(%302 : memref<!tpu.dma_semaphore, #tpu.memory_space<semaphore_mem>>)
      %c0_i32_289 = arith.constant 0 : i32
      %303 = arith.addi %273, %c0_i32_289 : i32
      %c4_i32_290 = arith.constant 4 : i32
      %c0_i32_291 = arith.constant 0 : i32
      %304 = tpu.memref_slice %arg8[%282, %c0_i32_291] : memref<100x32xf32, #tpu.memory_space<any>> -> memref<1x32xf32, #tpu.memory_space<any>>
      %c0_i32_292 = arith.constant 0 : i32
      %305 = tpu.memref_slice %arg19[%303, %c0_i32_292] : memref<16x32xf32, #tpu.memory_space<vmem>> -> memref<1x32xf32, #tpu.memory_space<vmem>>
      %306 = tpu.memref_slice %arg21[%c4_i32_290, %271] : memref<6x2x!tpu.dma_semaphore, #tpu.memory_space<semaphore_mem>> -> memref<1x1x!tpu.dma_semaphore, #tpu.memory_space<semaphore_mem>>
      %307 = tpu.memref_squeeze %306 : memref<1x1x!tpu.dma_semaphore, #tpu.memory_space<semaphore_mem>> -> memref<!tpu.dma_semaphore, #tpu.memory_space<semaphore_mem>>
      tpu.enqueue_dma source(%304 : memref<1x32xf32, #tpu.memory_space<any>>) target(%305 : memref<1x32xf32, #tpu.memory_space<vmem>>) target_semaphore(%307 : memref<!tpu.dma_semaphore, #tpu.memory_space<semaphore_mem>>)
      %c0_i32_293 = arith.constant 0 : i32
      %308 = arith.addi %273, %c0_i32_293 : i32
      %c5_i32_294 = arith.constant 5 : i32
      %c0_i32_295 = arith.constant 0 : i32
      %309 = tpu.memref_slice %arg9[%282, %c0_i32_295] : memref<100x32xf32, #tpu.memory_space<any>> -> memref<1x32xf32, #tpu.memory_space<any>>
      %c0_i32_296 = arith.constant 0 : i32
      %310 = tpu.memref_slice %arg20[%308, %c0_i32_296] : memref<16x32xf32, #tpu.memory_space<vmem>> -> memref<1x32xf32, #tpu.memory_space<vmem>>
      %311 = tpu.memref_slice %arg21[%c5_i32_294, %271] : memref<6x2x!tpu.dma_semaphore, #tpu.memory_space<semaphore_mem>> -> memref<1x1x!tpu.dma_semaphore, #tpu.memory_space<semaphore_mem>>
      %312 = tpu.memref_squeeze %311 : memref<1x1x!tpu.dma_semaphore, #tpu.memory_space<semaphore_mem>> -> memref<!tpu.dma_semaphore, #tpu.memory_space<semaphore_mem>>
      tpu.enqueue_dma source(%309 : memref<1x32xf32, #tpu.memory_space<any>>) target(%310 : memref<1x32xf32, #tpu.memory_space<vmem>>) target_semaphore(%312 : memref<!tpu.dma_semaphore, #tpu.memory_space<semaphore_mem>>)
      %c1_i32_297 = arith.constant 1 : i32
      %313 = arith.addi %272, %c1_i32_297 : i32
      %314 = arith.index_cast %313 : i32 to index
      %315 = memref.load %arg1[%314] : memref<32xi32, #tpu.memory_space<smem>>
      %c1_i32_298 = arith.constant 1 : i32
      %316 = arith.addi %272, %c1_i32_298 : i32
      %317 = arith.index_cast %316 : i32 to index
      %318 = memref.load %arg2[%317] : memref<32xi32, #tpu.memory_space<smem>>
      %c1_i32_299 = arith.constant 1 : i32
      %319 = arith.addi %272, %c1_i32_299 : i32
      %320 = arith.index_cast %319 : i32 to index
      %321 = memref.load %arg3[%320] : memref<32xi32, #tpu.memory_space<smem>>
      %c1_i32_300 = arith.constant 1 : i32
      %322 = arith.addi %273, %c1_i32_300 : i32
      %c0_i32_301 = arith.constant 0 : i32
      %c0_i32_302 = arith.constant 0 : i32
      %323 = tpu.memref_slice %arg6[%315, %c0_i32_302] : memref<50x32xf32, #tpu.memory_space<any>> -> memref<1x32xf32, #tpu.memory_space<any>>
      %c0_i32_303 = arith.constant 0 : i32
      %324 = tpu.memref_slice %arg15[%322, %c0_i32_303] : memref<16x32xf32, #tpu.memory_space<vmem>> -> memref<1x32xf32, #tpu.memory_space<vmem>>
      %325 = tpu.memref_slice %arg21[%c0_i32_301, %271] : memref<6x2x!tpu.dma_semaphore, #tpu.memory_space<semaphore_mem>> -> memref<1x1x!tpu.dma_semaphore, #tpu.memory_space<semaphore_mem>>
      %326 = tpu.memref_squeeze %325 : memref<1x1x!tpu.dma_semaphore, #tpu.memory_space<semaphore_mem>> -> memref<!tpu.dma_semaphore, #tpu.memory_space<semaphore_mem>>
      tpu.enqueue_dma source(%323 : memref<1x32xf32, #tpu.memory_space<any>>) target(%324 : memref<1x32xf32, #tpu.memory_space<vmem>>) target_semaphore(%326 : memref<!tpu.dma_semaphore, #tpu.memory_space<semaphore_mem>>)
      %c1_i32_304 = arith.constant 1 : i32
      %327 = arith.addi %273, %c1_i32_304 : i32
      %c1_i32_305 = arith.constant 1 : i32
      %c0_i32_306 = arith.constant 0 : i32
      %328 = tpu.memref_slice %arg7[%315, %c0_i32_306] : memref<50x32xf32, #tpu.memory_space<any>> -> memref<1x32xf32, #tpu.memory_space<any>>
      %c0_i32_307 = arith.constant 0 : i32
      %329 = tpu.memref_slice %arg16[%327, %c0_i32_307] : memref<16x32xf32, #tpu.memory_space<vmem>> -> memref<1x32xf32, #tpu.memory_space<vmem>>
      %330 = tpu.memref_slice %arg21[%c1_i32_305, %271] : memref<6x2x!tpu.dma_semaphore, #tpu.memory_space<semaphore_mem>> -> memref<1x1x!tpu.dma_semaphore, #tpu.memory_space<semaphore_mem>>
      %331 = tpu.memref_squeeze %330 : memref<1x1x!tpu.dma_semaphore, #tpu.memory_space<semaphore_mem>> -> memref<!tpu.dma_semaphore, #tpu.memory_space<semaphore_mem>>
      tpu.enqueue_dma source(%328 : memref<1x32xf32, #tpu.memory_space<any>>) target(%329 : memref<1x32xf32, #tpu.memory_space<vmem>>) target_semaphore(%331 : memref<!tpu.dma_semaphore, #tpu.memory_space<semaphore_mem>>)
      %c1_i32_308 = arith.constant 1 : i32
      %332 = arith.addi %273, %c1_i32_308 : i32
      %c2_i32_309 = arith.constant 2 : i32
      %c0_i32_310 = arith.constant 0 : i32
      %333 = tpu.memref_slice %arg8[%318, %c0_i32_310] : memref<100x32xf32, #tpu.memory_space<any>> -> memref<1x32xf32, #tpu.memory_space<any>>
      %c0_i32_311 = arith.constant 0 : i32
      %334 = tpu.memref_slice %arg17[%332, %c0_i32_311] : memref<16x32xf32, #tpu.memory_space<vmem>> -> memref<1x32xf32, #tpu.memory_space<vmem>>
      %335 = tpu.memref_slice %arg21[%c2_i32_309, %271] : memref<6x2x!tpu.dma_semaphore, #tpu.memory_space<semaphore_mem>> -> memref<1x1x!tpu.dma_semaphore, #tpu.memory_space<semaphore_mem>>
      %336 = tpu.memref_squeeze %335 : memref<1x1x!tpu.dma_semaphore, #tpu.memory_space<semaphore_mem>> -> memref<!tpu.dma_semaphore, #tpu.memory_space<semaphore_mem>>
      tpu.enqueue_dma source(%333 : memref<1x32xf32, #tpu.memory_space<any>>) target(%334 : memref<1x32xf32, #tpu.memory_space<vmem>>) target_semaphore(%336 : memref<!tpu.dma_semaphore, #tpu.memory_space<semaphore_mem>>)
      %c1_i32_312 = arith.constant 1 : i32
      %337 = arith.addi %273, %c1_i32_312 : i32
      %c3_i32_313 = arith.constant 3 : i32
      %c0_i32_314 = arith.constant 0 : i32
      %338 = tpu.memref_slice %arg9[%318, %c0_i32_314] : memref<100x32xf32, #tpu.memory_space<any>> -> memref<1x32xf32, #tpu.memory_space<any>>
      %c0_i32_315 = arith.constant 0 : i32
      %339 = tpu.memref_slice %arg18[%337, %c0_i32_315] : memref<16x32xf32, #tpu.memory_space<vmem>> -> memref<1x32xf32, #tpu.memory_space<vmem>>
      %340 = tpu.memref_slice %arg21[%c3_i32_313, %271] : memref<6x2x!tpu.dma_semaphore, #tpu.memory_space<semaphore_mem>> -> memref<1x1x!tpu.dma_semaphore, #tpu.memory_space<semaphore_mem>>
      %341 = tpu.memref_squeeze %340 : memref<1x1x!tpu.dma_semaphore, #tpu.memory_space<semaphore_mem>> -> memref<!tpu.dma_semaphore, #tpu.memory_space<semaphore_mem>>
      tpu.enqueue_dma source(%338 : memref<1x32xf32, #tpu.memory_space<any>>) target(%339 : memref<1x32xf32, #tpu.memory_space<vmem>>) target_semaphore(%341 : memref<!tpu.dma_semaphore, #tpu.memory_space<semaphore_mem>>)
      %c1_i32_316 = arith.constant 1 : i32
      %342 = arith.addi %273, %c1_i32_316 : i32
      %c4_i32_317 = arith.constant 4 : i32
      %c0_i32_318 = arith.constant 0 : i32
      %343 = tpu.memref_slice %arg8[%321, %c0_i32_318] : memref<100x32xf32, #tpu.memory_space<any>> -> memref<1x32xf32, #tpu.memory_space<any>>
      %c0_i32_319 = arith.constant 0 : i32
      %344 = tpu.memref_slice %arg19[%342, %c0_i32_319] : memref<16x32xf32, #tpu.memory_space<vmem>> -> memref<1x32xf32, #tpu.memory_space<vmem>>
      %345 = tpu.memref_slice %arg21[%c4_i32_317, %271] : memref<6x2x!tpu.dma_semaphore, #tpu.memory_space<semaphore_mem>> -> memref<1x1x!tpu.dma_semaphore, #tpu.memory_space<semaphore_mem>>
      %346 = tpu.memref_squeeze %345 : memref<1x1x!tpu.dma_semaphore, #tpu.memory_space<semaphore_mem>> -> memref<!tpu.dma_semaphore, #tpu.memory_space<semaphore_mem>>
      tpu.enqueue_dma source(%343 : memref<1x32xf32, #tpu.memory_space<any>>) target(%344 : memref<1x32xf32, #tpu.memory_space<vmem>>) target_semaphore(%346 : memref<!tpu.dma_semaphore, #tpu.memory_space<semaphore_mem>>)
      %c1_i32_320 = arith.constant 1 : i32
      %347 = arith.addi %273, %c1_i32_320 : i32
      %c5_i32_321 = arith.constant 5 : i32
      %c0_i32_322 = arith.constant 0 : i32
      %348 = tpu.memref_slice %arg9[%321, %c0_i32_322] : memref<100x32xf32, #tpu.memory_space<any>> -> memref<1x32xf32, #tpu.memory_space<any>>
      %c0_i32_323 = arith.constant 0 : i32
      %349 = tpu.memref_slice %arg20[%347, %c0_i32_323] : memref<16x32xf32, #tpu.memory_space<vmem>> -> memref<1x32xf32, #tpu.memory_space<vmem>>
      %350 = tpu.memref_slice %arg21[%c5_i32_321, %271] : memref<6x2x!tpu.dma_semaphore, #tpu.memory_space<semaphore_mem>> -> memref<1x1x!tpu.dma_semaphore, #tpu.memory_space<semaphore_mem>>
      %351 = tpu.memref_squeeze %350 : memref<1x1x!tpu.dma_semaphore, #tpu.memory_space<semaphore_mem>> -> memref<!tpu.dma_semaphore, #tpu.memory_space<semaphore_mem>>
      tpu.enqueue_dma source(%348 : memref<1x32xf32, #tpu.memory_space<any>>) target(%349 : memref<1x32xf32, #tpu.memory_space<vmem>>) target_semaphore(%351 : memref<!tpu.dma_semaphore, #tpu.memory_space<semaphore_mem>>)
      %c2_i32_324 = arith.constant 2 : i32
      %352 = arith.addi %272, %c2_i32_324 : i32
      %353 = arith.index_cast %352 : i32 to index
      %354 = memref.load %arg1[%353] : memref<32xi32, #tpu.memory_space<smem>>
      %c2_i32_325 = arith.constant 2 : i32
      %355 = arith.addi %272, %c2_i32_325 : i32
      %356 = arith.index_cast %355 : i32 to index
      %357 = memref.load %arg2[%356] : memref<32xi32, #tpu.memory_space<smem>>
      %c2_i32_326 = arith.constant 2 : i32
      %358 = arith.addi %272, %c2_i32_326 : i32
      %359 = arith.index_cast %358 : i32 to index
      %360 = memref.load %arg3[%359] : memref<32xi32, #tpu.memory_space<smem>>
      %c2_i32_327 = arith.constant 2 : i32
      %361 = arith.addi %273, %c2_i32_327 : i32
      %c0_i32_328 = arith.constant 0 : i32
      %c0_i32_329 = arith.constant 0 : i32
      %362 = tpu.memref_slice %arg6[%354, %c0_i32_329] : memref<50x32xf32, #tpu.memory_space<any>> -> memref<1x32xf32, #tpu.memory_space<any>>
      %c0_i32_330 = arith.constant 0 : i32
      %363 = tpu.memref_slice %arg15[%361, %c0_i32_330] : memref<16x32xf32, #tpu.memory_space<vmem>> -> memref<1x32xf32, #tpu.memory_space<vmem>>
      %364 = tpu.memref_slice %arg21[%c0_i32_328, %271] : memref<6x2x!tpu.dma_semaphore, #tpu.memory_space<semaphore_mem>> -> memref<1x1x!tpu.dma_semaphore, #tpu.memory_space<semaphore_mem>>
      %365 = tpu.memref_squeeze %364 : memref<1x1x!tpu.dma_semaphore, #tpu.memory_space<semaphore_mem>> -> memref<!tpu.dma_semaphore, #tpu.memory_space<semaphore_mem>>
      tpu.enqueue_dma source(%362 : memref<1x32xf32, #tpu.memory_space<any>>) target(%363 : memref<1x32xf32, #tpu.memory_space<vmem>>) target_semaphore(%365 : memref<!tpu.dma_semaphore, #tpu.memory_space<semaphore_mem>>)
      %c2_i32_331 = arith.constant 2 : i32
      %366 = arith.addi %273, %c2_i32_331 : i32
      %c1_i32_332 = arith.constant 1 : i32
      %c0_i32_333 = arith.constant 0 : i32
      %367 = tpu.memref_slice %arg7[%354, %c0_i32_333] : memref<50x32xf32, #tpu.memory_space<any>> -> memref<1x32xf32, #tpu.memory_space<any>>
      %c0_i32_334 = arith.constant 0 : i32
      %368 = tpu.memref_slice %arg16[%366, %c0_i32_334] : memref<16x32xf32, #tpu.memory_space<vmem>> -> memref<1x32xf32, #tpu.memory_space<vmem>>
      %369 = tpu.memref_slice %arg21[%c1_i32_332, %271] : memref<6x2x!tpu.dma_semaphore, #tpu.memory_space<semaphore_mem>> -> memref<1x1x!tpu.dma_semaphore, #tpu.memory_space<semaphore_mem>>
      %370 = tpu.memref_squeeze %369 : memref<1x1x!tpu.dma_semaphore, #tpu.memory_space<semaphore_mem>> -> memref<!tpu.dma_semaphore, #tpu.memory_space<semaphore_mem>>
      tpu.enqueue_dma source(%367 : memref<1x32xf32, #tpu.memory_space<any>>) target(%368 : memref<1x32xf32, #tpu.memory_space<vmem>>) target_semaphore(%370 : memref<!tpu.dma_semaphore, #tpu.memory_space<semaphore_mem>>)
      %c2_i32_335 = arith.constant 2 : i32
      %371 = arith.addi %273, %c2_i32_335 : i32
      %c2_i32_336 = arith.constant 2 : i32
      %c0_i32_337 = arith.constant 0 : i32
      %372 = tpu.memref_slice %arg8[%357, %c0_i32_337] : memref<100x32xf32, #tpu.memory_space<any>> -> memref<1x32xf32, #tpu.memory_space<any>>
      %c0_i32_338 = arith.constant 0 : i32
      %373 = tpu.memref_slice %arg17[%371, %c0_i32_338] : memref<16x32xf32, #tpu.memory_space<vmem>> -> memref<1x32xf32, #tpu.memory_space<vmem>>
      %374 = tpu.memref_slice %arg21[%c2_i32_336, %271] : memref<6x2x!tpu.dma_semaphore, #tpu.memory_space<semaphore_mem>> -> memref<1x1x!tpu.dma_semaphore, #tpu.memory_space<semaphore_mem>>
      %375 = tpu.memref_squeeze %374 : memref<1x1x!tpu.dma_semaphore, #tpu.memory_space<semaphore_mem>> -> memref<!tpu.dma_semaphore, #tpu.memory_space<semaphore_mem>>
      tpu.enqueue_dma source(%372 : memref<1x32xf32, #tpu.memory_space<any>>) target(%373 : memref<1x32xf32, #tpu.memory_space<vmem>>) target_semaphore(%375 : memref<!tpu.dma_semaphore, #tpu.memory_space<semaphore_mem>>)
      %c2_i32_339 = arith.constant 2 : i32
      %376 = arith.addi %273, %c2_i32_339 : i32
      %c3_i32_340 = arith.constant 3 : i32
      %c0_i32_341 = arith.constant 0 : i32
      %377 = tpu.memref_slice %arg9[%357, %c0_i32_341] : memref<100x32xf32, #tpu.memory_space<any>> -> memref<1x32xf32, #tpu.memory_space<any>>
      %c0_i32_342 = arith.constant 0 : i32
      %378 = tpu.memref_slice %arg18[%376, %c0_i32_342] : memref<16x32xf32, #tpu.memory_space<vmem>> -> memref<1x32xf32, #tpu.memory_space<vmem>>
      %379 = tpu.memref_slice %arg21[%c3_i32_340, %271] : memref<6x2x!tpu.dma_semaphore, #tpu.memory_space<semaphore_mem>> -> memref<1x1x!tpu.dma_semaphore, #tpu.memory_space<semaphore_mem>>
      %380 = tpu.memref_squeeze %379 : memref<1x1x!tpu.dma_semaphore, #tpu.memory_space<semaphore_mem>> -> memref<!tpu.dma_semaphore, #tpu.memory_space<semaphore_mem>>
      tpu.enqueue_dma source(%377 : memref<1x32xf32, #tpu.memory_space<any>>) target(%378 : memref<1x32xf32, #tpu.memory_space<vmem>>) target_semaphore(%380 : memref<!tpu.dma_semaphore, #tpu.memory_space<semaphore_mem>>)
      %c2_i32_343 = arith.constant 2 : i32
      %381 = arith.addi %273, %c2_i32_343 : i32
      %c4_i32_344 = arith.constant 4 : i32
      %c0_i32_345 = arith.constant 0 : i32
      %382 = tpu.memref_slice %arg8[%360, %c0_i32_345] : memref<100x32xf32, #tpu.memory_space<any>> -> memref<1x32xf32, #tpu.memory_space<any>>
      %c0_i32_346 = arith.constant 0 : i32
      %383 = tpu.memref_slice %arg19[%381, %c0_i32_346] : memref<16x32xf32, #tpu.memory_space<vmem>> -> memref<1x32xf32, #tpu.memory_space<vmem>>
      %384 = tpu.memref_slice %arg21[%c4_i32_344, %271] : memref<6x2x!tpu.dma_semaphore, #tpu.memory_space<semaphore_mem>> -> memref<1x1x!tpu.dma_semaphore, #tpu.memory_space<semaphore_mem>>
      %385 = tpu.memref_squeeze %384 : memref<1x1x!tpu.dma_semaphore, #tpu.memory_space<semaphore_mem>> -> memref<!tpu.dma_semaphore, #tpu.memory_space<semaphore_mem>>
      tpu.enqueue_dma source(%382 : memref<1x32xf32, #tpu.memory_space<any>>) target(%383 : memref<1x32xf32, #tpu.memory_space<vmem>>) target_semaphore(%385 : memref<!tpu.dma_semaphore, #tpu.memory_space<semaphore_mem>>)
      %c2_i32_347 = arith.constant 2 : i32
      %386 = arith.addi %273, %c2_i32_347 : i32
      %c5_i32_348 = arith.constant 5 : i32
      %c0_i32_349 = arith.constant 0 : i32
      %387 = tpu.memref_slice %arg9[%360, %c0_i32_349] : memref<100x32xf32, #tpu.memory_space<any>> -> memref<1x32xf32, #tpu.memory_space<any>>
      %c0_i32_350 = arith.constant 0 : i32
      %388 = tpu.memref_slice %arg20[%386, %c0_i32_350] : memref<16x32xf32, #tpu.memory_space<vmem>> -> memref<1x32xf32, #tpu.memory_space<vmem>>
      %389 = tpu.memref_slice %arg21[%c5_i32_348, %271] : memref<6x2x!tpu.dma_semaphore, #tpu.memory_space<semaphore_mem>> -> memref<1x1x!tpu.dma_semaphore, #tpu.memory_space<semaphore_mem>>
      %390 = tpu.memref_squeeze %389 : memref<1x1x!tpu.dma_semaphore, #tpu.memory_space<semaphore_mem>> -> memref<!tpu.dma_semaphore, #tpu.memory_space<semaphore_mem>>
      tpu.enqueue_dma source(%387 : memref<1x32xf32, #tpu.memory_space<any>>) target(%388 : memref<1x32xf32, #tpu.memory_space<vmem>>) target_semaphore(%390 : memref<!tpu.dma_semaphore, #tpu.memory_space<semaphore_mem>>)
      %c3_i32_351 = arith.constant 3 : i32
      %391 = arith.addi %272, %c3_i32_351 : i32
      %392 = arith.index_cast %391 : i32 to index
      %393 = memref.load %arg1[%392] : memref<32xi32, #tpu.memory_space<smem>>
      %c3_i32_352 = arith.constant 3 : i32
      %394 = arith.addi %272, %c3_i32_352 : i32
      %395 = arith.index_cast %394 : i32 to index
      %396 = memref.load %arg2[%395] : memref<32xi32, #tpu.memory_space<smem>>
      %c3_i32_353 = arith.constant 3 : i32
      %397 = arith.addi %272, %c3_i32_353 : i32
      %398 = arith.index_cast %397 : i32 to index
      %399 = memref.load %arg3[%398] : memref<32xi32, #tpu.memory_space<smem>>
      %c3_i32_354 = arith.constant 3 : i32
      %400 = arith.addi %273, %c3_i32_354 : i32
      %c0_i32_355 = arith.constant 0 : i32
      %c0_i32_356 = arith.constant 0 : i32
      %401 = tpu.memref_slice %arg6[%393, %c0_i32_356] : memref<50x32xf32, #tpu.memory_space<any>> -> memref<1x32xf32, #tpu.memory_space<any>>
      %c0_i32_357 = arith.constant 0 : i32
      %402 = tpu.memref_slice %arg15[%400, %c0_i32_357] : memref<16x32xf32, #tpu.memory_space<vmem>> -> memref<1x32xf32, #tpu.memory_space<vmem>>
      %403 = tpu.memref_slice %arg21[%c0_i32_355, %271] : memref<6x2x!tpu.dma_semaphore, #tpu.memory_space<semaphore_mem>> -> memref<1x1x!tpu.dma_semaphore, #tpu.memory_space<semaphore_mem>>
      %404 = tpu.memref_squeeze %403 : memref<1x1x!tpu.dma_semaphore, #tpu.memory_space<semaphore_mem>> -> memref<!tpu.dma_semaphore, #tpu.memory_space<semaphore_mem>>
      tpu.enqueue_dma source(%401 : memref<1x32xf32, #tpu.memory_space<any>>) target(%402 : memref<1x32xf32, #tpu.memory_space<vmem>>) target_semaphore(%404 : memref<!tpu.dma_semaphore, #tpu.memory_space<semaphore_mem>>)
      %c3_i32_358 = arith.constant 3 : i32
      %405 = arith.addi %273, %c3_i32_358 : i32
      %c1_i32_359 = arith.constant 1 : i32
      %c0_i32_360 = arith.constant 0 : i32
      %406 = tpu.memref_slice %arg7[%393, %c0_i32_360] : memref<50x32xf32, #tpu.memory_space<any>> -> memref<1x32xf32, #tpu.memory_space<any>>
      %c0_i32_361 = arith.constant 0 : i32
      %407 = tpu.memref_slice %arg16[%405, %c0_i32_361] : memref<16x32xf32, #tpu.memory_space<vmem>> -> memref<1x32xf32, #tpu.memory_space<vmem>>
      %408 = tpu.memref_slice %arg21[%c1_i32_359, %271] : memref<6x2x!tpu.dma_semaphore, #tpu.memory_space<semaphore_mem>> -> memref<1x1x!tpu.dma_semaphore, #tpu.memory_space<semaphore_mem>>
      %409 = tpu.memref_squeeze %408 : memref<1x1x!tpu.dma_semaphore, #tpu.memory_space<semaphore_mem>> -> memref<!tpu.dma_semaphore, #tpu.memory_space<semaphore_mem>>
      tpu.enqueue_dma source(%406 : memref<1x32xf32, #tpu.memory_space<any>>) target(%407 : memref<1x32xf32, #tpu.memory_space<vmem>>) target_semaphore(%409 : memref<!tpu.dma_semaphore, #tpu.memory_space<semaphore_mem>>)
      %c3_i32_362 = arith.constant 3 : i32
      %410 = arith.addi %273, %c3_i32_362 : i32
      %c2_i32_363 = arith.constant 2 : i32
      %c0_i32_364 = arith.constant 0 : i32
      %411 = tpu.memref_slice %arg8[%396, %c0_i32_364] : memref<100x32xf32, #tpu.memory_space<any>> -> memref<1x32xf32, #tpu.memory_space<any>>
      %c0_i32_365 = arith.constant 0 : i32
      %412 = tpu.memref_slice %arg17[%410, %c0_i32_365] : memref<16x32xf32, #tpu.memory_space<vmem>> -> memref<1x32xf32, #tpu.memory_space<vmem>>
      %413 = tpu.memref_slice %arg21[%c2_i32_363, %271] : memref<6x2x!tpu.dma_semaphore, #tpu.memory_space<semaphore_mem>> -> memref<1x1x!tpu.dma_semaphore, #tpu.memory_space<semaphore_mem>>
      %414 = tpu.memref_squeeze %413 : memref<1x1x!tpu.dma_semaphore, #tpu.memory_space<semaphore_mem>> -> memref<!tpu.dma_semaphore, #tpu.memory_space<semaphore_mem>>
      tpu.enqueue_dma source(%411 : memref<1x32xf32, #tpu.memory_space<any>>) target(%412 : memref<1x32xf32, #tpu.memory_space<vmem>>) target_semaphore(%414 : memref<!tpu.dma_semaphore, #tpu.memory_space<semaphore_mem>>)
      %c3_i32_366 = arith.constant 3 : i32
      %415 = arith.addi %273, %c3_i32_366 : i32
      %c3_i32_367 = arith.constant 3 : i32
      %c0_i32_368 = arith.constant 0 : i32
      %416 = tpu.memref_slice %arg9[%396, %c0_i32_368] : memref<100x32xf32, #tpu.memory_space<any>> -> memref<1x32xf32, #tpu.memory_space<any>>
      %c0_i32_369 = arith.constant 0 : i32
      %417 = tpu.memref_slice %arg18[%415, %c0_i32_369] : memref<16x32xf32, #tpu.memory_space<vmem>> -> memref<1x32xf32, #tpu.memory_space<vmem>>
      %418 = tpu.memref_slice %arg21[%c3_i32_367, %271] : memref<6x2x!tpu.dma_semaphore, #tpu.memory_space<semaphore_mem>> -> memref<1x1x!tpu.dma_semaphore, #tpu.memory_space<semaphore_mem>>
      %419 = tpu.memref_squeeze %418 : memref<1x1x!tpu.dma_semaphore, #tpu.memory_space<semaphore_mem>> -> memref<!tpu.dma_semaphore, #tpu.memory_space<semaphore_mem>>
      tpu.enqueue_dma source(%416 : memref<1x32xf32, #tpu.memory_space<any>>) target(%417 : memref<1x32xf32, #tpu.memory_space<vmem>>) target_semaphore(%419 : memref<!tpu.dma_semaphore, #tpu.memory_space<semaphore_mem>>)
      %c3_i32_370 = arith.constant 3 : i32
      %420 = arith.addi %273, %c3_i32_370 : i32
      %c4_i32_371 = arith.constant 4 : i32
      %c0_i32_372 = arith.constant 0 : i32
      %421 = tpu.memref_slice %arg8[%399, %c0_i32_372] : memref<100x32xf32, #tpu.memory_space<any>> -> memref<1x32xf32, #tpu.memory_space<any>>
      %c0_i32_373 = arith.constant 0 : i32
      %422 = tpu.memref_slice %arg19[%420, %c0_i32_373] : memref<16x32xf32, #tpu.memory_space<vmem>> -> memref<1x32xf32, #tpu.memory_space<vmem>>
      %423 = tpu.memref_slice %arg21[%c4_i32_371, %271] : memref<6x2x!tpu.dma_semaphore, #tpu.memory_space<semaphore_mem>> -> memref<1x1x!tpu.dma_semaphore, #tpu.memory_space<semaphore_mem>>
      %424 = tpu.memref_squeeze %423 : memref<1x1x!tpu.dma_semaphore, #tpu.memory_space<semaphore_mem>> -> memref<!tpu.dma_semaphore, #tpu.memory_space<semaphore_mem>>
      tpu.enqueue_dma source(%421 : memref<1x32xf32, #tpu.memory_space<any>>) target(%422 : memref<1x32xf32, #tpu.memory_space<vmem>>) target_semaphore(%424 : memref<!tpu.dma_semaphore, #tpu.memory_space<semaphore_mem>>)
      %c3_i32_374 = arith.constant 3 : i32
      %425 = arith.addi %273, %c3_i32_374 : i32
      %c5_i32_375 = arith.constant 5 : i32
      %c0_i32_376 = arith.constant 0 : i32
      %426 = tpu.memref_slice %arg9[%399, %c0_i32_376] : memref<100x32xf32, #tpu.memory_space<any>> -> memref<1x32xf32, #tpu.memory_space<any>>
      %c0_i32_377 = arith.constant 0 : i32
      %427 = tpu.memref_slice %arg20[%425, %c0_i32_377] : memref<16x32xf32, #tpu.memory_space<vmem>> -> memref<1x32xf32, #tpu.memory_space<vmem>>
      %428 = tpu.memref_slice %arg21[%c5_i32_375, %271] : memref<6x2x!tpu.dma_semaphore, #tpu.memory_space<semaphore_mem>> -> memref<1x1x!tpu.dma_semaphore, #tpu.memory_space<semaphore_mem>>
      %429 = tpu.memref_squeeze %428 : memref<1x1x!tpu.dma_semaphore, #tpu.memory_space<semaphore_mem>> -> memref<!tpu.dma_semaphore, #tpu.memory_space<semaphore_mem>>
      tpu.enqueue_dma source(%426 : memref<1x32xf32, #tpu.memory_space<any>>) target(%427 : memref<1x32xf32, #tpu.memory_space<vmem>>) target_semaphore(%429 : memref<!tpu.dma_semaphore, #tpu.memory_space<semaphore_mem>>)
      %c4_i32_378 = arith.constant 4 : i32
      %430 = arith.addi %272, %c4_i32_378 : i32
      %431 = arith.index_cast %430 : i32 to index
      %432 = memref.load %arg1[%431] : memref<32xi32, #tpu.memory_space<smem>>
      %c4_i32_379 = arith.constant 4 : i32
      %433 = arith.addi %272, %c4_i32_379 : i32
      %434 = arith.index_cast %433 : i32 to index
      %435 = memref.load %arg2[%434] : memref<32xi32, #tpu.memory_space<smem>>
      %c4_i32_380 = arith.constant 4 : i32
      %436 = arith.addi %272, %c4_i32_380 : i32
      %437 = arith.index_cast %436 : i32 to index
      %438 = memref.load %arg3[%437] : memref<32xi32, #tpu.memory_space<smem>>
      %c4_i32_381 = arith.constant 4 : i32
      %439 = arith.addi %273, %c4_i32_381 : i32
      %c0_i32_382 = arith.constant 0 : i32
      %c0_i32_383 = arith.constant 0 : i32
      %440 = tpu.memref_slice %arg6[%432, %c0_i32_383] : memref<50x32xf32, #tpu.memory_space<any>> -> memref<1x32xf32, #tpu.memory_space<any>>
      %c0_i32_384 = arith.constant 0 : i32
      %441 = tpu.memref_slice %arg15[%439, %c0_i32_384] : memref<16x32xf32, #tpu.memory_space<vmem>> -> memref<1x32xf32, #tpu.memory_space<vmem>>
      %442 = tpu.memref_slice %arg21[%c0_i32_382, %271] : memref<6x2x!tpu.dma_semaphore, #tpu.memory_space<semaphore_mem>> -> memref<1x1x!tpu.dma_semaphore, #tpu.memory_space<semaphore_mem>>
      %443 = tpu.memref_squeeze %442 : memref<1x1x!tpu.dma_semaphore, #tpu.memory_space<semaphore_mem>> -> memref<!tpu.dma_semaphore, #tpu.memory_space<semaphore_mem>>
      tpu.enqueue_dma source(%440 : memref<1x32xf32, #tpu.memory_space<any>>) target(%441 : memref<1x32xf32, #tpu.memory_space<vmem>>) target_semaphore(%443 : memref<!tpu.dma_semaphore, #tpu.memory_space<semaphore_mem>>)
      %c4_i32_385 = arith.constant 4 : i32
      %444 = arith.addi %273, %c4_i32_385 : i32
      %c1_i32_386 = arith.constant 1 : i32
      %c0_i32_387 = arith.constant 0 : i32
      %445 = tpu.memref_slice %arg7[%432, %c0_i32_387] : memref<50x32xf32, #tpu.memory_space<any>> -> memref<1x32xf32, #tpu.memory_space<any>>
      %c0_i32_388 = arith.constant 0 : i32
      %446 = tpu.memref_slice %arg16[%444, %c0_i32_388] : memref<16x32xf32, #tpu.memory_space<vmem>> -> memref<1x32xf32, #tpu.memory_space<vmem>>
      %447 = tpu.memref_slice %arg21[%c1_i32_386, %271] : memref<6x2x!tpu.dma_semaphore, #tpu.memory_space<semaphore_mem>> -> memref<1x1x!tpu.dma_semaphore, #tpu.memory_space<semaphore_mem>>
      %448 = tpu.memref_squeeze %447 : memref<1x1x!tpu.dma_semaphore, #tpu.memory_space<semaphore_mem>> -> memref<!tpu.dma_semaphore, #tpu.memory_space<semaphore_mem>>
      tpu.enqueue_dma source(%445 : memref<1x32xf32, #tpu.memory_space<any>>) target(%446 : memref<1x32xf32, #tpu.memory_space<vmem>>) target_semaphore(%448 : memref<!tpu.dma_semaphore, #tpu.memory_space<semaphore_mem>>)
      %c4_i32_389 = arith.constant 4 : i32
      %449 = arith.addi %273, %c4_i32_389 : i32
      %c2_i32_390 = arith.constant 2 : i32
      %c0_i32_391 = arith.constant 0 : i32
      %450 = tpu.memref_slice %arg8[%435, %c0_i32_391] : memref<100x32xf32, #tpu.memory_space<any>> -> memref<1x32xf32, #tpu.memory_space<any>>
      %c0_i32_392 = arith.constant 0 : i32
      %451 = tpu.memref_slice %arg17[%449, %c0_i32_392] : memref<16x32xf32, #tpu.memory_space<vmem>> -> memref<1x32xf32, #tpu.memory_space<vmem>>
      %452 = tpu.memref_slice %arg21[%c2_i32_390, %271] : memref<6x2x!tpu.dma_semaphore, #tpu.memory_space<semaphore_mem>> -> memref<1x1x!tpu.dma_semaphore, #tpu.memory_space<semaphore_mem>>
      %453 = tpu.memref_squeeze %452 : memref<1x1x!tpu.dma_semaphore, #tpu.memory_space<semaphore_mem>> -> memref<!tpu.dma_semaphore, #tpu.memory_space<semaphore_mem>>
      tpu.enqueue_dma source(%450 : memref<1x32xf32, #tpu.memory_space<any>>) target(%451 : memref<1x32xf32, #tpu.memory_space<vmem>>) target_semaphore(%453 : memref<!tpu.dma_semaphore, #tpu.memory_space<semaphore_mem>>)
      %c4_i32_393 = arith.constant 4 : i32
      %454 = arith.addi %273, %c4_i32_393 : i32
      %c3_i32_394 = arith.constant 3 : i32
      %c0_i32_395 = arith.constant 0 : i32
      %455 = tpu.memref_slice %arg9[%435, %c0_i32_395] : memref<100x32xf32, #tpu.memory_space<any>> -> memref<1x32xf32, #tpu.memory_space<any>>
      %c0_i32_396 = arith.constant 0 : i32
      %456 = tpu.memref_slice %arg18[%454, %c0_i32_396] : memref<16x32xf32, #tpu.memory_space<vmem>> -> memref<1x32xf32, #tpu.memory_space<vmem>>
      %457 = tpu.memref_slice %arg21[%c3_i32_394, %271] : memref<6x2x!tpu.dma_semaphore, #tpu.memory_space<semaphore_mem>> -> memref<1x1x!tpu.dma_semaphore, #tpu.memory_space<semaphore_mem>>
      %458 = tpu.memref_squeeze %457 : memref<1x1x!tpu.dma_semaphore, #tpu.memory_space<semaphore_mem>> -> memref<!tpu.dma_semaphore, #tpu.memory_space<semaphore_mem>>
      tpu.enqueue_dma source(%455 : memref<1x32xf32, #tpu.memory_space<any>>) target(%456 : memref<1x32xf32, #tpu.memory_space<vmem>>) target_semaphore(%458 : memref<!tpu.dma_semaphore, #tpu.memory_space<semaphore_mem>>)
      %c4_i32_397 = arith.constant 4 : i32
      %459 = arith.addi %273, %c4_i32_397 : i32
      %c4_i32_398 = arith.constant 4 : i32
      %c0_i32_399 = arith.constant 0 : i32
      %460 = tpu.memref_slice %arg8[%438, %c0_i32_399] : memref<100x32xf32, #tpu.memory_space<any>> -> memref<1x32xf32, #tpu.memory_space<any>>
      %c0_i32_400 = arith.constant 0 : i32
      %461 = tpu.memref_slice %arg19[%459, %c0_i32_400] : memref<16x32xf32, #tpu.memory_space<vmem>> -> memref<1x32xf32, #tpu.memory_space<vmem>>
      %462 = tpu.memref_slice %arg21[%c4_i32_398, %271] : memref<6x2x!tpu.dma_semaphore, #tpu.memory_space<semaphore_mem>> -> memref<1x1x!tpu.dma_semaphore, #tpu.memory_space<semaphore_mem>>
      %463 = tpu.memref_squeeze %462 : memref<1x1x!tpu.dma_semaphore, #tpu.memory_space<semaphore_mem>> -> memref<!tpu.dma_semaphore, #tpu.memory_space<semaphore_mem>>
      tpu.enqueue_dma source(%460 : memref<1x32xf32, #tpu.memory_space<any>>) target(%461 : memref<1x32xf32, #tpu.memory_space<vmem>>) target_semaphore(%463 : memref<!tpu.dma_semaphore, #tpu.memory_space<semaphore_mem>>)
      %c4_i32_401 = arith.constant 4 : i32
      %464 = arith.addi %273, %c4_i32_401 : i32
      %c5_i32_402 = arith.constant 5 : i32
      %c0_i32_403 = arith.constant 0 : i32
      %465 = tpu.memref_slice %arg9[%438, %c0_i32_403] : memref<100x32xf32, #tpu.memory_space<any>> -> memref<1x32xf32, #tpu.memory_space<any>>
      %c0_i32_404 = arith.constant 0 : i32
      %466 = tpu.memref_slice %arg20[%464, %c0_i32_404] : memref<16x32xf32, #tpu.memory_space<vmem>> -> memref<1x32xf32, #tpu.memory_space<vmem>>
      %467 = tpu.memref_slice %arg21[%c5_i32_402, %271] : memref<6x2x!tpu.dma_semaphore, #tpu.memory_space<semaphore_mem>> -> memref<1x1x!tpu.dma_semaphore, #tpu.memory_space<semaphore_mem>>
      %468 = tpu.memref_squeeze %467 : memref<1x1x!tpu.dma_semaphore, #tpu.memory_space<semaphore_mem>> -> memref<!tpu.dma_semaphore, #tpu.memory_space<semaphore_mem>>
      tpu.enqueue_dma source(%465 : memref<1x32xf32, #tpu.memory_space<any>>) target(%466 : memref<1x32xf32, #tpu.memory_space<vmem>>) target_semaphore(%468 : memref<!tpu.dma_semaphore, #tpu.memory_space<semaphore_mem>>)
      %c5_i32_405 = arith.constant 5 : i32
      %469 = arith.addi %272, %c5_i32_405 : i32
      %470 = arith.index_cast %469 : i32 to index
      %471 = memref.load %arg1[%470] : memref<32xi32, #tpu.memory_space<smem>>
      %c5_i32_406 = arith.constant 5 : i32
      %472 = arith.addi %272, %c5_i32_406 : i32
      %473 = arith.index_cast %472 : i32 to index
      %474 = memref.load %arg2[%473] : memref<32xi32, #tpu.memory_space<smem>>
      %c5_i32_407 = arith.constant 5 : i32
      %475 = arith.addi %272, %c5_i32_407 : i32
      %476 = arith.index_cast %475 : i32 to index
      %477 = memref.load %arg3[%476] : memref<32xi32, #tpu.memory_space<smem>>
      %c5_i32_408 = arith.constant 5 : i32
      %478 = arith.addi %273, %c5_i32_408 : i32
      %c0_i32_409 = arith.constant 0 : i32
      %c0_i32_410 = arith.constant 0 : i32
      %479 = tpu.memref_slice %arg6[%471, %c0_i32_410] : memref<50x32xf32, #tpu.memory_space<any>> -> memref<1x32xf32, #tpu.memory_space<any>>
      %c0_i32_411 = arith.constant 0 : i32
      %480 = tpu.memref_slice %arg15[%478, %c0_i32_411] : memref<16x32xf32, #tpu.memory_space<vmem>> -> memref<1x32xf32, #tpu.memory_space<vmem>>
      %481 = tpu.memref_slice %arg21[%c0_i32_409, %271] : memref<6x2x!tpu.dma_semaphore, #tpu.memory_space<semaphore_mem>> -> memref<1x1x!tpu.dma_semaphore, #tpu.memory_space<semaphore_mem>>
      %482 = tpu.memref_squeeze %481 : memref<1x1x!tpu.dma_semaphore, #tpu.memory_space<semaphore_mem>> -> memref<!tpu.dma_semaphore, #tpu.memory_space<semaphore_mem>>
      tpu.enqueue_dma source(%479 : memref<1x32xf32, #tpu.memory_space<any>>) target(%480 : memref<1x32xf32, #tpu.memory_space<vmem>>) target_semaphore(%482 : memref<!tpu.dma_semaphore, #tpu.memory_space<semaphore_mem>>)
      %c5_i32_412 = arith.constant 5 : i32
      %483 = arith.addi %273, %c5_i32_412 : i32
      %c1_i32_413 = arith.constant 1 : i32
      %c0_i32_414 = arith.constant 0 : i32
      %484 = tpu.memref_slice %arg7[%471, %c0_i32_414] : memref<50x32xf32, #tpu.memory_space<any>> -> memref<1x32xf32, #tpu.memory_space<any>>
      %c0_i32_415 = arith.constant 0 : i32
      %485 = tpu.memref_slice %arg16[%483, %c0_i32_415] : memref<16x32xf32, #tpu.memory_space<vmem>> -> memref<1x32xf32, #tpu.memory_space<vmem>>
      %486 = tpu.memref_slice %arg21[%c1_i32_413, %271] : memref<6x2x!tpu.dma_semaphore, #tpu.memory_space<semaphore_mem>> -> memref<1x1x!tpu.dma_semaphore, #tpu.memory_space<semaphore_mem>>
      %487 = tpu.memref_squeeze %486 : memref<1x1x!tpu.dma_semaphore, #tpu.memory_space<semaphore_mem>> -> memref<!tpu.dma_semaphore, #tpu.memory_space<semaphore_mem>>
      tpu.enqueue_dma source(%484 : memref<1x32xf32, #tpu.memory_space<any>>) target(%485 : memref<1x32xf32, #tpu.memory_space<vmem>>) target_semaphore(%487 : memref<!tpu.dma_semaphore, #tpu.memory_space<semaphore_mem>>)
      %c5_i32_416 = arith.constant 5 : i32
      %488 = arith.addi %273, %c5_i32_416 : i32
      %c2_i32_417 = arith.constant 2 : i32
      %c0_i32_418 = arith.constant 0 : i32
      %489 = tpu.memref_slice %arg8[%474, %c0_i32_418] : memref<100x32xf32, #tpu.memory_space<any>> -> memref<1x32xf32, #tpu.memory_space<any>>
      %c0_i32_419 = arith.constant 0 : i32
      %490 = tpu.memref_slice %arg17[%488, %c0_i32_419] : memref<16x32xf32, #tpu.memory_space<vmem>> -> memref<1x32xf32, #tpu.memory_space<vmem>>
      %491 = tpu.memref_slice %arg21[%c2_i32_417, %271] : memref<6x2x!tpu.dma_semaphore, #tpu.memory_space<semaphore_mem>> -> memref<1x1x!tpu.dma_semaphore, #tpu.memory_space<semaphore_mem>>
      %492 = tpu.memref_squeeze %491 : memref<1x1x!tpu.dma_semaphore, #tpu.memory_space<semaphore_mem>> -> memref<!tpu.dma_semaphore, #tpu.memory_space<semaphore_mem>>
      tpu.enqueue_dma source(%489 : memref<1x32xf32, #tpu.memory_space<any>>) target(%490 : memref<1x32xf32, #tpu.memory_space<vmem>>) target_semaphore(%492 : memref<!tpu.dma_semaphore, #tpu.memory_space<semaphore_mem>>)
      %c5_i32_420 = arith.constant 5 : i32
      %493 = arith.addi %273, %c5_i32_420 : i32
      %c3_i32_421 = arith.constant 3 : i32
      %c0_i32_422 = arith.constant 0 : i32
      %494 = tpu.memref_slice %arg9[%474, %c0_i32_422] : memref<100x32xf32, #tpu.memory_space<any>> -> memref<1x32xf32, #tpu.memory_space<any>>
      %c0_i32_423 = arith.constant 0 : i32
      %495 = tpu.memref_slice %arg18[%493, %c0_i32_423] : memref<16x32xf32, #tpu.memory_space<vmem>> -> memref<1x32xf32, #tpu.memory_space<vmem>>
      %496 = tpu.memref_slice %arg21[%c3_i32_421, %271] : memref<6x2x!tpu.dma_semaphore, #tpu.memory_space<semaphore_mem>> -> memref<1x1x!tpu.dma_semaphore, #tpu.memory_space<semaphore_mem>>
      %497 = tpu.memref_squeeze %496 : memref<1x1x!tpu.dma_semaphore, #tpu.memory_space<semaphore_mem>> -> memref<!tpu.dma_semaphore, #tpu.memory_space<semaphore_mem>>
      tpu.enqueue_dma source(%494 : memref<1x32xf32, #tpu.memory_space<any>>) target(%495 : memref<1x32xf32, #tpu.memory_space<vmem>>) target_semaphore(%497 : memref<!tpu.dma_semaphore, #tpu.memory_space<semaphore_mem>>)
      %c5_i32_424 = arith.constant 5 : i32
      %498 = arith.addi %273, %c5_i32_424 : i32
      %c4_i32_425 = arith.constant 4 : i32
      %c0_i32_426 = arith.constant 0 : i32
      %499 = tpu.memref_slice %arg8[%477, %c0_i32_426] : memref<100x32xf32, #tpu.memory_space<any>> -> memref<1x32xf32, #tpu.memory_space<any>>
      %c0_i32_427 = arith.constant 0 : i32
      %500 = tpu.memref_slice %arg19[%498, %c0_i32_427] : memref<16x32xf32, #tpu.memory_space<vmem>> -> memref<1x32xf32, #tpu.memory_space<vmem>>
      %501 = tpu.memref_slice %arg21[%c4_i32_425, %271] : memref<6x2x!tpu.dma_semaphore, #tpu.memory_space<semaphore_mem>> -> memref<1x1x!tpu.dma_semaphore, #tpu.memory_space<semaphore_mem>>
      %502 = tpu.memref_squeeze %501 : memref<1x1x!tpu.dma_semaphore, #tpu.memory_space<semaphore_mem>> -> memref<!tpu.dma_semaphore, #tpu.memory_space<semaphore_mem>>
      tpu.enqueue_dma source(%499 : memref<1x32xf32, #tpu.memory_space<any>>) target(%500 : memref<1x32xf32, #tpu.memory_space<vmem>>) target_semaphore(%502 : memref<!tpu.dma_semaphore, #tpu.memory_space<semaphore_mem>>)
      %c5_i32_428 = arith.constant 5 : i32
      %503 = arith.addi %273, %c5_i32_428 : i32
      %c5_i32_429 = arith.constant 5 : i32
      %c0_i32_430 = arith.constant 0 : i32
      %504 = tpu.memref_slice %arg9[%477, %c0_i32_430] : memref<100x32xf32, #tpu.memory_space<any>> -> memref<1x32xf32, #tpu.memory_space<any>>
      %c0_i32_431 = arith.constant 0 : i32
      %505 = tpu.memref_slice %arg20[%503, %c0_i32_431] : memref<16x32xf32, #tpu.memory_space<vmem>> -> memref<1x32xf32, #tpu.memory_space<vmem>>
      %506 = tpu.memref_slice %arg21[%c5_i32_429, %271] : memref<6x2x!tpu.dma_semaphore, #tpu.memory_space<semaphore_mem>> -> memref<1x1x!tpu.dma_semaphore, #tpu.memory_space<semaphore_mem>>
      %507 = tpu.memref_squeeze %506 : memref<1x1x!tpu.dma_semaphore, #tpu.memory_space<semaphore_mem>> -> memref<!tpu.dma_semaphore, #tpu.memory_space<semaphore_mem>>
      tpu.enqueue_dma source(%504 : memref<1x32xf32, #tpu.memory_space<any>>) target(%505 : memref<1x32xf32, #tpu.memory_space<vmem>>) target_semaphore(%507 : memref<!tpu.dma_semaphore, #tpu.memory_space<semaphore_mem>>)
      %c6_i32 = arith.constant 6 : i32
      %508 = arith.addi %272, %c6_i32 : i32
      %509 = arith.index_cast %508 : i32 to index
      %510 = memref.load %arg1[%509] : memref<32xi32, #tpu.memory_space<smem>>
      %c6_i32_432 = arith.constant 6 : i32
      %511 = arith.addi %272, %c6_i32_432 : i32
      %512 = arith.index_cast %511 : i32 to index
      %513 = memref.load %arg2[%512] : memref<32xi32, #tpu.memory_space<smem>>
      %c6_i32_433 = arith.constant 6 : i32
      %514 = arith.addi %272, %c6_i32_433 : i32
      %515 = arith.index_cast %514 : i32 to index
      %516 = memref.load %arg3[%515] : memref<32xi32, #tpu.memory_space<smem>>
      %c6_i32_434 = arith.constant 6 : i32
      %517 = arith.addi %273, %c6_i32_434 : i32
      %c0_i32_435 = arith.constant 0 : i32
      %c0_i32_436 = arith.constant 0 : i32
      %518 = tpu.memref_slice %arg6[%510, %c0_i32_436] : memref<50x32xf32, #tpu.memory_space<any>> -> memref<1x32xf32, #tpu.memory_space<any>>
      %c0_i32_437 = arith.constant 0 : i32
      %519 = tpu.memref_slice %arg15[%517, %c0_i32_437] : memref<16x32xf32, #tpu.memory_space<vmem>> -> memref<1x32xf32, #tpu.memory_space<vmem>>
      %520 = tpu.memref_slice %arg21[%c0_i32_435, %271] : memref<6x2x!tpu.dma_semaphore, #tpu.memory_space<semaphore_mem>> -> memref<1x1x!tpu.dma_semaphore, #tpu.memory_space<semaphore_mem>>
      %521 = tpu.memref_squeeze %520 : memref<1x1x!tpu.dma_semaphore, #tpu.memory_space<semaphore_mem>> -> memref<!tpu.dma_semaphore, #tpu.memory_space<semaphore_mem>>
      tpu.enqueue_dma source(%518 : memref<1x32xf32, #tpu.memory_space<any>>) target(%519 : memref<1x32xf32, #tpu.memory_space<vmem>>) target_semaphore(%521 : memref<!tpu.dma_semaphore, #tpu.memory_space<semaphore_mem>>)
      %c6_i32_438 = arith.constant 6 : i32
      %522 = arith.addi %273, %c6_i32_438 : i32
      %c1_i32_439 = arith.constant 1 : i32
      %c0_i32_440 = arith.constant 0 : i32
      %523 = tpu.memref_slice %arg7[%510, %c0_i32_440] : memref<50x32xf32, #tpu.memory_space<any>> -> memref<1x32xf32, #tpu.memory_space<any>>
      %c0_i32_441 = arith.constant 0 : i32
      %524 = tpu.memref_slice %arg16[%522, %c0_i32_441] : memref<16x32xf32, #tpu.memory_space<vmem>> -> memref<1x32xf32, #tpu.memory_space<vmem>>
      %525 = tpu.memref_slice %arg21[%c1_i32_439, %271] : memref<6x2x!tpu.dma_semaphore, #tpu.memory_space<semaphore_mem>> -> memref<1x1x!tpu.dma_semaphore, #tpu.memory_space<semaphore_mem>>
      %526 = tpu.memref_squeeze %525 : memref<1x1x!tpu.dma_semaphore, #tpu.memory_space<semaphore_mem>> -> memref<!tpu.dma_semaphore, #tpu.memory_space<semaphore_mem>>
      tpu.enqueue_dma source(%523 : memref<1x32xf32, #tpu.memory_space<any>>) target(%524 : memref<1x32xf32, #tpu.memory_space<vmem>>) target_semaphore(%526 : memref<!tpu.dma_semaphore, #tpu.memory_space<semaphore_mem>>)
      %c6_i32_442 = arith.constant 6 : i32
      %527 = arith.addi %273, %c6_i32_442 : i32
      %c2_i32_443 = arith.constant 2 : i32
      %c0_i32_444 = arith.constant 0 : i32
      %528 = tpu.memref_slice %arg8[%513, %c0_i32_444] : memref<100x32xf32, #tpu.memory_space<any>> -> memref<1x32xf32, #tpu.memory_space<any>>
      %c0_i32_445 = arith.constant 0 : i32
      %529 = tpu.memref_slice %arg17[%527, %c0_i32_445] : memref<16x32xf32, #tpu.memory_space<vmem>> -> memref<1x32xf32, #tpu.memory_space<vmem>>
      %530 = tpu.memref_slice %arg21[%c2_i32_443, %271] : memref<6x2x!tpu.dma_semaphore, #tpu.memory_space<semaphore_mem>> -> memref<1x1x!tpu.dma_semaphore, #tpu.memory_space<semaphore_mem>>
      %531 = tpu.memref_squeeze %530 : memref<1x1x!tpu.dma_semaphore, #tpu.memory_space<semaphore_mem>> -> memref<!tpu.dma_semaphore, #tpu.memory_space<semaphore_mem>>
      tpu.enqueue_dma source(%528 : memref<1x32xf32, #tpu.memory_space<any>>) target(%529 : memref<1x32xf32, #tpu.memory_space<vmem>>) target_semaphore(%531 : memref<!tpu.dma_semaphore, #tpu.memory_space<semaphore_mem>>)
      %c6_i32_446 = arith.constant 6 : i32
      %532 = arith.addi %273, %c6_i32_446 : i32
      %c3_i32_447 = arith.constant 3 : i32
      %c0_i32_448 = arith.constant 0 : i32
      %533 = tpu.memref_slice %arg9[%513, %c0_i32_448] : memref<100x32xf32, #tpu.memory_space<any>> -> memref<1x32xf32, #tpu.memory_space<any>>
      %c0_i32_449 = arith.constant 0 : i32
      %534 = tpu.memref_slice %arg18[%532, %c0_i32_449] : memref<16x32xf32, #tpu.memory_space<vmem>> -> memref<1x32xf32, #tpu.memory_space<vmem>>
      %535 = tpu.memref_slice %arg21[%c3_i32_447, %271] : memref<6x2x!tpu.dma_semaphore, #tpu.memory_space<semaphore_mem>> -> memref<1x1x!tpu.dma_semaphore, #tpu.memory_space<semaphore_mem>>
      %536 = tpu.memref_squeeze %535 : memref<1x1x!tpu.dma_semaphore, #tpu.memory_space<semaphore_mem>> -> memref<!tpu.dma_semaphore, #tpu.memory_space<semaphore_mem>>
      tpu.enqueue_dma source(%533 : memref<1x32xf32, #tpu.memory_space<any>>) target(%534 : memref<1x32xf32, #tpu.memory_space<vmem>>) target_semaphore(%536 : memref<!tpu.dma_semaphore, #tpu.memory_space<semaphore_mem>>)
      %c6_i32_450 = arith.constant 6 : i32
      %537 = arith.addi %273, %c6_i32_450 : i32
      %c4_i32_451 = arith.constant 4 : i32
      %c0_i32_452 = arith.constant 0 : i32
      %538 = tpu.memref_slice %arg8[%516, %c0_i32_452] : memref<100x32xf32, #tpu.memory_space<any>> -> memref<1x32xf32, #tpu.memory_space<any>>
      %c0_i32_453 = arith.constant 0 : i32
      %539 = tpu.memref_slice %arg19[%537, %c0_i32_453] : memref<16x32xf32, #tpu.memory_space<vmem>> -> memref<1x32xf32, #tpu.memory_space<vmem>>
      %540 = tpu.memref_slice %arg21[%c4_i32_451, %271] : memref<6x2x!tpu.dma_semaphore, #tpu.memory_space<semaphore_mem>> -> memref<1x1x!tpu.dma_semaphore, #tpu.memory_space<semaphore_mem>>
      %541 = tpu.memref_squeeze %540 : memref<1x1x!tpu.dma_semaphore, #tpu.memory_space<semaphore_mem>> -> memref<!tpu.dma_semaphore, #tpu.memory_space<semaphore_mem>>
      tpu.enqueue_dma source(%538 : memref<1x32xf32, #tpu.memory_space<any>>) target(%539 : memref<1x32xf32, #tpu.memory_space<vmem>>) target_semaphore(%541 : memref<!tpu.dma_semaphore, #tpu.memory_space<semaphore_mem>>)
      %c6_i32_454 = arith.constant 6 : i32
      %542 = arith.addi %273, %c6_i32_454 : i32
      %c5_i32_455 = arith.constant 5 : i32
      %c0_i32_456 = arith.constant 0 : i32
      %543 = tpu.memref_slice %arg9[%516, %c0_i32_456] : memref<100x32xf32, #tpu.memory_space<any>> -> memref<1x32xf32, #tpu.memory_space<any>>
      %c0_i32_457 = arith.constant 0 : i32
      %544 = tpu.memref_slice %arg20[%542, %c0_i32_457] : memref<16x32xf32, #tpu.memory_space<vmem>> -> memref<1x32xf32, #tpu.memory_space<vmem>>
      %545 = tpu.memref_slice %arg21[%c5_i32_455, %271] : memref<6x2x!tpu.dma_semaphore, #tpu.memory_space<semaphore_mem>> -> memref<1x1x!tpu.dma_semaphore, #tpu.memory_space<semaphore_mem>>
      %546 = tpu.memref_squeeze %545 : memref<1x1x!tpu.dma_semaphore, #tpu.memory_space<semaphore_mem>> -> memref<!tpu.dma_semaphore, #tpu.memory_space<semaphore_mem>>
      tpu.enqueue_dma source(%543 : memref<1x32xf32, #tpu.memory_space<any>>) target(%544 : memref<1x32xf32, #tpu.memory_space<vmem>>) target_semaphore(%546 : memref<!tpu.dma_semaphore, #tpu.memory_space<semaphore_mem>>)
      %c7_i32 = arith.constant 7 : i32
      %547 = arith.addi %272, %c7_i32 : i32
      %548 = arith.index_cast %547 : i32 to index
      %549 = memref.load %arg1[%548] : memref<32xi32, #tpu.memory_space<smem>>
      %c7_i32_458 = arith.constant 7 : i32
      %550 = arith.addi %272, %c7_i32_458 : i32
      %551 = arith.index_cast %550 : i32 to index
      %552 = memref.load %arg2[%551] : memref<32xi32, #tpu.memory_space<smem>>
      %c7_i32_459 = arith.constant 7 : i32
      %553 = arith.addi %272, %c7_i32_459 : i32
      %554 = arith.index_cast %553 : i32 to index
      %555 = memref.load %arg3[%554] : memref<32xi32, #tpu.memory_space<smem>>
      %c7_i32_460 = arith.constant 7 : i32
      %556 = arith.addi %273, %c7_i32_460 : i32
      %c0_i32_461 = arith.constant 0 : i32
      %c0_i32_462 = arith.constant 0 : i32
      %557 = tpu.memref_slice %arg6[%549, %c0_i32_462] : memref<50x32xf32, #tpu.memory_space<any>> -> memref<1x32xf32, #tpu.memory_space<any>>
      %c0_i32_463 = arith.constant 0 : i32
      %558 = tpu.memref_slice %arg15[%556, %c0_i32_463] : memref<16x32xf32, #tpu.memory_space<vmem>> -> memref<1x32xf32, #tpu.memory_space<vmem>>
      %559 = tpu.memref_slice %arg21[%c0_i32_461, %271] : memref<6x2x!tpu.dma_semaphore, #tpu.memory_space<semaphore_mem>> -> memref<1x1x!tpu.dma_semaphore, #tpu.memory_space<semaphore_mem>>
      %560 = tpu.memref_squeeze %559 : memref<1x1x!tpu.dma_semaphore, #tpu.memory_space<semaphore_mem>> -> memref<!tpu.dma_semaphore, #tpu.memory_space<semaphore_mem>>
      tpu.enqueue_dma source(%557 : memref<1x32xf32, #tpu.memory_space<any>>) target(%558 : memref<1x32xf32, #tpu.memory_space<vmem>>) target_semaphore(%560 : memref<!tpu.dma_semaphore, #tpu.memory_space<semaphore_mem>>)
      %c7_i32_464 = arith.constant 7 : i32
      %561 = arith.addi %273, %c7_i32_464 : i32
      %c1_i32_465 = arith.constant 1 : i32
      %c0_i32_466 = arith.constant 0 : i32
      %562 = tpu.memref_slice %arg7[%549, %c0_i32_466] : memref<50x32xf32, #tpu.memory_space<any>> -> memref<1x32xf32, #tpu.memory_space<any>>
      %c0_i32_467 = arith.constant 0 : i32
      %563 = tpu.memref_slice %arg16[%561, %c0_i32_467] : memref<16x32xf32, #tpu.memory_space<vmem>> -> memref<1x32xf32, #tpu.memory_space<vmem>>
      %564 = tpu.memref_slice %arg21[%c1_i32_465, %271] : memref<6x2x!tpu.dma_semaphore, #tpu.memory_space<semaphore_mem>> -> memref<1x1x!tpu.dma_semaphore, #tpu.memory_space<semaphore_mem>>
      %565 = tpu.memref_squeeze %564 : memref<1x1x!tpu.dma_semaphore, #tpu.memory_space<semaphore_mem>> -> memref<!tpu.dma_semaphore, #tpu.memory_space<semaphore_mem>>
      tpu.enqueue_dma source(%562 : memref<1x32xf32, #tpu.memory_space<any>>) target(%563 : memref<1x32xf32, #tpu.memory_space<vmem>>) target_semaphore(%565 : memref<!tpu.dma_semaphore, #tpu.memory_space<semaphore_mem>>)
      %c7_i32_468 = arith.constant 7 : i32
      %566 = arith.addi %273, %c7_i32_468 : i32
      %c2_i32_469 = arith.constant 2 : i32
      %c0_i32_470 = arith.constant 0 : i32
      %567 = tpu.memref_slice %arg8[%552, %c0_i32_470] : memref<100x32xf32, #tpu.memory_space<any>> -> memref<1x32xf32, #tpu.memory_space<any>>
      %c0_i32_471 = arith.constant 0 : i32
      %568 = tpu.memref_slice %arg17[%566, %c0_i32_471] : memref<16x32xf32, #tpu.memory_space<vmem>> -> memref<1x32xf32, #tpu.memory_space<vmem>>
      %569 = tpu.memref_slice %arg21[%c2_i32_469, %271] : memref<6x2x!tpu.dma_semaphore, #tpu.memory_space<semaphore_mem>> -> memref<1x1x!tpu.dma_semaphore, #tpu.memory_space<semaphore_mem>>
      %570 = tpu.memref_squeeze %569 : memref<1x1x!tpu.dma_semaphore, #tpu.memory_space<semaphore_mem>> -> memref<!tpu.dma_semaphore, #tpu.memory_space<semaphore_mem>>
      tpu.enqueue_dma source(%567 : memref<1x32xf32, #tpu.memory_space<any>>) target(%568 : memref<1x32xf32, #tpu.memory_space<vmem>>) target_semaphore(%570 : memref<!tpu.dma_semaphore, #tpu.memory_space<semaphore_mem>>)
      %c7_i32_472 = arith.constant 7 : i32
      %571 = arith.addi %273, %c7_i32_472 : i32
      %c3_i32_473 = arith.constant 3 : i32
      %c0_i32_474 = arith.constant 0 : i32
      %572 = tpu.memref_slice %arg9[%552, %c0_i32_474] : memref<100x32xf32, #tpu.memory_space<any>> -> memref<1x32xf32, #tpu.memory_space<any>>
      %c0_i32_475 = arith.constant 0 : i32
      %573 = tpu.memref_slice %arg18[%571, %c0_i32_475] : memref<16x32xf32, #tpu.memory_space<vmem>> -> memref<1x32xf32, #tpu.memory_space<vmem>>
      %574 = tpu.memref_slice %arg21[%c3_i32_473, %271] : memref<6x2x!tpu.dma_semaphore, #tpu.memory_space<semaphore_mem>> -> memref<1x1x!tpu.dma_semaphore, #tpu.memory_space<semaphore_mem>>
      %575 = tpu.memref_squeeze %574 : memref<1x1x!tpu.dma_semaphore, #tpu.memory_space<semaphore_mem>> -> memref<!tpu.dma_semaphore, #tpu.memory_space<semaphore_mem>>
      tpu.enqueue_dma source(%572 : memref<1x32xf32, #tpu.memory_space<any>>) target(%573 : memref<1x32xf32, #tpu.memory_space<vmem>>) target_semaphore(%575 : memref<!tpu.dma_semaphore, #tpu.memory_space<semaphore_mem>>)
      %c7_i32_476 = arith.constant 7 : i32
      %576 = arith.addi %273, %c7_i32_476 : i32
      %c4_i32_477 = arith.constant 4 : i32
      %c0_i32_478 = arith.constant 0 : i32
      %577 = tpu.memref_slice %arg8[%555, %c0_i32_478] : memref<100x32xf32, #tpu.memory_space<any>> -> memref<1x32xf32, #tpu.memory_space<any>>
      %c0_i32_479 = arith.constant 0 : i32
      %578 = tpu.memref_slice %arg19[%576, %c0_i32_479] : memref<16x32xf32, #tpu.memory_space<vmem>> -> memref<1x32xf32, #tpu.memory_space<vmem>>
      %579 = tpu.memref_slice %arg21[%c4_i32_477, %271] : memref<6x2x!tpu.dma_semaphore, #tpu.memory_space<semaphore_mem>> -> memref<1x1x!tpu.dma_semaphore, #tpu.memory_space<semaphore_mem>>
      %580 = tpu.memref_squeeze %579 : memref<1x1x!tpu.dma_semaphore, #tpu.memory_space<semaphore_mem>> -> memref<!tpu.dma_semaphore, #tpu.memory_space<semaphore_mem>>
      tpu.enqueue_dma source(%577 : memref<1x32xf32, #tpu.memory_space<any>>) target(%578 : memref<1x32xf32, #tpu.memory_space<vmem>>) target_semaphore(%580 : memref<!tpu.dma_semaphore, #tpu.memory_space<semaphore_mem>>)
      %c7_i32_480 = arith.constant 7 : i32
      %581 = arith.addi %273, %c7_i32_480 : i32
      %c5_i32_481 = arith.constant 5 : i32
      %c0_i32_482 = arith.constant 0 : i32
      %582 = tpu.memref_slice %arg9[%555, %c0_i32_482] : memref<100x32xf32, #tpu.memory_space<any>> -> memref<1x32xf32, #tpu.memory_space<any>>
      %c0_i32_483 = arith.constant 0 : i32
      %583 = tpu.memref_slice %arg20[%581, %c0_i32_483] : memref<16x32xf32, #tpu.memory_space<vmem>> -> memref<1x32xf32, #tpu.memory_space<vmem>>
      %584 = tpu.memref_slice %arg21[%c5_i32_481, %271] : memref<6x2x!tpu.dma_semaphore, #tpu.memory_space<semaphore_mem>> -> memref<1x1x!tpu.dma_semaphore, #tpu.memory_space<semaphore_mem>>
      %585 = tpu.memref_squeeze %584 : memref<1x1x!tpu.dma_semaphore, #tpu.memory_space<semaphore_mem>> -> memref<!tpu.dma_semaphore, #tpu.memory_space<semaphore_mem>>
      tpu.enqueue_dma source(%582 : memref<1x32xf32, #tpu.memory_space<any>>) target(%583 : memref<1x32xf32, #tpu.memory_space<vmem>>) target_semaphore(%585 : memref<!tpu.dma_semaphore, #tpu.memory_space<semaphore_mem>>)
    } else {
    }
    %c1_i32_1 = arith.constant 1 : i32
    %4 = arith.addi %arg0, %c1_i32_1 : i32
    %c4_i32 = arith.constant 4 : i32
    %5 = arith.cmpi slt, %4, %c4_i32 : i32
    %6 = arith.extui %5 : i1 to i32
    %c0_i32_2 = arith.constant 0 : i32
    %7 = arith.cmpi ne, %6, %c0_i32_2 : i32
    scf.if %7 {
      %c1_i32_267 = arith.constant 1 : i32
      %271 = arith.addi %arg0, %c1_i32_267 : i32
      %c1_i32_268 = arith.constant 1 : i32
      %272 = arith.andi %271, %c1_i32_268 : i32
      %c8_i32_269 = arith.constant 8 : i32
      %273 = arith.muli %271, %c8_i32_269 : i32
      %c8_i32_270 = arith.constant 8 : i32
      %274 = arith.muli %272, %c8_i32_270 : i32
      %c0_i32_271 = arith.constant 0 : i32
      %275 = arith.addi %273, %c0_i32_271 : i32
      %276 = arith.index_cast %275 : i32 to index
      %277 = memref.load %arg1[%276] : memref<32xi32, #tpu.memory_space<smem>>
      %c0_i32_272 = arith.constant 0 : i32
      %278 = arith.addi %273, %c0_i32_272 : i32
      %279 = arith.index_cast %278 : i32 to index
      %280 = memref.load %arg2[%279] : memref<32xi32, #tpu.memory_space<smem>>
      %c0_i32_273 = arith.constant 0 : i32
      %281 = arith.addi %273, %c0_i32_273 : i32
      %282 = arith.index_cast %281 : i32 to index
      %283 = memref.load %arg3[%282] : memref<32xi32, #tpu.memory_space<smem>>
      %c0_i32_274 = arith.constant 0 : i32
      %284 = arith.addi %274, %c0_i32_274 : i32
      %c0_i32_275 = arith.constant 0 : i32
      %c0_i32_276 = arith.constant 0 : i32
      %285 = tpu.memref_slice %arg6[%277, %c0_i32_276] : memref<50x32xf32, #tpu.memory_space<any>> -> memref<1x32xf32, #tpu.memory_space<any>>
      %c0_i32_277 = arith.constant 0 : i32
      %286 = tpu.memref_slice %arg15[%284, %c0_i32_277] : memref<16x32xf32, #tpu.memory_space<vmem>> -> memref<1x32xf32, #tpu.memory_space<vmem>>
      %287 = tpu.memref_slice %arg21[%c0_i32_275, %272] : memref<6x2x!tpu.dma_semaphore, #tpu.memory_space<semaphore_mem>> -> memref<1x1x!tpu.dma_semaphore, #tpu.memory_space<semaphore_mem>>
      %288 = tpu.memref_squeeze %287 : memref<1x1x!tpu.dma_semaphore, #tpu.memory_space<semaphore_mem>> -> memref<!tpu.dma_semaphore, #tpu.memory_space<semaphore_mem>>
      tpu.enqueue_dma source(%285 : memref<1x32xf32, #tpu.memory_space<any>>) target(%286 : memref<1x32xf32, #tpu.memory_space<vmem>>) target_semaphore(%288 : memref<!tpu.dma_semaphore, #tpu.memory_space<semaphore_mem>>)
      %c0_i32_278 = arith.constant 0 : i32
      %289 = arith.addi %274, %c0_i32_278 : i32
      %c1_i32_279 = arith.constant 1 : i32
      %c0_i32_280 = arith.constant 0 : i32
      %290 = tpu.memref_slice %arg7[%277, %c0_i32_280] : memref<50x32xf32, #tpu.memory_space<any>> -> memref<1x32xf32, #tpu.memory_space<any>>
      %c0_i32_281 = arith.constant 0 : i32
      %291 = tpu.memref_slice %arg16[%289, %c0_i32_281] : memref<16x32xf32, #tpu.memory_space<vmem>> -> memref<1x32xf32, #tpu.memory_space<vmem>>
      %292 = tpu.memref_slice %arg21[%c1_i32_279, %272] : memref<6x2x!tpu.dma_semaphore, #tpu.memory_space<semaphore_mem>> -> memref<1x1x!tpu.dma_semaphore, #tpu.memory_space<semaphore_mem>>
      %293 = tpu.memref_squeeze %292 : memref<1x1x!tpu.dma_semaphore, #tpu.memory_space<semaphore_mem>> -> memref<!tpu.dma_semaphore, #tpu.memory_space<semaphore_mem>>
      tpu.enqueue_dma source(%290 : memref<1x32xf32, #tpu.memory_space<any>>) target(%291 : memref<1x32xf32, #tpu.memory_space<vmem>>) target_semaphore(%293 : memref<!tpu.dma_semaphore, #tpu.memory_space<semaphore_mem>>)
      %c0_i32_282 = arith.constant 0 : i32
      %294 = arith.addi %274, %c0_i32_282 : i32
      %c2_i32_283 = arith.constant 2 : i32
      %c0_i32_284 = arith.constant 0 : i32
      %295 = tpu.memref_slice %arg8[%280, %c0_i32_284] : memref<100x32xf32, #tpu.memory_space<any>> -> memref<1x32xf32, #tpu.memory_space<any>>
      %c0_i32_285 = arith.constant 0 : i32
      %296 = tpu.memref_slice %arg17[%294, %c0_i32_285] : memref<16x32xf32, #tpu.memory_space<vmem>> -> memref<1x32xf32, #tpu.memory_space<vmem>>
      %297 = tpu.memref_slice %arg21[%c2_i32_283, %272] : memref<6x2x!tpu.dma_semaphore, #tpu.memory_space<semaphore_mem>> -> memref<1x1x!tpu.dma_semaphore, #tpu.memory_space<semaphore_mem>>
      %298 = tpu.memref_squeeze %297 : memref<1x1x!tpu.dma_semaphore, #tpu.memory_space<semaphore_mem>> -> memref<!tpu.dma_semaphore, #tpu.memory_space<semaphore_mem>>
      tpu.enqueue_dma source(%295 : memref<1x32xf32, #tpu.memory_space<any>>) target(%296 : memref<1x32xf32, #tpu.memory_space<vmem>>) target_semaphore(%298 : memref<!tpu.dma_semaphore, #tpu.memory_space<semaphore_mem>>)
      %c0_i32_286 = arith.constant 0 : i32
      %299 = arith.addi %274, %c0_i32_286 : i32
      %c3_i32_287 = arith.constant 3 : i32
      %c0_i32_288 = arith.constant 0 : i32
      %300 = tpu.memref_slice %arg9[%280, %c0_i32_288] : memref<100x32xf32, #tpu.memory_space<any>> -> memref<1x32xf32, #tpu.memory_space<any>>
      %c0_i32_289 = arith.constant 0 : i32
      %301 = tpu.memref_slice %arg18[%299, %c0_i32_289] : memref<16x32xf32, #tpu.memory_space<vmem>> -> memref<1x32xf32, #tpu.memory_space<vmem>>
      %302 = tpu.memref_slice %arg21[%c3_i32_287, %272] : memref<6x2x!tpu.dma_semaphore, #tpu.memory_space<semaphore_mem>> -> memref<1x1x!tpu.dma_semaphore, #tpu.memory_space<semaphore_mem>>
      %303 = tpu.memref_squeeze %302 : memref<1x1x!tpu.dma_semaphore, #tpu.memory_space<semaphore_mem>> -> memref<!tpu.dma_semaphore, #tpu.memory_space<semaphore_mem>>
      tpu.enqueue_dma source(%300 : memref<1x32xf32, #tpu.memory_space<any>>) target(%301 : memref<1x32xf32, #tpu.memory_space<vmem>>) target_semaphore(%303 : memref<!tpu.dma_semaphore, #tpu.memory_space<semaphore_mem>>)
      %c0_i32_290 = arith.constant 0 : i32
      %304 = arith.addi %274, %c0_i32_290 : i32
      %c4_i32_291 = arith.constant 4 : i32
      %c0_i32_292 = arith.constant 0 : i32
      %305 = tpu.memref_slice %arg8[%283, %c0_i32_292] : memref<100x32xf32, #tpu.memory_space<any>> -> memref<1x32xf32, #tpu.memory_space<any>>
      %c0_i32_293 = arith.constant 0 : i32
      %306 = tpu.memref_slice %arg19[%304, %c0_i32_293] : memref<16x32xf32, #tpu.memory_space<vmem>> -> memref<1x32xf32, #tpu.memory_space<vmem>>
      %307 = tpu.memref_slice %arg21[%c4_i32_291, %272] : memref<6x2x!tpu.dma_semaphore, #tpu.memory_space<semaphore_mem>> -> memref<1x1x!tpu.dma_semaphore, #tpu.memory_space<semaphore_mem>>
      %308 = tpu.memref_squeeze %307 : memref<1x1x!tpu.dma_semaphore, #tpu.memory_space<semaphore_mem>> -> memref<!tpu.dma_semaphore, #tpu.memory_space<semaphore_mem>>
      tpu.enqueue_dma source(%305 : memref<1x32xf32, #tpu.memory_space<any>>) target(%306 : memref<1x32xf32, #tpu.memory_space<vmem>>) target_semaphore(%308 : memref<!tpu.dma_semaphore, #tpu.memory_space<semaphore_mem>>)
      %c0_i32_294 = arith.constant 0 : i32
      %309 = arith.addi %274, %c0_i32_294 : i32
      %c5_i32_295 = arith.constant 5 : i32
      %c0_i32_296 = arith.constant 0 : i32
      %310 = tpu.memref_slice %arg9[%283, %c0_i32_296] : memref<100x32xf32, #tpu.memory_space<any>> -> memref<1x32xf32, #tpu.memory_space<any>>
      %c0_i32_297 = arith.constant 0 : i32
      %311 = tpu.memref_slice %arg20[%309, %c0_i32_297] : memref<16x32xf32, #tpu.memory_space<vmem>> -> memref<1x32xf32, #tpu.memory_space<vmem>>
      %312 = tpu.memref_slice %arg21[%c5_i32_295, %272] : memref<6x2x!tpu.dma_semaphore, #tpu.memory_space<semaphore_mem>> -> memref<1x1x!tpu.dma_semaphore, #tpu.memory_space<semaphore_mem>>
      %313 = tpu.memref_squeeze %312 : memref<1x1x!tpu.dma_semaphore, #tpu.memory_space<semaphore_mem>> -> memref<!tpu.dma_semaphore, #tpu.memory_space<semaphore_mem>>
      tpu.enqueue_dma source(%310 : memref<1x32xf32, #tpu.memory_space<any>>) target(%311 : memref<1x32xf32, #tpu.memory_space<vmem>>) target_semaphore(%313 : memref<!tpu.dma_semaphore, #tpu.memory_space<semaphore_mem>>)
      %c1_i32_298 = arith.constant 1 : i32
      %314 = arith.addi %273, %c1_i32_298 : i32
      %315 = arith.index_cast %314 : i32 to index
      %316 = memref.load %arg1[%315] : memref<32xi32, #tpu.memory_space<smem>>
      %c1_i32_299 = arith.constant 1 : i32
      %317 = arith.addi %273, %c1_i32_299 : i32
      %318 = arith.index_cast %317 : i32 to index
      %319 = memref.load %arg2[%318] : memref<32xi32, #tpu.memory_space<smem>>
      %c1_i32_300 = arith.constant 1 : i32
      %320 = arith.addi %273, %c1_i32_300 : i32
      %321 = arith.index_cast %320 : i32 to index
      %322 = memref.load %arg3[%321] : memref<32xi32, #tpu.memory_space<smem>>
      %c1_i32_301 = arith.constant 1 : i32
      %323 = arith.addi %274, %c1_i32_301 : i32
      %c0_i32_302 = arith.constant 0 : i32
      %c0_i32_303 = arith.constant 0 : i32
      %324 = tpu.memref_slice %arg6[%316, %c0_i32_303] : memref<50x32xf32, #tpu.memory_space<any>> -> memref<1x32xf32, #tpu.memory_space<any>>
      %c0_i32_304 = arith.constant 0 : i32
      %325 = tpu.memref_slice %arg15[%323, %c0_i32_304] : memref<16x32xf32, #tpu.memory_space<vmem>> -> memref<1x32xf32, #tpu.memory_space<vmem>>
      %326 = tpu.memref_slice %arg21[%c0_i32_302, %272] : memref<6x2x!tpu.dma_semaphore, #tpu.memory_space<semaphore_mem>> -> memref<1x1x!tpu.dma_semaphore, #tpu.memory_space<semaphore_mem>>
      %327 = tpu.memref_squeeze %326 : memref<1x1x!tpu.dma_semaphore, #tpu.memory_space<semaphore_mem>> -> memref<!tpu.dma_semaphore, #tpu.memory_space<semaphore_mem>>
      tpu.enqueue_dma source(%324 : memref<1x32xf32, #tpu.memory_space<any>>) target(%325 : memref<1x32xf32, #tpu.memory_space<vmem>>) target_semaphore(%327 : memref<!tpu.dma_semaphore, #tpu.memory_space<semaphore_mem>>)
      %c1_i32_305 = arith.constant 1 : i32
      %328 = arith.addi %274, %c1_i32_305 : i32
      %c1_i32_306 = arith.constant 1 : i32
      %c0_i32_307 = arith.constant 0 : i32
      %329 = tpu.memref_slice %arg7[%316, %c0_i32_307] : memref<50x32xf32, #tpu.memory_space<any>> -> memref<1x32xf32, #tpu.memory_space<any>>
      %c0_i32_308 = arith.constant 0 : i32
      %330 = tpu.memref_slice %arg16[%328, %c0_i32_308] : memref<16x32xf32, #tpu.memory_space<vmem>> -> memref<1x32xf32, #tpu.memory_space<vmem>>
      %331 = tpu.memref_slice %arg21[%c1_i32_306, %272] : memref<6x2x!tpu.dma_semaphore, #tpu.memory_space<semaphore_mem>> -> memref<1x1x!tpu.dma_semaphore, #tpu.memory_space<semaphore_mem>>
      %332 = tpu.memref_squeeze %331 : memref<1x1x!tpu.dma_semaphore, #tpu.memory_space<semaphore_mem>> -> memref<!tpu.dma_semaphore, #tpu.memory_space<semaphore_mem>>
      tpu.enqueue_dma source(%329 : memref<1x32xf32, #tpu.memory_space<any>>) target(%330 : memref<1x32xf32, #tpu.memory_space<vmem>>) target_semaphore(%332 : memref<!tpu.dma_semaphore, #tpu.memory_space<semaphore_mem>>)
      %c1_i32_309 = arith.constant 1 : i32
      %333 = arith.addi %274, %c1_i32_309 : i32
      %c2_i32_310 = arith.constant 2 : i32
      %c0_i32_311 = arith.constant 0 : i32
      %334 = tpu.memref_slice %arg8[%319, %c0_i32_311] : memref<100x32xf32, #tpu.memory_space<any>> -> memref<1x32xf32, #tpu.memory_space<any>>
      %c0_i32_312 = arith.constant 0 : i32
      %335 = tpu.memref_slice %arg17[%333, %c0_i32_312] : memref<16x32xf32, #tpu.memory_space<vmem>> -> memref<1x32xf32, #tpu.memory_space<vmem>>
      %336 = tpu.memref_slice %arg21[%c2_i32_310, %272] : memref<6x2x!tpu.dma_semaphore, #tpu.memory_space<semaphore_mem>> -> memref<1x1x!tpu.dma_semaphore, #tpu.memory_space<semaphore_mem>>
      %337 = tpu.memref_squeeze %336 : memref<1x1x!tpu.dma_semaphore, #tpu.memory_space<semaphore_mem>> -> memref<!tpu.dma_semaphore, #tpu.memory_space<semaphore_mem>>
      tpu.enqueue_dma source(%334 : memref<1x32xf32, #tpu.memory_space<any>>) target(%335 : memref<1x32xf32, #tpu.memory_space<vmem>>) target_semaphore(%337 : memref<!tpu.dma_semaphore, #tpu.memory_space<semaphore_mem>>)
      %c1_i32_313 = arith.constant 1 : i32
      %338 = arith.addi %274, %c1_i32_313 : i32
      %c3_i32_314 = arith.constant 3 : i32
      %c0_i32_315 = arith.constant 0 : i32
      %339 = tpu.memref_slice %arg9[%319, %c0_i32_315] : memref<100x32xf32, #tpu.memory_space<any>> -> memref<1x32xf32, #tpu.memory_space<any>>
      %c0_i32_316 = arith.constant 0 : i32
      %340 = tpu.memref_slice %arg18[%338, %c0_i32_316] : memref<16x32xf32, #tpu.memory_space<vmem>> -> memref<1x32xf32, #tpu.memory_space<vmem>>
      %341 = tpu.memref_slice %arg21[%c3_i32_314, %272] : memref<6x2x!tpu.dma_semaphore, #tpu.memory_space<semaphore_mem>> -> memref<1x1x!tpu.dma_semaphore, #tpu.memory_space<semaphore_mem>>
      %342 = tpu.memref_squeeze %341 : memref<1x1x!tpu.dma_semaphore, #tpu.memory_space<semaphore_mem>> -> memref<!tpu.dma_semaphore, #tpu.memory_space<semaphore_mem>>
      tpu.enqueue_dma source(%339 : memref<1x32xf32, #tpu.memory_space<any>>) target(%340 : memref<1x32xf32, #tpu.memory_space<vmem>>) target_semaphore(%342 : memref<!tpu.dma_semaphore, #tpu.memory_space<semaphore_mem>>)
      %c1_i32_317 = arith.constant 1 : i32
      %343 = arith.addi %274, %c1_i32_317 : i32
      %c4_i32_318 = arith.constant 4 : i32
      %c0_i32_319 = arith.constant 0 : i32
      %344 = tpu.memref_slice %arg8[%322, %c0_i32_319] : memref<100x32xf32, #tpu.memory_space<any>> -> memref<1x32xf32, #tpu.memory_space<any>>
      %c0_i32_320 = arith.constant 0 : i32
      %345 = tpu.memref_slice %arg19[%343, %c0_i32_320] : memref<16x32xf32, #tpu.memory_space<vmem>> -> memref<1x32xf32, #tpu.memory_space<vmem>>
      %346 = tpu.memref_slice %arg21[%c4_i32_318, %272] : memref<6x2x!tpu.dma_semaphore, #tpu.memory_space<semaphore_mem>> -> memref<1x1x!tpu.dma_semaphore, #tpu.memory_space<semaphore_mem>>
      %347 = tpu.memref_squeeze %346 : memref<1x1x!tpu.dma_semaphore, #tpu.memory_space<semaphore_mem>> -> memref<!tpu.dma_semaphore, #tpu.memory_space<semaphore_mem>>
      tpu.enqueue_dma source(%344 : memref<1x32xf32, #tpu.memory_space<any>>) target(%345 : memref<1x32xf32, #tpu.memory_space<vmem>>) target_semaphore(%347 : memref<!tpu.dma_semaphore, #tpu.memory_space<semaphore_mem>>)
      %c1_i32_321 = arith.constant 1 : i32
      %348 = arith.addi %274, %c1_i32_321 : i32
      %c5_i32_322 = arith.constant 5 : i32
      %c0_i32_323 = arith.constant 0 : i32
      %349 = tpu.memref_slice %arg9[%322, %c0_i32_323] : memref<100x32xf32, #tpu.memory_space<any>> -> memref<1x32xf32, #tpu.memory_space<any>>
      %c0_i32_324 = arith.constant 0 : i32
      %350 = tpu.memref_slice %arg20[%348, %c0_i32_324] : memref<16x32xf32, #tpu.memory_space<vmem>> -> memref<1x32xf32, #tpu.memory_space<vmem>>
      %351 = tpu.memref_slice %arg21[%c5_i32_322, %272] : memref<6x2x!tpu.dma_semaphore, #tpu.memory_space<semaphore_mem>> -> memref<1x1x!tpu.dma_semaphore, #tpu.memory_space<semaphore_mem>>
      %352 = tpu.memref_squeeze %351 : memref<1x1x!tpu.dma_semaphore, #tpu.memory_space<semaphore_mem>> -> memref<!tpu.dma_semaphore, #tpu.memory_space<semaphore_mem>>
      tpu.enqueue_dma source(%349 : memref<1x32xf32, #tpu.memory_space<any>>) target(%350 : memref<1x32xf32, #tpu.memory_space<vmem>>) target_semaphore(%352 : memref<!tpu.dma_semaphore, #tpu.memory_space<semaphore_mem>>)
      %c2_i32_325 = arith.constant 2 : i32
      %353 = arith.addi %273, %c2_i32_325 : i32
      %354 = arith.index_cast %353 : i32 to index
      %355 = memref.load %arg1[%354] : memref<32xi32, #tpu.memory_space<smem>>
      %c2_i32_326 = arith.constant 2 : i32
      %356 = arith.addi %273, %c2_i32_326 : i32
      %357 = arith.index_cast %356 : i32 to index
      %358 = memref.load %arg2[%357] : memref<32xi32, #tpu.memory_space<smem>>
      %c2_i32_327 = arith.constant 2 : i32
      %359 = arith.addi %273, %c2_i32_327 : i32
      %360 = arith.index_cast %359 : i32 to index
      %361 = memref.load %arg3[%360] : memref<32xi32, #tpu.memory_space<smem>>
      %c2_i32_328 = arith.constant 2 : i32
      %362 = arith.addi %274, %c2_i32_328 : i32
      %c0_i32_329 = arith.constant 0 : i32
      %c0_i32_330 = arith.constant 0 : i32
      %363 = tpu.memref_slice %arg6[%355, %c0_i32_330] : memref<50x32xf32, #tpu.memory_space<any>> -> memref<1x32xf32, #tpu.memory_space<any>>
      %c0_i32_331 = arith.constant 0 : i32
      %364 = tpu.memref_slice %arg15[%362, %c0_i32_331] : memref<16x32xf32, #tpu.memory_space<vmem>> -> memref<1x32xf32, #tpu.memory_space<vmem>>
      %365 = tpu.memref_slice %arg21[%c0_i32_329, %272] : memref<6x2x!tpu.dma_semaphore, #tpu.memory_space<semaphore_mem>> -> memref<1x1x!tpu.dma_semaphore, #tpu.memory_space<semaphore_mem>>
      %366 = tpu.memref_squeeze %365 : memref<1x1x!tpu.dma_semaphore, #tpu.memory_space<semaphore_mem>> -> memref<!tpu.dma_semaphore, #tpu.memory_space<semaphore_mem>>
      tpu.enqueue_dma source(%363 : memref<1x32xf32, #tpu.memory_space<any>>) target(%364 : memref<1x32xf32, #tpu.memory_space<vmem>>) target_semaphore(%366 : memref<!tpu.dma_semaphore, #tpu.memory_space<semaphore_mem>>)
      %c2_i32_332 = arith.constant 2 : i32
      %367 = arith.addi %274, %c2_i32_332 : i32
      %c1_i32_333 = arith.constant 1 : i32
      %c0_i32_334 = arith.constant 0 : i32
      %368 = tpu.memref_slice %arg7[%355, %c0_i32_334] : memref<50x32xf32, #tpu.memory_space<any>> -> memref<1x32xf32, #tpu.memory_space<any>>
      %c0_i32_335 = arith.constant 0 : i32
      %369 = tpu.memref_slice %arg16[%367, %c0_i32_335] : memref<16x32xf32, #tpu.memory_space<vmem>> -> memref<1x32xf32, #tpu.memory_space<vmem>>
      %370 = tpu.memref_slice %arg21[%c1_i32_333, %272] : memref<6x2x!tpu.dma_semaphore, #tpu.memory_space<semaphore_mem>> -> memref<1x1x!tpu.dma_semaphore, #tpu.memory_space<semaphore_mem>>
      %371 = tpu.memref_squeeze %370 : memref<1x1x!tpu.dma_semaphore, #tpu.memory_space<semaphore_mem>> -> memref<!tpu.dma_semaphore, #tpu.memory_space<semaphore_mem>>
      tpu.enqueue_dma source(%368 : memref<1x32xf32, #tpu.memory_space<any>>) target(%369 : memref<1x32xf32, #tpu.memory_space<vmem>>) target_semaphore(%371 : memref<!tpu.dma_semaphore, #tpu.memory_space<semaphore_mem>>)
      %c2_i32_336 = arith.constant 2 : i32
      %372 = arith.addi %274, %c2_i32_336 : i32
      %c2_i32_337 = arith.constant 2 : i32
      %c0_i32_338 = arith.constant 0 : i32
      %373 = tpu.memref_slice %arg8[%358, %c0_i32_338] : memref<100x32xf32, #tpu.memory_space<any>> -> memref<1x32xf32, #tpu.memory_space<any>>
      %c0_i32_339 = arith.constant 0 : i32
      %374 = tpu.memref_slice %arg17[%372, %c0_i32_339] : memref<16x32xf32, #tpu.memory_space<vmem>> -> memref<1x32xf32, #tpu.memory_space<vmem>>
      %375 = tpu.memref_slice %arg21[%c2_i32_337, %272] : memref<6x2x!tpu.dma_semaphore, #tpu.memory_space<semaphore_mem>> -> memref<1x1x!tpu.dma_semaphore, #tpu.memory_space<semaphore_mem>>
      %376 = tpu.memref_squeeze %375 : memref<1x1x!tpu.dma_semaphore, #tpu.memory_space<semaphore_mem>> -> memref<!tpu.dma_semaphore, #tpu.memory_space<semaphore_mem>>
      tpu.enqueue_dma source(%373 : memref<1x32xf32, #tpu.memory_space<any>>) target(%374 : memref<1x32xf32, #tpu.memory_space<vmem>>) target_semaphore(%376 : memref<!tpu.dma_semaphore, #tpu.memory_space<semaphore_mem>>)
      %c2_i32_340 = arith.constant 2 : i32
      %377 = arith.addi %274, %c2_i32_340 : i32
      %c3_i32_341 = arith.constant 3 : i32
      %c0_i32_342 = arith.constant 0 : i32
      %378 = tpu.memref_slice %arg9[%358, %c0_i32_342] : memref<100x32xf32, #tpu.memory_space<any>> -> memref<1x32xf32, #tpu.memory_space<any>>
      %c0_i32_343 = arith.constant 0 : i32
      %379 = tpu.memref_slice %arg18[%377, %c0_i32_343] : memref<16x32xf32, #tpu.memory_space<vmem>> -> memref<1x32xf32, #tpu.memory_space<vmem>>
      %380 = tpu.memref_slice %arg21[%c3_i32_341, %272] : memref<6x2x!tpu.dma_semaphore, #tpu.memory_space<semaphore_mem>> -> memref<1x1x!tpu.dma_semaphore, #tpu.memory_space<semaphore_mem>>
      %381 = tpu.memref_squeeze %380 : memref<1x1x!tpu.dma_semaphore, #tpu.memory_space<semaphore_mem>> -> memref<!tpu.dma_semaphore, #tpu.memory_space<semaphore_mem>>
      tpu.enqueue_dma source(%378 : memref<1x32xf32, #tpu.memory_space<any>>) target(%379 : memref<1x32xf32, #tpu.memory_space<vmem>>) target_semaphore(%381 : memref<!tpu.dma_semaphore, #tpu.memory_space<semaphore_mem>>)
      %c2_i32_344 = arith.constant 2 : i32
      %382 = arith.addi %274, %c2_i32_344 : i32
      %c4_i32_345 = arith.constant 4 : i32
      %c0_i32_346 = arith.constant 0 : i32
      %383 = tpu.memref_slice %arg8[%361, %c0_i32_346] : memref<100x32xf32, #tpu.memory_space<any>> -> memref<1x32xf32, #tpu.memory_space<any>>
      %c0_i32_347 = arith.constant 0 : i32
      %384 = tpu.memref_slice %arg19[%382, %c0_i32_347] : memref<16x32xf32, #tpu.memory_space<vmem>> -> memref<1x32xf32, #tpu.memory_space<vmem>>
      %385 = tpu.memref_slice %arg21[%c4_i32_345, %272] : memref<6x2x!tpu.dma_semaphore, #tpu.memory_space<semaphore_mem>> -> memref<1x1x!tpu.dma_semaphore, #tpu.memory_space<semaphore_mem>>
      %386 = tpu.memref_squeeze %385 : memref<1x1x!tpu.dma_semaphore, #tpu.memory_space<semaphore_mem>> -> memref<!tpu.dma_semaphore, #tpu.memory_space<semaphore_mem>>
      tpu.enqueue_dma source(%383 : memref<1x32xf32, #tpu.memory_space<any>>) target(%384 : memref<1x32xf32, #tpu.memory_space<vmem>>) target_semaphore(%386 : memref<!tpu.dma_semaphore, #tpu.memory_space<semaphore_mem>>)
      %c2_i32_348 = arith.constant 2 : i32
      %387 = arith.addi %274, %c2_i32_348 : i32
      %c5_i32_349 = arith.constant 5 : i32
      %c0_i32_350 = arith.constant 0 : i32
      %388 = tpu.memref_slice %arg9[%361, %c0_i32_350] : memref<100x32xf32, #tpu.memory_space<any>> -> memref<1x32xf32, #tpu.memory_space<any>>
      %c0_i32_351 = arith.constant 0 : i32
      %389 = tpu.memref_slice %arg20[%387, %c0_i32_351] : memref<16x32xf32, #tpu.memory_space<vmem>> -> memref<1x32xf32, #tpu.memory_space<vmem>>
      %390 = tpu.memref_slice %arg21[%c5_i32_349, %272] : memref<6x2x!tpu.dma_semaphore, #tpu.memory_space<semaphore_mem>> -> memref<1x1x!tpu.dma_semaphore, #tpu.memory_space<semaphore_mem>>
      %391 = tpu.memref_squeeze %390 : memref<1x1x!tpu.dma_semaphore, #tpu.memory_space<semaphore_mem>> -> memref<!tpu.dma_semaphore, #tpu.memory_space<semaphore_mem>>
      tpu.enqueue_dma source(%388 : memref<1x32xf32, #tpu.memory_space<any>>) target(%389 : memref<1x32xf32, #tpu.memory_space<vmem>>) target_semaphore(%391 : memref<!tpu.dma_semaphore, #tpu.memory_space<semaphore_mem>>)
      %c3_i32_352 = arith.constant 3 : i32
      %392 = arith.addi %273, %c3_i32_352 : i32
      %393 = arith.index_cast %392 : i32 to index
      %394 = memref.load %arg1[%393] : memref<32xi32, #tpu.memory_space<smem>>
      %c3_i32_353 = arith.constant 3 : i32
      %395 = arith.addi %273, %c3_i32_353 : i32
      %396 = arith.index_cast %395 : i32 to index
      %397 = memref.load %arg2[%396] : memref<32xi32, #tpu.memory_space<smem>>
      %c3_i32_354 = arith.constant 3 : i32
      %398 = arith.addi %273, %c3_i32_354 : i32
      %399 = arith.index_cast %398 : i32 to index
      %400 = memref.load %arg3[%399] : memref<32xi32, #tpu.memory_space<smem>>
      %c3_i32_355 = arith.constant 3 : i32
      %401 = arith.addi %274, %c3_i32_355 : i32
      %c0_i32_356 = arith.constant 0 : i32
      %c0_i32_357 = arith.constant 0 : i32
      %402 = tpu.memref_slice %arg6[%394, %c0_i32_357] : memref<50x32xf32, #tpu.memory_space<any>> -> memref<1x32xf32, #tpu.memory_space<any>>
      %c0_i32_358 = arith.constant 0 : i32
      %403 = tpu.memref_slice %arg15[%401, %c0_i32_358] : memref<16x32xf32, #tpu.memory_space<vmem>> -> memref<1x32xf32, #tpu.memory_space<vmem>>
      %404 = tpu.memref_slice %arg21[%c0_i32_356, %272] : memref<6x2x!tpu.dma_semaphore, #tpu.memory_space<semaphore_mem>> -> memref<1x1x!tpu.dma_semaphore, #tpu.memory_space<semaphore_mem>>
      %405 = tpu.memref_squeeze %404 : memref<1x1x!tpu.dma_semaphore, #tpu.memory_space<semaphore_mem>> -> memref<!tpu.dma_semaphore, #tpu.memory_space<semaphore_mem>>
      tpu.enqueue_dma source(%402 : memref<1x32xf32, #tpu.memory_space<any>>) target(%403 : memref<1x32xf32, #tpu.memory_space<vmem>>) target_semaphore(%405 : memref<!tpu.dma_semaphore, #tpu.memory_space<semaphore_mem>>)
      %c3_i32_359 = arith.constant 3 : i32
      %406 = arith.addi %274, %c3_i32_359 : i32
      %c1_i32_360 = arith.constant 1 : i32
      %c0_i32_361 = arith.constant 0 : i32
      %407 = tpu.memref_slice %arg7[%394, %c0_i32_361] : memref<50x32xf32, #tpu.memory_space<any>> -> memref<1x32xf32, #tpu.memory_space<any>>
      %c0_i32_362 = arith.constant 0 : i32
      %408 = tpu.memref_slice %arg16[%406, %c0_i32_362] : memref<16x32xf32, #tpu.memory_space<vmem>> -> memref<1x32xf32, #tpu.memory_space<vmem>>
      %409 = tpu.memref_slice %arg21[%c1_i32_360, %272] : memref<6x2x!tpu.dma_semaphore, #tpu.memory_space<semaphore_mem>> -> memref<1x1x!tpu.dma_semaphore, #tpu.memory_space<semaphore_mem>>
      %410 = tpu.memref_squeeze %409 : memref<1x1x!tpu.dma_semaphore, #tpu.memory_space<semaphore_mem>> -> memref<!tpu.dma_semaphore, #tpu.memory_space<semaphore_mem>>
      tpu.enqueue_dma source(%407 : memref<1x32xf32, #tpu.memory_space<any>>) target(%408 : memref<1x32xf32, #tpu.memory_space<vmem>>) target_semaphore(%410 : memref<!tpu.dma_semaphore, #tpu.memory_space<semaphore_mem>>)
      %c3_i32_363 = arith.constant 3 : i32
      %411 = arith.addi %274, %c3_i32_363 : i32
      %c2_i32_364 = arith.constant 2 : i32
      %c0_i32_365 = arith.constant 0 : i32
      %412 = tpu.memref_slice %arg8[%397, %c0_i32_365] : memref<100x32xf32, #tpu.memory_space<any>> -> memref<1x32xf32, #tpu.memory_space<any>>
      %c0_i32_366 = arith.constant 0 : i32
      %413 = tpu.memref_slice %arg17[%411, %c0_i32_366] : memref<16x32xf32, #tpu.memory_space<vmem>> -> memref<1x32xf32, #tpu.memory_space<vmem>>
      %414 = tpu.memref_slice %arg21[%c2_i32_364, %272] : memref<6x2x!tpu.dma_semaphore, #tpu.memory_space<semaphore_mem>> -> memref<1x1x!tpu.dma_semaphore, #tpu.memory_space<semaphore_mem>>
      %415 = tpu.memref_squeeze %414 : memref<1x1x!tpu.dma_semaphore, #tpu.memory_space<semaphore_mem>> -> memref<!tpu.dma_semaphore, #tpu.memory_space<semaphore_mem>>
      tpu.enqueue_dma source(%412 : memref<1x32xf32, #tpu.memory_space<any>>) target(%413 : memref<1x32xf32, #tpu.memory_space<vmem>>) target_semaphore(%415 : memref<!tpu.dma_semaphore, #tpu.memory_space<semaphore_mem>>)
      %c3_i32_367 = arith.constant 3 : i32
      %416 = arith.addi %274, %c3_i32_367 : i32
      %c3_i32_368 = arith.constant 3 : i32
      %c0_i32_369 = arith.constant 0 : i32
      %417 = tpu.memref_slice %arg9[%397, %c0_i32_369] : memref<100x32xf32, #tpu.memory_space<any>> -> memref<1x32xf32, #tpu.memory_space<any>>
      %c0_i32_370 = arith.constant 0 : i32
      %418 = tpu.memref_slice %arg18[%416, %c0_i32_370] : memref<16x32xf32, #tpu.memory_space<vmem>> -> memref<1x32xf32, #tpu.memory_space<vmem>>
      %419 = tpu.memref_slice %arg21[%c3_i32_368, %272] : memref<6x2x!tpu.dma_semaphore, #tpu.memory_space<semaphore_mem>> -> memref<1x1x!tpu.dma_semaphore, #tpu.memory_space<semaphore_mem>>
      %420 = tpu.memref_squeeze %419 : memref<1x1x!tpu.dma_semaphore, #tpu.memory_space<semaphore_mem>> -> memref<!tpu.dma_semaphore, #tpu.memory_space<semaphore_mem>>
      tpu.enqueue_dma source(%417 : memref<1x32xf32, #tpu.memory_space<any>>) target(%418 : memref<1x32xf32, #tpu.memory_space<vmem>>) target_semaphore(%420 : memref<!tpu.dma_semaphore, #tpu.memory_space<semaphore_mem>>)
      %c3_i32_371 = arith.constant 3 : i32
      %421 = arith.addi %274, %c3_i32_371 : i32
      %c4_i32_372 = arith.constant 4 : i32
      %c0_i32_373 = arith.constant 0 : i32
      %422 = tpu.memref_slice %arg8[%400, %c0_i32_373] : memref<100x32xf32, #tpu.memory_space<any>> -> memref<1x32xf32, #tpu.memory_space<any>>
      %c0_i32_374 = arith.constant 0 : i32
      %423 = tpu.memref_slice %arg19[%421, %c0_i32_374] : memref<16x32xf32, #tpu.memory_space<vmem>> -> memref<1x32xf32, #tpu.memory_space<vmem>>
      %424 = tpu.memref_slice %arg21[%c4_i32_372, %272] : memref<6x2x!tpu.dma_semaphore, #tpu.memory_space<semaphore_mem>> -> memref<1x1x!tpu.dma_semaphore, #tpu.memory_space<semaphore_mem>>
      %425 = tpu.memref_squeeze %424 : memref<1x1x!tpu.dma_semaphore, #tpu.memory_space<semaphore_mem>> -> memref<!tpu.dma_semaphore, #tpu.memory_space<semaphore_mem>>
      tpu.enqueue_dma source(%422 : memref<1x32xf32, #tpu.memory_space<any>>) target(%423 : memref<1x32xf32, #tpu.memory_space<vmem>>) target_semaphore(%425 : memref<!tpu.dma_semaphore, #tpu.memory_space<semaphore_mem>>)
      %c3_i32_375 = arith.constant 3 : i32
      %426 = arith.addi %274, %c3_i32_375 : i32
      %c5_i32_376 = arith.constant 5 : i32
      %c0_i32_377 = arith.constant 0 : i32
      %427 = tpu.memref_slice %arg9[%400, %c0_i32_377] : memref<100x32xf32, #tpu.memory_space<any>> -> memref<1x32xf32, #tpu.memory_space<any>>
      %c0_i32_378 = arith.constant 0 : i32
      %428 = tpu.memref_slice %arg20[%426, %c0_i32_378] : memref<16x32xf32, #tpu.memory_space<vmem>> -> memref<1x32xf32, #tpu.memory_space<vmem>>
      %429 = tpu.memref_slice %arg21[%c5_i32_376, %272] : memref<6x2x!tpu.dma_semaphore, #tpu.memory_space<semaphore_mem>> -> memref<1x1x!tpu.dma_semaphore, #tpu.memory_space<semaphore_mem>>
      %430 = tpu.memref_squeeze %429 : memref<1x1x!tpu.dma_semaphore, #tpu.memory_space<semaphore_mem>> -> memref<!tpu.dma_semaphore, #tpu.memory_space<semaphore_mem>>
      tpu.enqueue_dma source(%427 : memref<1x32xf32, #tpu.memory_space<any>>) target(%428 : memref<1x32xf32, #tpu.memory_space<vmem>>) target_semaphore(%430 : memref<!tpu.dma_semaphore, #tpu.memory_space<semaphore_mem>>)
      %c4_i32_379 = arith.constant 4 : i32
      %431 = arith.addi %273, %c4_i32_379 : i32
      %432 = arith.index_cast %431 : i32 to index
      %433 = memref.load %arg1[%432] : memref<32xi32, #tpu.memory_space<smem>>
      %c4_i32_380 = arith.constant 4 : i32
      %434 = arith.addi %273, %c4_i32_380 : i32
      %435 = arith.index_cast %434 : i32 to index
      %436 = memref.load %arg2[%435] : memref<32xi32, #tpu.memory_space<smem>>
      %c4_i32_381 = arith.constant 4 : i32
      %437 = arith.addi %273, %c4_i32_381 : i32
      %438 = arith.index_cast %437 : i32 to index
      %439 = memref.load %arg3[%438] : memref<32xi32, #tpu.memory_space<smem>>
      %c4_i32_382 = arith.constant 4 : i32
      %440 = arith.addi %274, %c4_i32_382 : i32
      %c0_i32_383 = arith.constant 0 : i32
      %c0_i32_384 = arith.constant 0 : i32
      %441 = tpu.memref_slice %arg6[%433, %c0_i32_384] : memref<50x32xf32, #tpu.memory_space<any>> -> memref<1x32xf32, #tpu.memory_space<any>>
      %c0_i32_385 = arith.constant 0 : i32
      %442 = tpu.memref_slice %arg15[%440, %c0_i32_385] : memref<16x32xf32, #tpu.memory_space<vmem>> -> memref<1x32xf32, #tpu.memory_space<vmem>>
      %443 = tpu.memref_slice %arg21[%c0_i32_383, %272] : memref<6x2x!tpu.dma_semaphore, #tpu.memory_space<semaphore_mem>> -> memref<1x1x!tpu.dma_semaphore, #tpu.memory_space<semaphore_mem>>
      %444 = tpu.memref_squeeze %443 : memref<1x1x!tpu.dma_semaphore, #tpu.memory_space<semaphore_mem>> -> memref<!tpu.dma_semaphore, #tpu.memory_space<semaphore_mem>>
      tpu.enqueue_dma source(%441 : memref<1x32xf32, #tpu.memory_space<any>>) target(%442 : memref<1x32xf32, #tpu.memory_space<vmem>>) target_semaphore(%444 : memref<!tpu.dma_semaphore, #tpu.memory_space<semaphore_mem>>)
      %c4_i32_386 = arith.constant 4 : i32
      %445 = arith.addi %274, %c4_i32_386 : i32
      %c1_i32_387 = arith.constant 1 : i32
      %c0_i32_388 = arith.constant 0 : i32
      %446 = tpu.memref_slice %arg7[%433, %c0_i32_388] : memref<50x32xf32, #tpu.memory_space<any>> -> memref<1x32xf32, #tpu.memory_space<any>>
      %c0_i32_389 = arith.constant 0 : i32
      %447 = tpu.memref_slice %arg16[%445, %c0_i32_389] : memref<16x32xf32, #tpu.memory_space<vmem>> -> memref<1x32xf32, #tpu.memory_space<vmem>>
      %448 = tpu.memref_slice %arg21[%c1_i32_387, %272] : memref<6x2x!tpu.dma_semaphore, #tpu.memory_space<semaphore_mem>> -> memref<1x1x!tpu.dma_semaphore, #tpu.memory_space<semaphore_mem>>
      %449 = tpu.memref_squeeze %448 : memref<1x1x!tpu.dma_semaphore, #tpu.memory_space<semaphore_mem>> -> memref<!tpu.dma_semaphore, #tpu.memory_space<semaphore_mem>>
      tpu.enqueue_dma source(%446 : memref<1x32xf32, #tpu.memory_space<any>>) target(%447 : memref<1x32xf32, #tpu.memory_space<vmem>>) target_semaphore(%449 : memref<!tpu.dma_semaphore, #tpu.memory_space<semaphore_mem>>)
      %c4_i32_390 = arith.constant 4 : i32
      %450 = arith.addi %274, %c4_i32_390 : i32
      %c2_i32_391 = arith.constant 2 : i32
      %c0_i32_392 = arith.constant 0 : i32
      %451 = tpu.memref_slice %arg8[%436, %c0_i32_392] : memref<100x32xf32, #tpu.memory_space<any>> -> memref<1x32xf32, #tpu.memory_space<any>>
      %c0_i32_393 = arith.constant 0 : i32
      %452 = tpu.memref_slice %arg17[%450, %c0_i32_393] : memref<16x32xf32, #tpu.memory_space<vmem>> -> memref<1x32xf32, #tpu.memory_space<vmem>>
      %453 = tpu.memref_slice %arg21[%c2_i32_391, %272] : memref<6x2x!tpu.dma_semaphore, #tpu.memory_space<semaphore_mem>> -> memref<1x1x!tpu.dma_semaphore, #tpu.memory_space<semaphore_mem>>
      %454 = tpu.memref_squeeze %453 : memref<1x1x!tpu.dma_semaphore, #tpu.memory_space<semaphore_mem>> -> memref<!tpu.dma_semaphore, #tpu.memory_space<semaphore_mem>>
      tpu.enqueue_dma source(%451 : memref<1x32xf32, #tpu.memory_space<any>>) target(%452 : memref<1x32xf32, #tpu.memory_space<vmem>>) target_semaphore(%454 : memref<!tpu.dma_semaphore, #tpu.memory_space<semaphore_mem>>)
      %c4_i32_394 = arith.constant 4 : i32
      %455 = arith.addi %274, %c4_i32_394 : i32
      %c3_i32_395 = arith.constant 3 : i32
      %c0_i32_396 = arith.constant 0 : i32
      %456 = tpu.memref_slice %arg9[%436, %c0_i32_396] : memref<100x32xf32, #tpu.memory_space<any>> -> memref<1x32xf32, #tpu.memory_space<any>>
      %c0_i32_397 = arith.constant 0 : i32
      %457 = tpu.memref_slice %arg18[%455, %c0_i32_397] : memref<16x32xf32, #tpu.memory_space<vmem>> -> memref<1x32xf32, #tpu.memory_space<vmem>>
      %458 = tpu.memref_slice %arg21[%c3_i32_395, %272] : memref<6x2x!tpu.dma_semaphore, #tpu.memory_space<semaphore_mem>> -> memref<1x1x!tpu.dma_semaphore, #tpu.memory_space<semaphore_mem>>
      %459 = tpu.memref_squeeze %458 : memref<1x1x!tpu.dma_semaphore, #tpu.memory_space<semaphore_mem>> -> memref<!tpu.dma_semaphore, #tpu.memory_space<semaphore_mem>>
      tpu.enqueue_dma source(%456 : memref<1x32xf32, #tpu.memory_space<any>>) target(%457 : memref<1x32xf32, #tpu.memory_space<vmem>>) target_semaphore(%459 : memref<!tpu.dma_semaphore, #tpu.memory_space<semaphore_mem>>)
      %c4_i32_398 = arith.constant 4 : i32
      %460 = arith.addi %274, %c4_i32_398 : i32
      %c4_i32_399 = arith.constant 4 : i32
      %c0_i32_400 = arith.constant 0 : i32
      %461 = tpu.memref_slice %arg8[%439, %c0_i32_400] : memref<100x32xf32, #tpu.memory_space<any>> -> memref<1x32xf32, #tpu.memory_space<any>>
      %c0_i32_401 = arith.constant 0 : i32
      %462 = tpu.memref_slice %arg19[%460, %c0_i32_401] : memref<16x32xf32, #tpu.memory_space<vmem>> -> memref<1x32xf32, #tpu.memory_space<vmem>>
      %463 = tpu.memref_slice %arg21[%c4_i32_399, %272] : memref<6x2x!tpu.dma_semaphore, #tpu.memory_space<semaphore_mem>> -> memref<1x1x!tpu.dma_semaphore, #tpu.memory_space<semaphore_mem>>
      %464 = tpu.memref_squeeze %463 : memref<1x1x!tpu.dma_semaphore, #tpu.memory_space<semaphore_mem>> -> memref<!tpu.dma_semaphore, #tpu.memory_space<semaphore_mem>>
      tpu.enqueue_dma source(%461 : memref<1x32xf32, #tpu.memory_space<any>>) target(%462 : memref<1x32xf32, #tpu.memory_space<vmem>>) target_semaphore(%464 : memref<!tpu.dma_semaphore, #tpu.memory_space<semaphore_mem>>)
      %c4_i32_402 = arith.constant 4 : i32
      %465 = arith.addi %274, %c4_i32_402 : i32
      %c5_i32_403 = arith.constant 5 : i32
      %c0_i32_404 = arith.constant 0 : i32
      %466 = tpu.memref_slice %arg9[%439, %c0_i32_404] : memref<100x32xf32, #tpu.memory_space<any>> -> memref<1x32xf32, #tpu.memory_space<any>>
      %c0_i32_405 = arith.constant 0 : i32
      %467 = tpu.memref_slice %arg20[%465, %c0_i32_405] : memref<16x32xf32, #tpu.memory_space<vmem>> -> memref<1x32xf32, #tpu.memory_space<vmem>>
      %468 = tpu.memref_slice %arg21[%c5_i32_403, %272] : memref<6x2x!tpu.dma_semaphore, #tpu.memory_space<semaphore_mem>> -> memref<1x1x!tpu.dma_semaphore, #tpu.memory_space<semaphore_mem>>
      %469 = tpu.memref_squeeze %468 : memref<1x1x!tpu.dma_semaphore, #tpu.memory_space<semaphore_mem>> -> memref<!tpu.dma_semaphore, #tpu.memory_space<semaphore_mem>>
      tpu.enqueue_dma source(%466 : memref<1x32xf32, #tpu.memory_space<any>>) target(%467 : memref<1x32xf32, #tpu.memory_space<vmem>>) target_semaphore(%469 : memref<!tpu.dma_semaphore, #tpu.memory_space<semaphore_mem>>)
      %c5_i32_406 = arith.constant 5 : i32
      %470 = arith.addi %273, %c5_i32_406 : i32
      %471 = arith.index_cast %470 : i32 to index
      %472 = memref.load %arg1[%471] : memref<32xi32, #tpu.memory_space<smem>>
      %c5_i32_407 = arith.constant 5 : i32
      %473 = arith.addi %273, %c5_i32_407 : i32
      %474 = arith.index_cast %473 : i32 to index
      %475 = memref.load %arg2[%474] : memref<32xi32, #tpu.memory_space<smem>>
      %c5_i32_408 = arith.constant 5 : i32
      %476 = arith.addi %273, %c5_i32_408 : i32
      %477 = arith.index_cast %476 : i32 to index
      %478 = memref.load %arg3[%477] : memref<32xi32, #tpu.memory_space<smem>>
      %c5_i32_409 = arith.constant 5 : i32
      %479 = arith.addi %274, %c5_i32_409 : i32
      %c0_i32_410 = arith.constant 0 : i32
      %c0_i32_411 = arith.constant 0 : i32
      %480 = tpu.memref_slice %arg6[%472, %c0_i32_411] : memref<50x32xf32, #tpu.memory_space<any>> -> memref<1x32xf32, #tpu.memory_space<any>>
      %c0_i32_412 = arith.constant 0 : i32
      %481 = tpu.memref_slice %arg15[%479, %c0_i32_412] : memref<16x32xf32, #tpu.memory_space<vmem>> -> memref<1x32xf32, #tpu.memory_space<vmem>>
      %482 = tpu.memref_slice %arg21[%c0_i32_410, %272] : memref<6x2x!tpu.dma_semaphore, #tpu.memory_space<semaphore_mem>> -> memref<1x1x!tpu.dma_semaphore, #tpu.memory_space<semaphore_mem>>
      %483 = tpu.memref_squeeze %482 : memref<1x1x!tpu.dma_semaphore, #tpu.memory_space<semaphore_mem>> -> memref<!tpu.dma_semaphore, #tpu.memory_space<semaphore_mem>>
      tpu.enqueue_dma source(%480 : memref<1x32xf32, #tpu.memory_space<any>>) target(%481 : memref<1x32xf32, #tpu.memory_space<vmem>>) target_semaphore(%483 : memref<!tpu.dma_semaphore, #tpu.memory_space<semaphore_mem>>)
      %c5_i32_413 = arith.constant 5 : i32
      %484 = arith.addi %274, %c5_i32_413 : i32
      %c1_i32_414 = arith.constant 1 : i32
      %c0_i32_415 = arith.constant 0 : i32
      %485 = tpu.memref_slice %arg7[%472, %c0_i32_415] : memref<50x32xf32, #tpu.memory_space<any>> -> memref<1x32xf32, #tpu.memory_space<any>>
      %c0_i32_416 = arith.constant 0 : i32
      %486 = tpu.memref_slice %arg16[%484, %c0_i32_416] : memref<16x32xf32, #tpu.memory_space<vmem>> -> memref<1x32xf32, #tpu.memory_space<vmem>>
      %487 = tpu.memref_slice %arg21[%c1_i32_414, %272] : memref<6x2x!tpu.dma_semaphore, #tpu.memory_space<semaphore_mem>> -> memref<1x1x!tpu.dma_semaphore, #tpu.memory_space<semaphore_mem>>
      %488 = tpu.memref_squeeze %487 : memref<1x1x!tpu.dma_semaphore, #tpu.memory_space<semaphore_mem>> -> memref<!tpu.dma_semaphore, #tpu.memory_space<semaphore_mem>>
      tpu.enqueue_dma source(%485 : memref<1x32xf32, #tpu.memory_space<any>>) target(%486 : memref<1x32xf32, #tpu.memory_space<vmem>>) target_semaphore(%488 : memref<!tpu.dma_semaphore, #tpu.memory_space<semaphore_mem>>)
      %c5_i32_417 = arith.constant 5 : i32
      %489 = arith.addi %274, %c5_i32_417 : i32
      %c2_i32_418 = arith.constant 2 : i32
      %c0_i32_419 = arith.constant 0 : i32
      %490 = tpu.memref_slice %arg8[%475, %c0_i32_419] : memref<100x32xf32, #tpu.memory_space<any>> -> memref<1x32xf32, #tpu.memory_space<any>>
      %c0_i32_420 = arith.constant 0 : i32
      %491 = tpu.memref_slice %arg17[%489, %c0_i32_420] : memref<16x32xf32, #tpu.memory_space<vmem>> -> memref<1x32xf32, #tpu.memory_space<vmem>>
      %492 = tpu.memref_slice %arg21[%c2_i32_418, %272] : memref<6x2x!tpu.dma_semaphore, #tpu.memory_space<semaphore_mem>> -> memref<1x1x!tpu.dma_semaphore, #tpu.memory_space<semaphore_mem>>
      %493 = tpu.memref_squeeze %492 : memref<1x1x!tpu.dma_semaphore, #tpu.memory_space<semaphore_mem>> -> memref<!tpu.dma_semaphore, #tpu.memory_space<semaphore_mem>>
      tpu.enqueue_dma source(%490 : memref<1x32xf32, #tpu.memory_space<any>>) target(%491 : memref<1x32xf32, #tpu.memory_space<vmem>>) target_semaphore(%493 : memref<!tpu.dma_semaphore, #tpu.memory_space<semaphore_mem>>)
      %c5_i32_421 = arith.constant 5 : i32
      %494 = arith.addi %274, %c5_i32_421 : i32
      %c3_i32_422 = arith.constant 3 : i32
      %c0_i32_423 = arith.constant 0 : i32
      %495 = tpu.memref_slice %arg9[%475, %c0_i32_423] : memref<100x32xf32, #tpu.memory_space<any>> -> memref<1x32xf32, #tpu.memory_space<any>>
      %c0_i32_424 = arith.constant 0 : i32
      %496 = tpu.memref_slice %arg18[%494, %c0_i32_424] : memref<16x32xf32, #tpu.memory_space<vmem>> -> memref<1x32xf32, #tpu.memory_space<vmem>>
      %497 = tpu.memref_slice %arg21[%c3_i32_422, %272] : memref<6x2x!tpu.dma_semaphore, #tpu.memory_space<semaphore_mem>> -> memref<1x1x!tpu.dma_semaphore, #tpu.memory_space<semaphore_mem>>
      %498 = tpu.memref_squeeze %497 : memref<1x1x!tpu.dma_semaphore, #tpu.memory_space<semaphore_mem>> -> memref<!tpu.dma_semaphore, #tpu.memory_space<semaphore_mem>>
      tpu.enqueue_dma source(%495 : memref<1x32xf32, #tpu.memory_space<any>>) target(%496 : memref<1x32xf32, #tpu.memory_space<vmem>>) target_semaphore(%498 : memref<!tpu.dma_semaphore, #tpu.memory_space<semaphore_mem>>)
      %c5_i32_425 = arith.constant 5 : i32
      %499 = arith.addi %274, %c5_i32_425 : i32
      %c4_i32_426 = arith.constant 4 : i32
      %c0_i32_427 = arith.constant 0 : i32
      %500 = tpu.memref_slice %arg8[%478, %c0_i32_427] : memref<100x32xf32, #tpu.memory_space<any>> -> memref<1x32xf32, #tpu.memory_space<any>>
      %c0_i32_428 = arith.constant 0 : i32
      %501 = tpu.memref_slice %arg19[%499, %c0_i32_428] : memref<16x32xf32, #tpu.memory_space<vmem>> -> memref<1x32xf32, #tpu.memory_space<vmem>>
      %502 = tpu.memref_slice %arg21[%c4_i32_426, %272] : memref<6x2x!tpu.dma_semaphore, #tpu.memory_space<semaphore_mem>> -> memref<1x1x!tpu.dma_semaphore, #tpu.memory_space<semaphore_mem>>
      %503 = tpu.memref_squeeze %502 : memref<1x1x!tpu.dma_semaphore, #tpu.memory_space<semaphore_mem>> -> memref<!tpu.dma_semaphore, #tpu.memory_space<semaphore_mem>>
      tpu.enqueue_dma source(%500 : memref<1x32xf32, #tpu.memory_space<any>>) target(%501 : memref<1x32xf32, #tpu.memory_space<vmem>>) target_semaphore(%503 : memref<!tpu.dma_semaphore, #tpu.memory_space<semaphore_mem>>)
      %c5_i32_429 = arith.constant 5 : i32
      %504 = arith.addi %274, %c5_i32_429 : i32
      %c5_i32_430 = arith.constant 5 : i32
      %c0_i32_431 = arith.constant 0 : i32
      %505 = tpu.memref_slice %arg9[%478, %c0_i32_431] : memref<100x32xf32, #tpu.memory_space<any>> -> memref<1x32xf32, #tpu.memory_space<any>>
      %c0_i32_432 = arith.constant 0 : i32
      %506 = tpu.memref_slice %arg20[%504, %c0_i32_432] : memref<16x32xf32, #tpu.memory_space<vmem>> -> memref<1x32xf32, #tpu.memory_space<vmem>>
      %507 = tpu.memref_slice %arg21[%c5_i32_430, %272] : memref<6x2x!tpu.dma_semaphore, #tpu.memory_space<semaphore_mem>> -> memref<1x1x!tpu.dma_semaphore, #tpu.memory_space<semaphore_mem>>
      %508 = tpu.memref_squeeze %507 : memref<1x1x!tpu.dma_semaphore, #tpu.memory_space<semaphore_mem>> -> memref<!tpu.dma_semaphore, #tpu.memory_space<semaphore_mem>>
      tpu.enqueue_dma source(%505 : memref<1x32xf32, #tpu.memory_space<any>>) target(%506 : memref<1x32xf32, #tpu.memory_space<vmem>>) target_semaphore(%508 : memref<!tpu.dma_semaphore, #tpu.memory_space<semaphore_mem>>)
      %c6_i32 = arith.constant 6 : i32
      %509 = arith.addi %273, %c6_i32 : i32
      %510 = arith.index_cast %509 : i32 to index
      %511 = memref.load %arg1[%510] : memref<32xi32, #tpu.memory_space<smem>>
      %c6_i32_433 = arith.constant 6 : i32
      %512 = arith.addi %273, %c6_i32_433 : i32
      %513 = arith.index_cast %512 : i32 to index
      %514 = memref.load %arg2[%513] : memref<32xi32, #tpu.memory_space<smem>>
      %c6_i32_434 = arith.constant 6 : i32
      %515 = arith.addi %273, %c6_i32_434 : i32
      %516 = arith.index_cast %515 : i32 to index
      %517 = memref.load %arg3[%516] : memref<32xi32, #tpu.memory_space<smem>>
      %c6_i32_435 = arith.constant 6 : i32
      %518 = arith.addi %274, %c6_i32_435 : i32
      %c0_i32_436 = arith.constant 0 : i32
      %c0_i32_437 = arith.constant 0 : i32
      %519 = tpu.memref_slice %arg6[%511, %c0_i32_437] : memref<50x32xf32, #tpu.memory_space<any>> -> memref<1x32xf32, #tpu.memory_space<any>>
      %c0_i32_438 = arith.constant 0 : i32
      %520 = tpu.memref_slice %arg15[%518, %c0_i32_438] : memref<16x32xf32, #tpu.memory_space<vmem>> -> memref<1x32xf32, #tpu.memory_space<vmem>>
      %521 = tpu.memref_slice %arg21[%c0_i32_436, %272] : memref<6x2x!tpu.dma_semaphore, #tpu.memory_space<semaphore_mem>> -> memref<1x1x!tpu.dma_semaphore, #tpu.memory_space<semaphore_mem>>
      %522 = tpu.memref_squeeze %521 : memref<1x1x!tpu.dma_semaphore, #tpu.memory_space<semaphore_mem>> -> memref<!tpu.dma_semaphore, #tpu.memory_space<semaphore_mem>>
      tpu.enqueue_dma source(%519 : memref<1x32xf32, #tpu.memory_space<any>>) target(%520 : memref<1x32xf32, #tpu.memory_space<vmem>>) target_semaphore(%522 : memref<!tpu.dma_semaphore, #tpu.memory_space<semaphore_mem>>)
      %c6_i32_439 = arith.constant 6 : i32
      %523 = arith.addi %274, %c6_i32_439 : i32
      %c1_i32_440 = arith.constant 1 : i32
      %c0_i32_441 = arith.constant 0 : i32
      %524 = tpu.memref_slice %arg7[%511, %c0_i32_441] : memref<50x32xf32, #tpu.memory_space<any>> -> memref<1x32xf32, #tpu.memory_space<any>>
      %c0_i32_442 = arith.constant 0 : i32
      %525 = tpu.memref_slice %arg16[%523, %c0_i32_442] : memref<16x32xf32, #tpu.memory_space<vmem>> -> memref<1x32xf32, #tpu.memory_space<vmem>>
      %526 = tpu.memref_slice %arg21[%c1_i32_440, %272] : memref<6x2x!tpu.dma_semaphore, #tpu.memory_space<semaphore_mem>> -> memref<1x1x!tpu.dma_semaphore, #tpu.memory_space<semaphore_mem>>
      %527 = tpu.memref_squeeze %526 : memref<1x1x!tpu.dma_semaphore, #tpu.memory_space<semaphore_mem>> -> memref<!tpu.dma_semaphore, #tpu.memory_space<semaphore_mem>>
      tpu.enqueue_dma source(%524 : memref<1x32xf32, #tpu.memory_space<any>>) target(%525 : memref<1x32xf32, #tpu.memory_space<vmem>>) target_semaphore(%527 : memref<!tpu.dma_semaphore, #tpu.memory_space<semaphore_mem>>)
      %c6_i32_443 = arith.constant 6 : i32
      %528 = arith.addi %274, %c6_i32_443 : i32
      %c2_i32_444 = arith.constant 2 : i32
      %c0_i32_445 = arith.constant 0 : i32
      %529 = tpu.memref_slice %arg8[%514, %c0_i32_445] : memref<100x32xf32, #tpu.memory_space<any>> -> memref<1x32xf32, #tpu.memory_space<any>>
      %c0_i32_446 = arith.constant 0 : i32
      %530 = tpu.memref_slice %arg17[%528, %c0_i32_446] : memref<16x32xf32, #tpu.memory_space<vmem>> -> memref<1x32xf32, #tpu.memory_space<vmem>>
      %531 = tpu.memref_slice %arg21[%c2_i32_444, %272] : memref<6x2x!tpu.dma_semaphore, #tpu.memory_space<semaphore_mem>> -> memref<1x1x!tpu.dma_semaphore, #tpu.memory_space<semaphore_mem>>
      %532 = tpu.memref_squeeze %531 : memref<1x1x!tpu.dma_semaphore, #tpu.memory_space<semaphore_mem>> -> memref<!tpu.dma_semaphore, #tpu.memory_space<semaphore_mem>>
      tpu.enqueue_dma source(%529 : memref<1x32xf32, #tpu.memory_space<any>>) target(%530 : memref<1x32xf32, #tpu.memory_space<vmem>>) target_semaphore(%532 : memref<!tpu.dma_semaphore, #tpu.memory_space<semaphore_mem>>)
      %c6_i32_447 = arith.constant 6 : i32
      %533 = arith.addi %274, %c6_i32_447 : i32
      %c3_i32_448 = arith.constant 3 : i32
      %c0_i32_449 = arith.constant 0 : i32
      %534 = tpu.memref_slice %arg9[%514, %c0_i32_449] : memref<100x32xf32, #tpu.memory_space<any>> -> memref<1x32xf32, #tpu.memory_space<any>>
      %c0_i32_450 = arith.constant 0 : i32
      %535 = tpu.memref_slice %arg18[%533, %c0_i32_450] : memref<16x32xf32, #tpu.memory_space<vmem>> -> memref<1x32xf32, #tpu.memory_space<vmem>>
      %536 = tpu.memref_slice %arg21[%c3_i32_448, %272] : memref<6x2x!tpu.dma_semaphore, #tpu.memory_space<semaphore_mem>> -> memref<1x1x!tpu.dma_semaphore, #tpu.memory_space<semaphore_mem>>
      %537 = tpu.memref_squeeze %536 : memref<1x1x!tpu.dma_semaphore, #tpu.memory_space<semaphore_mem>> -> memref<!tpu.dma_semaphore, #tpu.memory_space<semaphore_mem>>
      tpu.enqueue_dma source(%534 : memref<1x32xf32, #tpu.memory_space<any>>) target(%535 : memref<1x32xf32, #tpu.memory_space<vmem>>) target_semaphore(%537 : memref<!tpu.dma_semaphore, #tpu.memory_space<semaphore_mem>>)
      %c6_i32_451 = arith.constant 6 : i32
      %538 = arith.addi %274, %c6_i32_451 : i32
      %c4_i32_452 = arith.constant 4 : i32
      %c0_i32_453 = arith.constant 0 : i32
      %539 = tpu.memref_slice %arg8[%517, %c0_i32_453] : memref<100x32xf32, #tpu.memory_space<any>> -> memref<1x32xf32, #tpu.memory_space<any>>
      %c0_i32_454 = arith.constant 0 : i32
      %540 = tpu.memref_slice %arg19[%538, %c0_i32_454] : memref<16x32xf32, #tpu.memory_space<vmem>> -> memref<1x32xf32, #tpu.memory_space<vmem>>
      %541 = tpu.memref_slice %arg21[%c4_i32_452, %272] : memref<6x2x!tpu.dma_semaphore, #tpu.memory_space<semaphore_mem>> -> memref<1x1x!tpu.dma_semaphore, #tpu.memory_space<semaphore_mem>>
      %542 = tpu.memref_squeeze %541 : memref<1x1x!tpu.dma_semaphore, #tpu.memory_space<semaphore_mem>> -> memref<!tpu.dma_semaphore, #tpu.memory_space<semaphore_mem>>
      tpu.enqueue_dma source(%539 : memref<1x32xf32, #tpu.memory_space<any>>) target(%540 : memref<1x32xf32, #tpu.memory_space<vmem>>) target_semaphore(%542 : memref<!tpu.dma_semaphore, #tpu.memory_space<semaphore_mem>>)
      %c6_i32_455 = arith.constant 6 : i32
      %543 = arith.addi %274, %c6_i32_455 : i32
      %c5_i32_456 = arith.constant 5 : i32
      %c0_i32_457 = arith.constant 0 : i32
      %544 = tpu.memref_slice %arg9[%517, %c0_i32_457] : memref<100x32xf32, #tpu.memory_space<any>> -> memref<1x32xf32, #tpu.memory_space<any>>
      %c0_i32_458 = arith.constant 0 : i32
      %545 = tpu.memref_slice %arg20[%543, %c0_i32_458] : memref<16x32xf32, #tpu.memory_space<vmem>> -> memref<1x32xf32, #tpu.memory_space<vmem>>
      %546 = tpu.memref_slice %arg21[%c5_i32_456, %272] : memref<6x2x!tpu.dma_semaphore, #tpu.memory_space<semaphore_mem>> -> memref<1x1x!tpu.dma_semaphore, #tpu.memory_space<semaphore_mem>>
      %547 = tpu.memref_squeeze %546 : memref<1x1x!tpu.dma_semaphore, #tpu.memory_space<semaphore_mem>> -> memref<!tpu.dma_semaphore, #tpu.memory_space<semaphore_mem>>
      tpu.enqueue_dma source(%544 : memref<1x32xf32, #tpu.memory_space<any>>) target(%545 : memref<1x32xf32, #tpu.memory_space<vmem>>) target_semaphore(%547 : memref<!tpu.dma_semaphore, #tpu.memory_space<semaphore_mem>>)
      %c7_i32 = arith.constant 7 : i32
      %548 = arith.addi %273, %c7_i32 : i32
      %549 = arith.index_cast %548 : i32 to index
      %550 = memref.load %arg1[%549] : memref<32xi32, #tpu.memory_space<smem>>
      %c7_i32_459 = arith.constant 7 : i32
      %551 = arith.addi %273, %c7_i32_459 : i32
      %552 = arith.index_cast %551 : i32 to index
      %553 = memref.load %arg2[%552] : memref<32xi32, #tpu.memory_space<smem>>
      %c7_i32_460 = arith.constant 7 : i32
      %554 = arith.addi %273, %c7_i32_460 : i32
      %555 = arith.index_cast %554 : i32 to index
      %556 = memref.load %arg3[%555] : memref<32xi32, #tpu.memory_space<smem>>
      %c7_i32_461 = arith.constant 7 : i32
      %557 = arith.addi %274, %c7_i32_461 : i32
      %c0_i32_462 = arith.constant 0 : i32
      %c0_i32_463 = arith.constant 0 : i32
      %558 = tpu.memref_slice %arg6[%550, %c0_i32_463] : memref<50x32xf32, #tpu.memory_space<any>> -> memref<1x32xf32, #tpu.memory_space<any>>
      %c0_i32_464 = arith.constant 0 : i32
      %559 = tpu.memref_slice %arg15[%557, %c0_i32_464] : memref<16x32xf32, #tpu.memory_space<vmem>> -> memref<1x32xf32, #tpu.memory_space<vmem>>
      %560 = tpu.memref_slice %arg21[%c0_i32_462, %272] : memref<6x2x!tpu.dma_semaphore, #tpu.memory_space<semaphore_mem>> -> memref<1x1x!tpu.dma_semaphore, #tpu.memory_space<semaphore_mem>>
      %561 = tpu.memref_squeeze %560 : memref<1x1x!tpu.dma_semaphore, #tpu.memory_space<semaphore_mem>> -> memref<!tpu.dma_semaphore, #tpu.memory_space<semaphore_mem>>
      tpu.enqueue_dma source(%558 : memref<1x32xf32, #tpu.memory_space<any>>) target(%559 : memref<1x32xf32, #tpu.memory_space<vmem>>) target_semaphore(%561 : memref<!tpu.dma_semaphore, #tpu.memory_space<semaphore_mem>>)
      %c7_i32_465 = arith.constant 7 : i32
      %562 = arith.addi %274, %c7_i32_465 : i32
      %c1_i32_466 = arith.constant 1 : i32
      %c0_i32_467 = arith.constant 0 : i32
      %563 = tpu.memref_slice %arg7[%550, %c0_i32_467] : memref<50x32xf32, #tpu.memory_space<any>> -> memref<1x32xf32, #tpu.memory_space<any>>
      %c0_i32_468 = arith.constant 0 : i32
      %564 = tpu.memref_slice %arg16[%562, %c0_i32_468] : memref<16x32xf32, #tpu.memory_space<vmem>> -> memref<1x32xf32, #tpu.memory_space<vmem>>
      %565 = tpu.memref_slice %arg21[%c1_i32_466, %272] : memref<6x2x!tpu.dma_semaphore, #tpu.memory_space<semaphore_mem>> -> memref<1x1x!tpu.dma_semaphore, #tpu.memory_space<semaphore_mem>>
      %566 = tpu.memref_squeeze %565 : memref<1x1x!tpu.dma_semaphore, #tpu.memory_space<semaphore_mem>> -> memref<!tpu.dma_semaphore, #tpu.memory_space<semaphore_mem>>
      tpu.enqueue_dma source(%563 : memref<1x32xf32, #tpu.memory_space<any>>) target(%564 : memref<1x32xf32, #tpu.memory_space<vmem>>) target_semaphore(%566 : memref<!tpu.dma_semaphore, #tpu.memory_space<semaphore_mem>>)
      %c7_i32_469 = arith.constant 7 : i32
      %567 = arith.addi %274, %c7_i32_469 : i32
      %c2_i32_470 = arith.constant 2 : i32
      %c0_i32_471 = arith.constant 0 : i32
      %568 = tpu.memref_slice %arg8[%553, %c0_i32_471] : memref<100x32xf32, #tpu.memory_space<any>> -> memref<1x32xf32, #tpu.memory_space<any>>
      %c0_i32_472 = arith.constant 0 : i32
      %569 = tpu.memref_slice %arg17[%567, %c0_i32_472] : memref<16x32xf32, #tpu.memory_space<vmem>> -> memref<1x32xf32, #tpu.memory_space<vmem>>
      %570 = tpu.memref_slice %arg21[%c2_i32_470, %272] : memref<6x2x!tpu.dma_semaphore, #tpu.memory_space<semaphore_mem>> -> memref<1x1x!tpu.dma_semaphore, #tpu.memory_space<semaphore_mem>>
      %571 = tpu.memref_squeeze %570 : memref<1x1x!tpu.dma_semaphore, #tpu.memory_space<semaphore_mem>> -> memref<!tpu.dma_semaphore, #tpu.memory_space<semaphore_mem>>
      tpu.enqueue_dma source(%568 : memref<1x32xf32, #tpu.memory_space<any>>) target(%569 : memref<1x32xf32, #tpu.memory_space<vmem>>) target_semaphore(%571 : memref<!tpu.dma_semaphore, #tpu.memory_space<semaphore_mem>>)
      %c7_i32_473 = arith.constant 7 : i32
      %572 = arith.addi %274, %c7_i32_473 : i32
      %c3_i32_474 = arith.constant 3 : i32
      %c0_i32_475 = arith.constant 0 : i32
      %573 = tpu.memref_slice %arg9[%553, %c0_i32_475] : memref<100x32xf32, #tpu.memory_space<any>> -> memref<1x32xf32, #tpu.memory_space<any>>
      %c0_i32_476 = arith.constant 0 : i32
      %574 = tpu.memref_slice %arg18[%572, %c0_i32_476] : memref<16x32xf32, #tpu.memory_space<vmem>> -> memref<1x32xf32, #tpu.memory_space<vmem>>
      %575 = tpu.memref_slice %arg21[%c3_i32_474, %272] : memref<6x2x!tpu.dma_semaphore, #tpu.memory_space<semaphore_mem>> -> memref<1x1x!tpu.dma_semaphore, #tpu.memory_space<semaphore_mem>>
      %576 = tpu.memref_squeeze %575 : memref<1x1x!tpu.dma_semaphore, #tpu.memory_space<semaphore_mem>> -> memref<!tpu.dma_semaphore, #tpu.memory_space<semaphore_mem>>
      tpu.enqueue_dma source(%573 : memref<1x32xf32, #tpu.memory_space<any>>) target(%574 : memref<1x32xf32, #tpu.memory_space<vmem>>) target_semaphore(%576 : memref<!tpu.dma_semaphore, #tpu.memory_space<semaphore_mem>>)
      %c7_i32_477 = arith.constant 7 : i32
      %577 = arith.addi %274, %c7_i32_477 : i32
      %c4_i32_478 = arith.constant 4 : i32
      %c0_i32_479 = arith.constant 0 : i32
      %578 = tpu.memref_slice %arg8[%556, %c0_i32_479] : memref<100x32xf32, #tpu.memory_space<any>> -> memref<1x32xf32, #tpu.memory_space<any>>
      %c0_i32_480 = arith.constant 0 : i32
      %579 = tpu.memref_slice %arg19[%577, %c0_i32_480] : memref<16x32xf32, #tpu.memory_space<vmem>> -> memref<1x32xf32, #tpu.memory_space<vmem>>
      %580 = tpu.memref_slice %arg21[%c4_i32_478, %272] : memref<6x2x!tpu.dma_semaphore, #tpu.memory_space<semaphore_mem>> -> memref<1x1x!tpu.dma_semaphore, #tpu.memory_space<semaphore_mem>>
      %581 = tpu.memref_squeeze %580 : memref<1x1x!tpu.dma_semaphore, #tpu.memory_space<semaphore_mem>> -> memref<!tpu.dma_semaphore, #tpu.memory_space<semaphore_mem>>
      tpu.enqueue_dma source(%578 : memref<1x32xf32, #tpu.memory_space<any>>) target(%579 : memref<1x32xf32, #tpu.memory_space<vmem>>) target_semaphore(%581 : memref<!tpu.dma_semaphore, #tpu.memory_space<semaphore_mem>>)
      %c7_i32_481 = arith.constant 7 : i32
      %582 = arith.addi %274, %c7_i32_481 : i32
      %c5_i32_482 = arith.constant 5 : i32
      %c0_i32_483 = arith.constant 0 : i32
      %583 = tpu.memref_slice %arg9[%556, %c0_i32_483] : memref<100x32xf32, #tpu.memory_space<any>> -> memref<1x32xf32, #tpu.memory_space<any>>
      %c0_i32_484 = arith.constant 0 : i32
      %584 = tpu.memref_slice %arg20[%582, %c0_i32_484] : memref<16x32xf32, #tpu.memory_space<vmem>> -> memref<1x32xf32, #tpu.memory_space<vmem>>
      %585 = tpu.memref_slice %arg21[%c5_i32_482, %272] : memref<6x2x!tpu.dma_semaphore, #tpu.memory_space<semaphore_mem>> -> memref<1x1x!tpu.dma_semaphore, #tpu.memory_space<semaphore_mem>>
      %586 = tpu.memref_squeeze %585 : memref<1x1x!tpu.dma_semaphore, #tpu.memory_space<semaphore_mem>> -> memref<!tpu.dma_semaphore, #tpu.memory_space<semaphore_mem>>
      tpu.enqueue_dma source(%583 : memref<1x32xf32, #tpu.memory_space<any>>) target(%584 : memref<1x32xf32, #tpu.memory_space<vmem>>) target_semaphore(%586 : memref<!tpu.dma_semaphore, #tpu.memory_space<semaphore_mem>>)
    } else {
    }
    %c0_i32_3 = arith.constant 0 : i32
    %c0_i32_4 = arith.constant 0 : i32
    %c0_i32_5 = arith.constant 0 : i32
    %8 = tpu.memref_slice %arg6[%c0_i32_4, %c0_i32_5] : memref<50x32xf32, #tpu.memory_space<any>> -> memref<1x32xf32, #tpu.memory_space<any>>
    %c0_i32_6 = arith.constant 0 : i32
    %c0_i32_7 = arith.constant 0 : i32
    %9 = tpu.memref_slice %arg15[%c0_i32_6, %c0_i32_7] : memref<16x32xf32, #tpu.memory_space<vmem>> -> memref<1x32xf32, #tpu.memory_space<vmem>>
    %10 = tpu.memref_slice %arg21[%c0_i32_3, %0] : memref<6x2x!tpu.dma_semaphore, #tpu.memory_space<semaphore_mem>> -> memref<1x1x!tpu.dma_semaphore, #tpu.memory_space<semaphore_mem>>
    %11 = tpu.memref_squeeze %10 : memref<1x1x!tpu.dma_semaphore, #tpu.memory_space<semaphore_mem>> -> memref<!tpu.dma_semaphore, #tpu.memory_space<semaphore_mem>>
    tpu.wait_dma2 semaphore(%11 : memref<!tpu.dma_semaphore, #tpu.memory_space<semaphore_mem>>) src(%8 : memref<1x32xf32, #tpu.memory_space<any>>) dst(%9 : memref<1x32xf32, #tpu.memory_space<vmem>>)
    %c0_i32_8 = arith.constant 0 : i32
    %c0_i32_9 = arith.constant 0 : i32
    %c0_i32_10 = arith.constant 0 : i32
    %12 = tpu.memref_slice %arg6[%c0_i32_9, %c0_i32_10] : memref<50x32xf32, #tpu.memory_space<any>> -> memref<1x32xf32, #tpu.memory_space<any>>
    %c0_i32_11 = arith.constant 0 : i32
    %c0_i32_12 = arith.constant 0 : i32
    %13 = tpu.memref_slice %arg15[%c0_i32_11, %c0_i32_12] : memref<16x32xf32, #tpu.memory_space<vmem>> -> memref<1x32xf32, #tpu.memory_space<vmem>>
    %14 = tpu.memref_slice %arg21[%c0_i32_8, %0] : memref<6x2x!tpu.dma_semaphore, #tpu.memory_space<semaphore_mem>> -> memref<1x1x!tpu.dma_semaphore, #tpu.memory_space<semaphore_mem>>
    %15 = tpu.memref_squeeze %14 : memref<1x1x!tpu.dma_semaphore, #tpu.memory_space<semaphore_mem>> -> memref<!tpu.dma_semaphore, #tpu.memory_space<semaphore_mem>>
    tpu.wait_dma2 semaphore(%15 : memref<!tpu.dma_semaphore, #tpu.memory_space<semaphore_mem>>) src(%12 : memref<1x32xf32, #tpu.memory_space<any>>) dst(%13 : memref<1x32xf32, #tpu.memory_space<vmem>>)
    %c0_i32_13 = arith.constant 0 : i32
    %c0_i32_14 = arith.constant 0 : i32
    %c0_i32_15 = arith.constant 0 : i32
    %16 = tpu.memref_slice %arg6[%c0_i32_14, %c0_i32_15] : memref<50x32xf32, #tpu.memory_space<any>> -> memref<1x32xf32, #tpu.memory_space<any>>
    %c0_i32_16 = arith.constant 0 : i32
    %c0_i32_17 = arith.constant 0 : i32
    %17 = tpu.memref_slice %arg15[%c0_i32_16, %c0_i32_17] : memref<16x32xf32, #tpu.memory_space<vmem>> -> memref<1x32xf32, #tpu.memory_space<vmem>>
    %18 = tpu.memref_slice %arg21[%c0_i32_13, %0] : memref<6x2x!tpu.dma_semaphore, #tpu.memory_space<semaphore_mem>> -> memref<1x1x!tpu.dma_semaphore, #tpu.memory_space<semaphore_mem>>
    %19 = tpu.memref_squeeze %18 : memref<1x1x!tpu.dma_semaphore, #tpu.memory_space<semaphore_mem>> -> memref<!tpu.dma_semaphore, #tpu.memory_space<semaphore_mem>>
    tpu.wait_dma2 semaphore(%19 : memref<!tpu.dma_semaphore, #tpu.memory_space<semaphore_mem>>) src(%16 : memref<1x32xf32, #tpu.memory_space<any>>) dst(%17 : memref<1x32xf32, #tpu.memory_space<vmem>>)
    %c0_i32_18 = arith.constant 0 : i32
    %c0_i32_19 = arith.constant 0 : i32
    %c0_i32_20 = arith.constant 0 : i32
    %20 = tpu.memref_slice %arg6[%c0_i32_19, %c0_i32_20] : memref<50x32xf32, #tpu.memory_space<any>> -> memref<1x32xf32, #tpu.memory_space<any>>
    %c0_i32_21 = arith.constant 0 : i32
    %c0_i32_22 = arith.constant 0 : i32
    %21 = tpu.memref_slice %arg15[%c0_i32_21, %c0_i32_22] : memref<16x32xf32, #tpu.memory_space<vmem>> -> memref<1x32xf32, #tpu.memory_space<vmem>>
    %22 = tpu.memref_slice %arg21[%c0_i32_18, %0] : memref<6x2x!tpu.dma_semaphore, #tpu.memory_space<semaphore_mem>> -> memref<1x1x!tpu.dma_semaphore, #tpu.memory_space<semaphore_mem>>
    %23 = tpu.memref_squeeze %22 : memref<1x1x!tpu.dma_semaphore, #tpu.memory_space<semaphore_mem>> -> memref<!tpu.dma_semaphore, #tpu.memory_space<semaphore_mem>>
    tpu.wait_dma2 semaphore(%23 : memref<!tpu.dma_semaphore, #tpu.memory_space<semaphore_mem>>) src(%20 : memref<1x32xf32, #tpu.memory_space<any>>) dst(%21 : memref<1x32xf32, #tpu.memory_space<vmem>>)
    %c0_i32_23 = arith.constant 0 : i32
    %c0_i32_24 = arith.constant 0 : i32
    %c0_i32_25 = arith.constant 0 : i32
    %24 = tpu.memref_slice %arg6[%c0_i32_24, %c0_i32_25] : memref<50x32xf32, #tpu.memory_space<any>> -> memref<1x32xf32, #tpu.memory_space<any>>
    %c0_i32_26 = arith.constant 0 : i32
    %c0_i32_27 = arith.constant 0 : i32
    %25 = tpu.memref_slice %arg15[%c0_i32_26, %c0_i32_27] : memref<16x32xf32, #tpu.memory_space<vmem>> -> memref<1x32xf32, #tpu.memory_space<vmem>>
    %26 = tpu.memref_slice %arg21[%c0_i32_23, %0] : memref<6x2x!tpu.dma_semaphore, #tpu.memory_space<semaphore_mem>> -> memref<1x1x!tpu.dma_semaphore, #tpu.memory_space<semaphore_mem>>
    %27 = tpu.memref_squeeze %26 : memref<1x1x!tpu.dma_semaphore, #tpu.memory_space<semaphore_mem>> -> memref<!tpu.dma_semaphore, #tpu.memory_space<semaphore_mem>>
    tpu.wait_dma2 semaphore(%27 : memref<!tpu.dma_semaphore, #tpu.memory_space<semaphore_mem>>) src(%24 : memref<1x32xf32, #tpu.memory_space<any>>) dst(%25 : memref<1x32xf32, #tpu.memory_space<vmem>>)
    %c0_i32_28 = arith.constant 0 : i32
    %c0_i32_29 = arith.constant 0 : i32
    %c0_i32_30 = arith.constant 0 : i32
    %28 = tpu.memref_slice %arg6[%c0_i32_29, %c0_i32_30] : memref<50x32xf32, #tpu.memory_space<any>> -> memref<1x32xf32, #tpu.memory_space<any>>
    %c0_i32_31 = arith.constant 0 : i32
    %c0_i32_32 = arith.constant 0 : i32
    %29 = tpu.memref_slice %arg15[%c0_i32_31, %c0_i32_32] : memref<16x32xf32, #tpu.memory_space<vmem>> -> memref<1x32xf32, #tpu.memory_space<vmem>>
    %30 = tpu.memref_slice %arg21[%c0_i32_28, %0] : memref<6x2x!tpu.dma_semaphore, #tpu.memory_space<semaphore_mem>> -> memref<1x1x!tpu.dma_semaphore, #tpu.memory_space<semaphore_mem>>
    %31 = tpu.memref_squeeze %30 : memref<1x1x!tpu.dma_semaphore, #tpu.memory_space<semaphore_mem>> -> memref<!tpu.dma_semaphore, #tpu.memory_space<semaphore_mem>>
    tpu.wait_dma2 semaphore(%31 : memref<!tpu.dma_semaphore, #tpu.memory_space<semaphore_mem>>) src(%28 : memref<1x32xf32, #tpu.memory_space<any>>) dst(%29 : memref<1x32xf32, #tpu.memory_space<vmem>>)
    %c0_i32_33 = arith.constant 0 : i32
    %c0_i32_34 = arith.constant 0 : i32
    %c0_i32_35 = arith.constant 0 : i32
    %32 = tpu.memref_slice %arg6[%c0_i32_34, %c0_i32_35] : memref<50x32xf32, #tpu.memory_space<any>> -> memref<1x32xf32, #tpu.memory_space<any>>
    %c0_i32_36 = arith.constant 0 : i32
    %c0_i32_37 = arith.constant 0 : i32
    %33 = tpu.memref_slice %arg15[%c0_i32_36, %c0_i32_37] : memref<16x32xf32, #tpu.memory_space<vmem>> -> memref<1x32xf32, #tpu.memory_space<vmem>>
    %34 = tpu.memref_slice %arg21[%c0_i32_33, %0] : memref<6x2x!tpu.dma_semaphore, #tpu.memory_space<semaphore_mem>> -> memref<1x1x!tpu.dma_semaphore, #tpu.memory_space<semaphore_mem>>
    %35 = tpu.memref_squeeze %34 : memref<1x1x!tpu.dma_semaphore, #tpu.memory_space<semaphore_mem>> -> memref<!tpu.dma_semaphore, #tpu.memory_space<semaphore_mem>>
    tpu.wait_dma2 semaphore(%35 : memref<!tpu.dma_semaphore, #tpu.memory_space<semaphore_mem>>) src(%32 : memref<1x32xf32, #tpu.memory_space<any>>) dst(%33 : memref<1x32xf32, #tpu.memory_space<vmem>>)
    %c0_i32_38 = arith.constant 0 : i32
    %c0_i32_39 = arith.constant 0 : i32
    %c0_i32_40 = arith.constant 0 : i32
    %36 = tpu.memref_slice %arg6[%c0_i32_39, %c0_i32_40] : memref<50x32xf32, #tpu.memory_space<any>> -> memref<1x32xf32, #tpu.memory_space<any>>
    %c0_i32_41 = arith.constant 0 : i32
    %c0_i32_42 = arith.constant 0 : i32
    %37 = tpu.memref_slice %arg15[%c0_i32_41, %c0_i32_42] : memref<16x32xf32, #tpu.memory_space<vmem>> -> memref<1x32xf32, #tpu.memory_space<vmem>>
    %38 = tpu.memref_slice %arg21[%c0_i32_38, %0] : memref<6x2x!tpu.dma_semaphore, #tpu.memory_space<semaphore_mem>> -> memref<1x1x!tpu.dma_semaphore, #tpu.memory_space<semaphore_mem>>
    %39 = tpu.memref_squeeze %38 : memref<1x1x!tpu.dma_semaphore, #tpu.memory_space<semaphore_mem>> -> memref<!tpu.dma_semaphore, #tpu.memory_space<semaphore_mem>>
    tpu.wait_dma2 semaphore(%39 : memref<!tpu.dma_semaphore, #tpu.memory_space<semaphore_mem>>) src(%36 : memref<1x32xf32, #tpu.memory_space<any>>) dst(%37 : memref<1x32xf32, #tpu.memory_space<vmem>>)
    %c1_i32_43 = arith.constant 1 : i32
    %c0_i32_44 = arith.constant 0 : i32
    %c0_i32_45 = arith.constant 0 : i32
    %40 = tpu.memref_slice %arg7[%c0_i32_44, %c0_i32_45] : memref<50x32xf32, #tpu.memory_space<any>> -> memref<1x32xf32, #tpu.memory_space<any>>
    %c0_i32_46 = arith.constant 0 : i32
    %c0_i32_47 = arith.constant 0 : i32
    %41 = tpu.memref_slice %arg16[%c0_i32_46, %c0_i32_47] : memref<16x32xf32, #tpu.memory_space<vmem>> -> memref<1x32xf32, #tpu.memory_space<vmem>>
    %42 = tpu.memref_slice %arg21[%c1_i32_43, %0] : memref<6x2x!tpu.dma_semaphore, #tpu.memory_space<semaphore_mem>> -> memref<1x1x!tpu.dma_semaphore, #tpu.memory_space<semaphore_mem>>
    %43 = tpu.memref_squeeze %42 : memref<1x1x!tpu.dma_semaphore, #tpu.memory_space<semaphore_mem>> -> memref<!tpu.dma_semaphore, #tpu.memory_space<semaphore_mem>>
    tpu.wait_dma2 semaphore(%43 : memref<!tpu.dma_semaphore, #tpu.memory_space<semaphore_mem>>) src(%40 : memref<1x32xf32, #tpu.memory_space<any>>) dst(%41 : memref<1x32xf32, #tpu.memory_space<vmem>>)
    %c1_i32_48 = arith.constant 1 : i32
    %c0_i32_49 = arith.constant 0 : i32
    %c0_i32_50 = arith.constant 0 : i32
    %44 = tpu.memref_slice %arg7[%c0_i32_49, %c0_i32_50] : memref<50x32xf32, #tpu.memory_space<any>> -> memref<1x32xf32, #tpu.memory_space<any>>
    %c0_i32_51 = arith.constant 0 : i32
    %c0_i32_52 = arith.constant 0 : i32
    %45 = tpu.memref_slice %arg16[%c0_i32_51, %c0_i32_52] : memref<16x32xf32, #tpu.memory_space<vmem>> -> memref<1x32xf32, #tpu.memory_space<vmem>>
    %46 = tpu.memref_slice %arg21[%c1_i32_48, %0] : memref<6x2x!tpu.dma_semaphore, #tpu.memory_space<semaphore_mem>> -> memref<1x1x!tpu.dma_semaphore, #tpu.memory_space<semaphore_mem>>
    %47 = tpu.memref_squeeze %46 : memref<1x1x!tpu.dma_semaphore, #tpu.memory_space<semaphore_mem>> -> memref<!tpu.dma_semaphore, #tpu.memory_space<semaphore_mem>>
    tpu.wait_dma2 semaphore(%47 : memref<!tpu.dma_semaphore, #tpu.memory_space<semaphore_mem>>) src(%44 : memref<1x32xf32, #tpu.memory_space<any>>) dst(%45 : memref<1x32xf32, #tpu.memory_space<vmem>>)
    %c1_i32_53 = arith.constant 1 : i32
    %c0_i32_54 = arith.constant 0 : i32
    %c0_i32_55 = arith.constant 0 : i32
    %48 = tpu.memref_slice %arg7[%c0_i32_54, %c0_i32_55] : memref<50x32xf32, #tpu.memory_space<any>> -> memref<1x32xf32, #tpu.memory_space<any>>
    %c0_i32_56 = arith.constant 0 : i32
    %c0_i32_57 = arith.constant 0 : i32
    %49 = tpu.memref_slice %arg16[%c0_i32_56, %c0_i32_57] : memref<16x32xf32, #tpu.memory_space<vmem>> -> memref<1x32xf32, #tpu.memory_space<vmem>>
    %50 = tpu.memref_slice %arg21[%c1_i32_53, %0] : memref<6x2x!tpu.dma_semaphore, #tpu.memory_space<semaphore_mem>> -> memref<1x1x!tpu.dma_semaphore, #tpu.memory_space<semaphore_mem>>
    %51 = tpu.memref_squeeze %50 : memref<1x1x!tpu.dma_semaphore, #tpu.memory_space<semaphore_mem>> -> memref<!tpu.dma_semaphore, #tpu.memory_space<semaphore_mem>>
    tpu.wait_dma2 semaphore(%51 : memref<!tpu.dma_semaphore, #tpu.memory_space<semaphore_mem>>) src(%48 : memref<1x32xf32, #tpu.memory_space<any>>) dst(%49 : memref<1x32xf32, #tpu.memory_space<vmem>>)
    %c1_i32_58 = arith.constant 1 : i32
    %c0_i32_59 = arith.constant 0 : i32
    %c0_i32_60 = arith.constant 0 : i32
    %52 = tpu.memref_slice %arg7[%c0_i32_59, %c0_i32_60] : memref<50x32xf32, #tpu.memory_space<any>> -> memref<1x32xf32, #tpu.memory_space<any>>
    %c0_i32_61 = arith.constant 0 : i32
    %c0_i32_62 = arith.constant 0 : i32
    %53 = tpu.memref_slice %arg16[%c0_i32_61, %c0_i32_62] : memref<16x32xf32, #tpu.memory_space<vmem>> -> memref<1x32xf32, #tpu.memory_space<vmem>>
    %54 = tpu.memref_slice %arg21[%c1_i32_58, %0] : memref<6x2x!tpu.dma_semaphore, #tpu.memory_space<semaphore_mem>> -> memref<1x1x!tpu.dma_semaphore, #tpu.memory_space<semaphore_mem>>
    %55 = tpu.memref_squeeze %54 : memref<1x1x!tpu.dma_semaphore, #tpu.memory_space<semaphore_mem>> -> memref<!tpu.dma_semaphore, #tpu.memory_space<semaphore_mem>>
    tpu.wait_dma2 semaphore(%55 : memref<!tpu.dma_semaphore, #tpu.memory_space<semaphore_mem>>) src(%52 : memref<1x32xf32, #tpu.memory_space<any>>) dst(%53 : memref<1x32xf32, #tpu.memory_space<vmem>>)
    %c1_i32_63 = arith.constant 1 : i32
    %c0_i32_64 = arith.constant 0 : i32
    %c0_i32_65 = arith.constant 0 : i32
    %56 = tpu.memref_slice %arg7[%c0_i32_64, %c0_i32_65] : memref<50x32xf32, #tpu.memory_space<any>> -> memref<1x32xf32, #tpu.memory_space<any>>
    %c0_i32_66 = arith.constant 0 : i32
    %c0_i32_67 = arith.constant 0 : i32
    %57 = tpu.memref_slice %arg16[%c0_i32_66, %c0_i32_67] : memref<16x32xf32, #tpu.memory_space<vmem>> -> memref<1x32xf32, #tpu.memory_space<vmem>>
    %58 = tpu.memref_slice %arg21[%c1_i32_63, %0] : memref<6x2x!tpu.dma_semaphore, #tpu.memory_space<semaphore_mem>> -> memref<1x1x!tpu.dma_semaphore, #tpu.memory_space<semaphore_mem>>
    %59 = tpu.memref_squeeze %58 : memref<1x1x!tpu.dma_semaphore, #tpu.memory_space<semaphore_mem>> -> memref<!tpu.dma_semaphore, #tpu.memory_space<semaphore_mem>>
    tpu.wait_dma2 semaphore(%59 : memref<!tpu.dma_semaphore, #tpu.memory_space<semaphore_mem>>) src(%56 : memref<1x32xf32, #tpu.memory_space<any>>) dst(%57 : memref<1x32xf32, #tpu.memory_space<vmem>>)
    %c1_i32_68 = arith.constant 1 : i32
    %c0_i32_69 = arith.constant 0 : i32
    %c0_i32_70 = arith.constant 0 : i32
    %60 = tpu.memref_slice %arg7[%c0_i32_69, %c0_i32_70] : memref<50x32xf32, #tpu.memory_space<any>> -> memref<1x32xf32, #tpu.memory_space<any>>
    %c0_i32_71 = arith.constant 0 : i32
    %c0_i32_72 = arith.constant 0 : i32
    %61 = tpu.memref_slice %arg16[%c0_i32_71, %c0_i32_72] : memref<16x32xf32, #tpu.memory_space<vmem>> -> memref<1x32xf32, #tpu.memory_space<vmem>>
    %62 = tpu.memref_slice %arg21[%c1_i32_68, %0] : memref<6x2x!tpu.dma_semaphore, #tpu.memory_space<semaphore_mem>> -> memref<1x1x!tpu.dma_semaphore, #tpu.memory_space<semaphore_mem>>
    %63 = tpu.memref_squeeze %62 : memref<1x1x!tpu.dma_semaphore, #tpu.memory_space<semaphore_mem>> -> memref<!tpu.dma_semaphore, #tpu.memory_space<semaphore_mem>>
    tpu.wait_dma2 semaphore(%63 : memref<!tpu.dma_semaphore, #tpu.memory_space<semaphore_mem>>) src(%60 : memref<1x32xf32, #tpu.memory_space<any>>) dst(%61 : memref<1x32xf32, #tpu.memory_space<vmem>>)
    %c1_i32_73 = arith.constant 1 : i32
    %c0_i32_74 = arith.constant 0 : i32
    %c0_i32_75 = arith.constant 0 : i32
    %64 = tpu.memref_slice %arg7[%c0_i32_74, %c0_i32_75] : memref<50x32xf32, #tpu.memory_space<any>> -> memref<1x32xf32, #tpu.memory_space<any>>
    %c0_i32_76 = arith.constant 0 : i32
    %c0_i32_77 = arith.constant 0 : i32
    %65 = tpu.memref_slice %arg16[%c0_i32_76, %c0_i32_77] : memref<16x32xf32, #tpu.memory_space<vmem>> -> memref<1x32xf32, #tpu.memory_space<vmem>>
    %66 = tpu.memref_slice %arg21[%c1_i32_73, %0] : memref<6x2x!tpu.dma_semaphore, #tpu.memory_space<semaphore_mem>> -> memref<1x1x!tpu.dma_semaphore, #tpu.memory_space<semaphore_mem>>
    %67 = tpu.memref_squeeze %66 : memref<1x1x!tpu.dma_semaphore, #tpu.memory_space<semaphore_mem>> -> memref<!tpu.dma_semaphore, #tpu.memory_space<semaphore_mem>>
    tpu.wait_dma2 semaphore(%67 : memref<!tpu.dma_semaphore, #tpu.memory_space<semaphore_mem>>) src(%64 : memref<1x32xf32, #tpu.memory_space<any>>) dst(%65 : memref<1x32xf32, #tpu.memory_space<vmem>>)
    %c1_i32_78 = arith.constant 1 : i32
    %c0_i32_79 = arith.constant 0 : i32
    %c0_i32_80 = arith.constant 0 : i32
    %68 = tpu.memref_slice %arg7[%c0_i32_79, %c0_i32_80] : memref<50x32xf32, #tpu.memory_space<any>> -> memref<1x32xf32, #tpu.memory_space<any>>
    %c0_i32_81 = arith.constant 0 : i32
    %c0_i32_82 = arith.constant 0 : i32
    %69 = tpu.memref_slice %arg16[%c0_i32_81, %c0_i32_82] : memref<16x32xf32, #tpu.memory_space<vmem>> -> memref<1x32xf32, #tpu.memory_space<vmem>>
    %70 = tpu.memref_slice %arg21[%c1_i32_78, %0] : memref<6x2x!tpu.dma_semaphore, #tpu.memory_space<semaphore_mem>> -> memref<1x1x!tpu.dma_semaphore, #tpu.memory_space<semaphore_mem>>
    %71 = tpu.memref_squeeze %70 : memref<1x1x!tpu.dma_semaphore, #tpu.memory_space<semaphore_mem>> -> memref<!tpu.dma_semaphore, #tpu.memory_space<semaphore_mem>>
    tpu.wait_dma2 semaphore(%71 : memref<!tpu.dma_semaphore, #tpu.memory_space<semaphore_mem>>) src(%68 : memref<1x32xf32, #tpu.memory_space<any>>) dst(%69 : memref<1x32xf32, #tpu.memory_space<vmem>>)
    %c2_i32 = arith.constant 2 : i32
    %c0_i32_83 = arith.constant 0 : i32
    %c0_i32_84 = arith.constant 0 : i32
    %72 = tpu.memref_slice %arg8[%c0_i32_83, %c0_i32_84] : memref<100x32xf32, #tpu.memory_space<any>> -> memref<1x32xf32, #tpu.memory_space<any>>
    %c0_i32_85 = arith.constant 0 : i32
    %c0_i32_86 = arith.constant 0 : i32
    %73 = tpu.memref_slice %arg17[%c0_i32_85, %c0_i32_86] : memref<16x32xf32, #tpu.memory_space<vmem>> -> memref<1x32xf32, #tpu.memory_space<vmem>>
    %74 = tpu.memref_slice %arg21[%c2_i32, %0] : memref<6x2x!tpu.dma_semaphore, #tpu.memory_space<semaphore_mem>> -> memref<1x1x!tpu.dma_semaphore, #tpu.memory_space<semaphore_mem>>
    %75 = tpu.memref_squeeze %74 : memref<1x1x!tpu.dma_semaphore, #tpu.memory_space<semaphore_mem>> -> memref<!tpu.dma_semaphore, #tpu.memory_space<semaphore_mem>>
    tpu.wait_dma2 semaphore(%75 : memref<!tpu.dma_semaphore, #tpu.memory_space<semaphore_mem>>) src(%72 : memref<1x32xf32, #tpu.memory_space<any>>) dst(%73 : memref<1x32xf32, #tpu.memory_space<vmem>>)
    %c2_i32_87 = arith.constant 2 : i32
    %c0_i32_88 = arith.constant 0 : i32
    %c0_i32_89 = arith.constant 0 : i32
    %76 = tpu.memref_slice %arg8[%c0_i32_88, %c0_i32_89] : memref<100x32xf32, #tpu.memory_space<any>> -> memref<1x32xf32, #tpu.memory_space<any>>
    %c0_i32_90 = arith.constant 0 : i32
    %c0_i32_91 = arith.constant 0 : i32
    %77 = tpu.memref_slice %arg17[%c0_i32_90, %c0_i32_91] : memref<16x32xf32, #tpu.memory_space<vmem>> -> memref<1x32xf32, #tpu.memory_space<vmem>>
    %78 = tpu.memref_slice %arg21[%c2_i32_87, %0] : memref<6x2x!tpu.dma_semaphore, #tpu.memory_space<semaphore_mem>> -> memref<1x1x!tpu.dma_semaphore, #tpu.memory_space<semaphore_mem>>
    %79 = tpu.memref_squeeze %78 : memref<1x1x!tpu.dma_semaphore, #tpu.memory_space<semaphore_mem>> -> memref<!tpu.dma_semaphore, #tpu.memory_space<semaphore_mem>>
    tpu.wait_dma2 semaphore(%79 : memref<!tpu.dma_semaphore, #tpu.memory_space<semaphore_mem>>) src(%76 : memref<1x32xf32, #tpu.memory_space<any>>) dst(%77 : memref<1x32xf32, #tpu.memory_space<vmem>>)
    %c2_i32_92 = arith.constant 2 : i32
    %c0_i32_93 = arith.constant 0 : i32
    %c0_i32_94 = arith.constant 0 : i32
    %80 = tpu.memref_slice %arg8[%c0_i32_93, %c0_i32_94] : memref<100x32xf32, #tpu.memory_space<any>> -> memref<1x32xf32, #tpu.memory_space<any>>
    %c0_i32_95 = arith.constant 0 : i32
    %c0_i32_96 = arith.constant 0 : i32
    %81 = tpu.memref_slice %arg17[%c0_i32_95, %c0_i32_96] : memref<16x32xf32, #tpu.memory_space<vmem>> -> memref<1x32xf32, #tpu.memory_space<vmem>>
    %82 = tpu.memref_slice %arg21[%c2_i32_92, %0] : memref<6x2x!tpu.dma_semaphore, #tpu.memory_space<semaphore_mem>> -> memref<1x1x!tpu.dma_semaphore, #tpu.memory_space<semaphore_mem>>
    %83 = tpu.memref_squeeze %82 : memref<1x1x!tpu.dma_semaphore, #tpu.memory_space<semaphore_mem>> -> memref<!tpu.dma_semaphore, #tpu.memory_space<semaphore_mem>>
    tpu.wait_dma2 semaphore(%83 : memref<!tpu.dma_semaphore, #tpu.memory_space<semaphore_mem>>) src(%80 : memref<1x32xf32, #tpu.memory_space<any>>) dst(%81 : memref<1x32xf32, #tpu.memory_space<vmem>>)
    %c2_i32_97 = arith.constant 2 : i32
    %c0_i32_98 = arith.constant 0 : i32
    %c0_i32_99 = arith.constant 0 : i32
    %84 = tpu.memref_slice %arg8[%c0_i32_98, %c0_i32_99] : memref<100x32xf32, #tpu.memory_space<any>> -> memref<1x32xf32, #tpu.memory_space<any>>
    %c0_i32_100 = arith.constant 0 : i32
    %c0_i32_101 = arith.constant 0 : i32
    %85 = tpu.memref_slice %arg17[%c0_i32_100, %c0_i32_101] : memref<16x32xf32, #tpu.memory_space<vmem>> -> memref<1x32xf32, #tpu.memory_space<vmem>>
    %86 = tpu.memref_slice %arg21[%c2_i32_97, %0] : memref<6x2x!tpu.dma_semaphore, #tpu.memory_space<semaphore_mem>> -> memref<1x1x!tpu.dma_semaphore, #tpu.memory_space<semaphore_mem>>
    %87 = tpu.memref_squeeze %86 : memref<1x1x!tpu.dma_semaphore, #tpu.memory_space<semaphore_mem>> -> memref<!tpu.dma_semaphore, #tpu.memory_space<semaphore_mem>>
    tpu.wait_dma2 semaphore(%87 : memref<!tpu.dma_semaphore, #tpu.memory_space<semaphore_mem>>) src(%84 : memref<1x32xf32, #tpu.memory_space<any>>) dst(%85 : memref<1x32xf32, #tpu.memory_space<vmem>>)
    %c2_i32_102 = arith.constant 2 : i32
    %c0_i32_103 = arith.constant 0 : i32
    %c0_i32_104 = arith.constant 0 : i32
    %88 = tpu.memref_slice %arg8[%c0_i32_103, %c0_i32_104] : memref<100x32xf32, #tpu.memory_space<any>> -> memref<1x32xf32, #tpu.memory_space<any>>
    %c0_i32_105 = arith.constant 0 : i32
    %c0_i32_106 = arith.constant 0 : i32
    %89 = tpu.memref_slice %arg17[%c0_i32_105, %c0_i32_106] : memref<16x32xf32, #tpu.memory_space<vmem>> -> memref<1x32xf32, #tpu.memory_space<vmem>>
    %90 = tpu.memref_slice %arg21[%c2_i32_102, %0] : memref<6x2x!tpu.dma_semaphore, #tpu.memory_space<semaphore_mem>> -> memref<1x1x!tpu.dma_semaphore, #tpu.memory_space<semaphore_mem>>
    %91 = tpu.memref_squeeze %90 : memref<1x1x!tpu.dma_semaphore, #tpu.memory_space<semaphore_mem>> -> memref<!tpu.dma_semaphore, #tpu.memory_space<semaphore_mem>>
    tpu.wait_dma2 semaphore(%91 : memref<!tpu.dma_semaphore, #tpu.memory_space<semaphore_mem>>) src(%88 : memref<1x32xf32, #tpu.memory_space<any>>) dst(%89 : memref<1x32xf32, #tpu.memory_space<vmem>>)
    %c2_i32_107 = arith.constant 2 : i32
    %c0_i32_108 = arith.constant 0 : i32
    %c0_i32_109 = arith.constant 0 : i32
    %92 = tpu.memref_slice %arg8[%c0_i32_108, %c0_i32_109] : memref<100x32xf32, #tpu.memory_space<any>> -> memref<1x32xf32, #tpu.memory_space<any>>
    %c0_i32_110 = arith.constant 0 : i32
    %c0_i32_111 = arith.constant 0 : i32
    %93 = tpu.memref_slice %arg17[%c0_i32_110, %c0_i32_111] : memref<16x32xf32, #tpu.memory_space<vmem>> -> memref<1x32xf32, #tpu.memory_space<vmem>>
    %94 = tpu.memref_slice %arg21[%c2_i32_107, %0] : memref<6x2x!tpu.dma_semaphore, #tpu.memory_space<semaphore_mem>> -> memref<1x1x!tpu.dma_semaphore, #tpu.memory_space<semaphore_mem>>
    %95 = tpu.memref_squeeze %94 : memref<1x1x!tpu.dma_semaphore, #tpu.memory_space<semaphore_mem>> -> memref<!tpu.dma_semaphore, #tpu.memory_space<semaphore_mem>>
    tpu.wait_dma2 semaphore(%95 : memref<!tpu.dma_semaphore, #tpu.memory_space<semaphore_mem>>) src(%92 : memref<1x32xf32, #tpu.memory_space<any>>) dst(%93 : memref<1x32xf32, #tpu.memory_space<vmem>>)
    %c2_i32_112 = arith.constant 2 : i32
    %c0_i32_113 = arith.constant 0 : i32
    %c0_i32_114 = arith.constant 0 : i32
    %96 = tpu.memref_slice %arg8[%c0_i32_113, %c0_i32_114] : memref<100x32xf32, #tpu.memory_space<any>> -> memref<1x32xf32, #tpu.memory_space<any>>
    %c0_i32_115 = arith.constant 0 : i32
    %c0_i32_116 = arith.constant 0 : i32
    %97 = tpu.memref_slice %arg17[%c0_i32_115, %c0_i32_116] : memref<16x32xf32, #tpu.memory_space<vmem>> -> memref<1x32xf32, #tpu.memory_space<vmem>>
    %98 = tpu.memref_slice %arg21[%c2_i32_112, %0] : memref<6x2x!tpu.dma_semaphore, #tpu.memory_space<semaphore_mem>> -> memref<1x1x!tpu.dma_semaphore, #tpu.memory_space<semaphore_mem>>
    %99 = tpu.memref_squeeze %98 : memref<1x1x!tpu.dma_semaphore, #tpu.memory_space<semaphore_mem>> -> memref<!tpu.dma_semaphore, #tpu.memory_space<semaphore_mem>>
    tpu.wait_dma2 semaphore(%99 : memref<!tpu.dma_semaphore, #tpu.memory_space<semaphore_mem>>) src(%96 : memref<1x32xf32, #tpu.memory_space<any>>) dst(%97 : memref<1x32xf32, #tpu.memory_space<vmem>>)
    %c2_i32_117 = arith.constant 2 : i32
    %c0_i32_118 = arith.constant 0 : i32
    %c0_i32_119 = arith.constant 0 : i32
    %100 = tpu.memref_slice %arg8[%c0_i32_118, %c0_i32_119] : memref<100x32xf32, #tpu.memory_space<any>> -> memref<1x32xf32, #tpu.memory_space<any>>
    %c0_i32_120 = arith.constant 0 : i32
    %c0_i32_121 = arith.constant 0 : i32
    %101 = tpu.memref_slice %arg17[%c0_i32_120, %c0_i32_121] : memref<16x32xf32, #tpu.memory_space<vmem>> -> memref<1x32xf32, #tpu.memory_space<vmem>>
    %102 = tpu.memref_slice %arg21[%c2_i32_117, %0] : memref<6x2x!tpu.dma_semaphore, #tpu.memory_space<semaphore_mem>> -> memref<1x1x!tpu.dma_semaphore, #tpu.memory_space<semaphore_mem>>
    %103 = tpu.memref_squeeze %102 : memref<1x1x!tpu.dma_semaphore, #tpu.memory_space<semaphore_mem>> -> memref<!tpu.dma_semaphore, #tpu.memory_space<semaphore_mem>>
    tpu.wait_dma2 semaphore(%103 : memref<!tpu.dma_semaphore, #tpu.memory_space<semaphore_mem>>) src(%100 : memref<1x32xf32, #tpu.memory_space<any>>) dst(%101 : memref<1x32xf32, #tpu.memory_space<vmem>>)
    %c3_i32 = arith.constant 3 : i32
    %c0_i32_122 = arith.constant 0 : i32
    %c0_i32_123 = arith.constant 0 : i32
    %104 = tpu.memref_slice %arg9[%c0_i32_122, %c0_i32_123] : memref<100x32xf32, #tpu.memory_space<any>> -> memref<1x32xf32, #tpu.memory_space<any>>
    %c0_i32_124 = arith.constant 0 : i32
    %c0_i32_125 = arith.constant 0 : i32
    %105 = tpu.memref_slice %arg18[%c0_i32_124, %c0_i32_125] : memref<16x32xf32, #tpu.memory_space<vmem>> -> memref<1x32xf32, #tpu.memory_space<vmem>>
    %106 = tpu.memref_slice %arg21[%c3_i32, %0] : memref<6x2x!tpu.dma_semaphore, #tpu.memory_space<semaphore_mem>> -> memref<1x1x!tpu.dma_semaphore, #tpu.memory_space<semaphore_mem>>
    %107 = tpu.memref_squeeze %106 : memref<1x1x!tpu.dma_semaphore, #tpu.memory_space<semaphore_mem>> -> memref<!tpu.dma_semaphore, #tpu.memory_space<semaphore_mem>>
    tpu.wait_dma2 semaphore(%107 : memref<!tpu.dma_semaphore, #tpu.memory_space<semaphore_mem>>) src(%104 : memref<1x32xf32, #tpu.memory_space<any>>) dst(%105 : memref<1x32xf32, #tpu.memory_space<vmem>>)
    %c3_i32_126 = arith.constant 3 : i32
    %c0_i32_127 = arith.constant 0 : i32
    %c0_i32_128 = arith.constant 0 : i32
    %108 = tpu.memref_slice %arg9[%c0_i32_127, %c0_i32_128] : memref<100x32xf32, #tpu.memory_space<any>> -> memref<1x32xf32, #tpu.memory_space<any>>
    %c0_i32_129 = arith.constant 0 : i32
    %c0_i32_130 = arith.constant 0 : i32
    %109 = tpu.memref_slice %arg18[%c0_i32_129, %c0_i32_130] : memref<16x32xf32, #tpu.memory_space<vmem>> -> memref<1x32xf32, #tpu.memory_space<vmem>>
    %110 = tpu.memref_slice %arg21[%c3_i32_126, %0] : memref<6x2x!tpu.dma_semaphore, #tpu.memory_space<semaphore_mem>> -> memref<1x1x!tpu.dma_semaphore, #tpu.memory_space<semaphore_mem>>
    %111 = tpu.memref_squeeze %110 : memref<1x1x!tpu.dma_semaphore, #tpu.memory_space<semaphore_mem>> -> memref<!tpu.dma_semaphore, #tpu.memory_space<semaphore_mem>>
    tpu.wait_dma2 semaphore(%111 : memref<!tpu.dma_semaphore, #tpu.memory_space<semaphore_mem>>) src(%108 : memref<1x32xf32, #tpu.memory_space<any>>) dst(%109 : memref<1x32xf32, #tpu.memory_space<vmem>>)
    %c3_i32_131 = arith.constant 3 : i32
    %c0_i32_132 = arith.constant 0 : i32
    %c0_i32_133 = arith.constant 0 : i32
    %112 = tpu.memref_slice %arg9[%c0_i32_132, %c0_i32_133] : memref<100x32xf32, #tpu.memory_space<any>> -> memref<1x32xf32, #tpu.memory_space<any>>
    %c0_i32_134 = arith.constant 0 : i32
    %c0_i32_135 = arith.constant 0 : i32
    %113 = tpu.memref_slice %arg18[%c0_i32_134, %c0_i32_135] : memref<16x32xf32, #tpu.memory_space<vmem>> -> memref<1x32xf32, #tpu.memory_space<vmem>>
    %114 = tpu.memref_slice %arg21[%c3_i32_131, %0] : memref<6x2x!tpu.dma_semaphore, #tpu.memory_space<semaphore_mem>> -> memref<1x1x!tpu.dma_semaphore, #tpu.memory_space<semaphore_mem>>
    %115 = tpu.memref_squeeze %114 : memref<1x1x!tpu.dma_semaphore, #tpu.memory_space<semaphore_mem>> -> memref<!tpu.dma_semaphore, #tpu.memory_space<semaphore_mem>>
    tpu.wait_dma2 semaphore(%115 : memref<!tpu.dma_semaphore, #tpu.memory_space<semaphore_mem>>) src(%112 : memref<1x32xf32, #tpu.memory_space<any>>) dst(%113 : memref<1x32xf32, #tpu.memory_space<vmem>>)
    %c3_i32_136 = arith.constant 3 : i32
    %c0_i32_137 = arith.constant 0 : i32
    %c0_i32_138 = arith.constant 0 : i32
    %116 = tpu.memref_slice %arg9[%c0_i32_137, %c0_i32_138] : memref<100x32xf32, #tpu.memory_space<any>> -> memref<1x32xf32, #tpu.memory_space<any>>
    %c0_i32_139 = arith.constant 0 : i32
    %c0_i32_140 = arith.constant 0 : i32
    %117 = tpu.memref_slice %arg18[%c0_i32_139, %c0_i32_140] : memref<16x32xf32, #tpu.memory_space<vmem>> -> memref<1x32xf32, #tpu.memory_space<vmem>>
    %118 = tpu.memref_slice %arg21[%c3_i32_136, %0] : memref<6x2x!tpu.dma_semaphore, #tpu.memory_space<semaphore_mem>> -> memref<1x1x!tpu.dma_semaphore, #tpu.memory_space<semaphore_mem>>
    %119 = tpu.memref_squeeze %118 : memref<1x1x!tpu.dma_semaphore, #tpu.memory_space<semaphore_mem>> -> memref<!tpu.dma_semaphore, #tpu.memory_space<semaphore_mem>>
    tpu.wait_dma2 semaphore(%119 : memref<!tpu.dma_semaphore, #tpu.memory_space<semaphore_mem>>) src(%116 : memref<1x32xf32, #tpu.memory_space<any>>) dst(%117 : memref<1x32xf32, #tpu.memory_space<vmem>>)
    %c3_i32_141 = arith.constant 3 : i32
    %c0_i32_142 = arith.constant 0 : i32
    %c0_i32_143 = arith.constant 0 : i32
    %120 = tpu.memref_slice %arg9[%c0_i32_142, %c0_i32_143] : memref<100x32xf32, #tpu.memory_space<any>> -> memref<1x32xf32, #tpu.memory_space<any>>
    %c0_i32_144 = arith.constant 0 : i32
    %c0_i32_145 = arith.constant 0 : i32
    %121 = tpu.memref_slice %arg18[%c0_i32_144, %c0_i32_145] : memref<16x32xf32, #tpu.memory_space<vmem>> -> memref<1x32xf32, #tpu.memory_space<vmem>>
    %122 = tpu.memref_slice %arg21[%c3_i32_141, %0] : memref<6x2x!tpu.dma_semaphore, #tpu.memory_space<semaphore_mem>> -> memref<1x1x!tpu.dma_semaphore, #tpu.memory_space<semaphore_mem>>
    %123 = tpu.memref_squeeze %122 : memref<1x1x!tpu.dma_semaphore, #tpu.memory_space<semaphore_mem>> -> memref<!tpu.dma_semaphore, #tpu.memory_space<semaphore_mem>>
    tpu.wait_dma2 semaphore(%123 : memref<!tpu.dma_semaphore, #tpu.memory_space<semaphore_mem>>) src(%120 : memref<1x32xf32, #tpu.memory_space<any>>) dst(%121 : memref<1x32xf32, #tpu.memory_space<vmem>>)
    %c3_i32_146 = arith.constant 3 : i32
    %c0_i32_147 = arith.constant 0 : i32
    %c0_i32_148 = arith.constant 0 : i32
    %124 = tpu.memref_slice %arg9[%c0_i32_147, %c0_i32_148] : memref<100x32xf32, #tpu.memory_space<any>> -> memref<1x32xf32, #tpu.memory_space<any>>
    %c0_i32_149 = arith.constant 0 : i32
    %c0_i32_150 = arith.constant 0 : i32
    %125 = tpu.memref_slice %arg18[%c0_i32_149, %c0_i32_150] : memref<16x32xf32, #tpu.memory_space<vmem>> -> memref<1x32xf32, #tpu.memory_space<vmem>>
    %126 = tpu.memref_slice %arg21[%c3_i32_146, %0] : memref<6x2x!tpu.dma_semaphore, #tpu.memory_space<semaphore_mem>> -> memref<1x1x!tpu.dma_semaphore, #tpu.memory_space<semaphore_mem>>
    %127 = tpu.memref_squeeze %126 : memref<1x1x!tpu.dma_semaphore, #tpu.memory_space<semaphore_mem>> -> memref<!tpu.dma_semaphore, #tpu.memory_space<semaphore_mem>>
    tpu.wait_dma2 semaphore(%127 : memref<!tpu.dma_semaphore, #tpu.memory_space<semaphore_mem>>) src(%124 : memref<1x32xf32, #tpu.memory_space<any>>) dst(%125 : memref<1x32xf32, #tpu.memory_space<vmem>>)
    %c3_i32_151 = arith.constant 3 : i32
    %c0_i32_152 = arith.constant 0 : i32
    %c0_i32_153 = arith.constant 0 : i32
    %128 = tpu.memref_slice %arg9[%c0_i32_152, %c0_i32_153] : memref<100x32xf32, #tpu.memory_space<any>> -> memref<1x32xf32, #tpu.memory_space<any>>
    %c0_i32_154 = arith.constant 0 : i32
    %c0_i32_155 = arith.constant 0 : i32
    %129 = tpu.memref_slice %arg18[%c0_i32_154, %c0_i32_155] : memref<16x32xf32, #tpu.memory_space<vmem>> -> memref<1x32xf32, #tpu.memory_space<vmem>>
    %130 = tpu.memref_slice %arg21[%c3_i32_151, %0] : memref<6x2x!tpu.dma_semaphore, #tpu.memory_space<semaphore_mem>> -> memref<1x1x!tpu.dma_semaphore, #tpu.memory_space<semaphore_mem>>
    %131 = tpu.memref_squeeze %130 : memref<1x1x!tpu.dma_semaphore, #tpu.memory_space<semaphore_mem>> -> memref<!tpu.dma_semaphore, #tpu.memory_space<semaphore_mem>>
    tpu.wait_dma2 semaphore(%131 : memref<!tpu.dma_semaphore, #tpu.memory_space<semaphore_mem>>) src(%128 : memref<1x32xf32, #tpu.memory_space<any>>) dst(%129 : memref<1x32xf32, #tpu.memory_space<vmem>>)
    %c3_i32_156 = arith.constant 3 : i32
    %c0_i32_157 = arith.constant 0 : i32
    %c0_i32_158 = arith.constant 0 : i32
    %132 = tpu.memref_slice %arg9[%c0_i32_157, %c0_i32_158] : memref<100x32xf32, #tpu.memory_space<any>> -> memref<1x32xf32, #tpu.memory_space<any>>
    %c0_i32_159 = arith.constant 0 : i32
    %c0_i32_160 = arith.constant 0 : i32
    %133 = tpu.memref_slice %arg18[%c0_i32_159, %c0_i32_160] : memref<16x32xf32, #tpu.memory_space<vmem>> -> memref<1x32xf32, #tpu.memory_space<vmem>>
    %134 = tpu.memref_slice %arg21[%c3_i32_156, %0] : memref<6x2x!tpu.dma_semaphore, #tpu.memory_space<semaphore_mem>> -> memref<1x1x!tpu.dma_semaphore, #tpu.memory_space<semaphore_mem>>
    %135 = tpu.memref_squeeze %134 : memref<1x1x!tpu.dma_semaphore, #tpu.memory_space<semaphore_mem>> -> memref<!tpu.dma_semaphore, #tpu.memory_space<semaphore_mem>>
    tpu.wait_dma2 semaphore(%135 : memref<!tpu.dma_semaphore, #tpu.memory_space<semaphore_mem>>) src(%132 : memref<1x32xf32, #tpu.memory_space<any>>) dst(%133 : memref<1x32xf32, #tpu.memory_space<vmem>>)
    %c4_i32_161 = arith.constant 4 : i32
    %c0_i32_162 = arith.constant 0 : i32
    %c0_i32_163 = arith.constant 0 : i32
    %136 = tpu.memref_slice %arg8[%c0_i32_162, %c0_i32_163] : memref<100x32xf32, #tpu.memory_space<any>> -> memref<1x32xf32, #tpu.memory_space<any>>
    %c0_i32_164 = arith.constant 0 : i32
    %c0_i32_165 = arith.constant 0 : i32
    %137 = tpu.memref_slice %arg19[%c0_i32_164, %c0_i32_165] : memref<16x32xf32, #tpu.memory_space<vmem>> -> memref<1x32xf32, #tpu.memory_space<vmem>>
    %138 = tpu.memref_slice %arg21[%c4_i32_161, %0] : memref<6x2x!tpu.dma_semaphore, #tpu.memory_space<semaphore_mem>> -> memref<1x1x!tpu.dma_semaphore, #tpu.memory_space<semaphore_mem>>
    %139 = tpu.memref_squeeze %138 : memref<1x1x!tpu.dma_semaphore, #tpu.memory_space<semaphore_mem>> -> memref<!tpu.dma_semaphore, #tpu.memory_space<semaphore_mem>>
    tpu.wait_dma2 semaphore(%139 : memref<!tpu.dma_semaphore, #tpu.memory_space<semaphore_mem>>) src(%136 : memref<1x32xf32, #tpu.memory_space<any>>) dst(%137 : memref<1x32xf32, #tpu.memory_space<vmem>>)
    %c4_i32_166 = arith.constant 4 : i32
    %c0_i32_167 = arith.constant 0 : i32
    %c0_i32_168 = arith.constant 0 : i32
    %140 = tpu.memref_slice %arg8[%c0_i32_167, %c0_i32_168] : memref<100x32xf32, #tpu.memory_space<any>> -> memref<1x32xf32, #tpu.memory_space<any>>
    %c0_i32_169 = arith.constant 0 : i32
    %c0_i32_170 = arith.constant 0 : i32
    %141 = tpu.memref_slice %arg19[%c0_i32_169, %c0_i32_170] : memref<16x32xf32, #tpu.memory_space<vmem>> -> memref<1x32xf32, #tpu.memory_space<vmem>>
    %142 = tpu.memref_slice %arg21[%c4_i32_166, %0] : memref<6x2x!tpu.dma_semaphore, #tpu.memory_space<semaphore_mem>> -> memref<1x1x!tpu.dma_semaphore, #tpu.memory_space<semaphore_mem>>
    %143 = tpu.memref_squeeze %142 : memref<1x1x!tpu.dma_semaphore, #tpu.memory_space<semaphore_mem>> -> memref<!tpu.dma_semaphore, #tpu.memory_space<semaphore_mem>>
    tpu.wait_dma2 semaphore(%143 : memref<!tpu.dma_semaphore, #tpu.memory_space<semaphore_mem>>) src(%140 : memref<1x32xf32, #tpu.memory_space<any>>) dst(%141 : memref<1x32xf32, #tpu.memory_space<vmem>>)
    %c4_i32_171 = arith.constant 4 : i32
    %c0_i32_172 = arith.constant 0 : i32
    %c0_i32_173 = arith.constant 0 : i32
    %144 = tpu.memref_slice %arg8[%c0_i32_172, %c0_i32_173] : memref<100x32xf32, #tpu.memory_space<any>> -> memref<1x32xf32, #tpu.memory_space<any>>
    %c0_i32_174 = arith.constant 0 : i32
    %c0_i32_175 = arith.constant 0 : i32
    %145 = tpu.memref_slice %arg19[%c0_i32_174, %c0_i32_175] : memref<16x32xf32, #tpu.memory_space<vmem>> -> memref<1x32xf32, #tpu.memory_space<vmem>>
    %146 = tpu.memref_slice %arg21[%c4_i32_171, %0] : memref<6x2x!tpu.dma_semaphore, #tpu.memory_space<semaphore_mem>> -> memref<1x1x!tpu.dma_semaphore, #tpu.memory_space<semaphore_mem>>
    %147 = tpu.memref_squeeze %146 : memref<1x1x!tpu.dma_semaphore, #tpu.memory_space<semaphore_mem>> -> memref<!tpu.dma_semaphore, #tpu.memory_space<semaphore_mem>>
    tpu.wait_dma2 semaphore(%147 : memref<!tpu.dma_semaphore, #tpu.memory_space<semaphore_mem>>) src(%144 : memref<1x32xf32, #tpu.memory_space<any>>) dst(%145 : memref<1x32xf32, #tpu.memory_space<vmem>>)
    %c4_i32_176 = arith.constant 4 : i32
    %c0_i32_177 = arith.constant 0 : i32
    %c0_i32_178 = arith.constant 0 : i32
    %148 = tpu.memref_slice %arg8[%c0_i32_177, %c0_i32_178] : memref<100x32xf32, #tpu.memory_space<any>> -> memref<1x32xf32, #tpu.memory_space<any>>
    %c0_i32_179 = arith.constant 0 : i32
    %c0_i32_180 = arith.constant 0 : i32
    %149 = tpu.memref_slice %arg19[%c0_i32_179, %c0_i32_180] : memref<16x32xf32, #tpu.memory_space<vmem>> -> memref<1x32xf32, #tpu.memory_space<vmem>>
    %150 = tpu.memref_slice %arg21[%c4_i32_176, %0] : memref<6x2x!tpu.dma_semaphore, #tpu.memory_space<semaphore_mem>> -> memref<1x1x!tpu.dma_semaphore, #tpu.memory_space<semaphore_mem>>
    %151 = tpu.memref_squeeze %150 : memref<1x1x!tpu.dma_semaphore, #tpu.memory_space<semaphore_mem>> -> memref<!tpu.dma_semaphore, #tpu.memory_space<semaphore_mem>>
    tpu.wait_dma2 semaphore(%151 : memref<!tpu.dma_semaphore, #tpu.memory_space<semaphore_mem>>) src(%148 : memref<1x32xf32, #tpu.memory_space<any>>) dst(%149 : memref<1x32xf32, #tpu.memory_space<vmem>>)
    %c4_i32_181 = arith.constant 4 : i32
    %c0_i32_182 = arith.constant 0 : i32
    %c0_i32_183 = arith.constant 0 : i32
    %152 = tpu.memref_slice %arg8[%c0_i32_182, %c0_i32_183] : memref<100x32xf32, #tpu.memory_space<any>> -> memref<1x32xf32, #tpu.memory_space<any>>
    %c0_i32_184 = arith.constant 0 : i32
    %c0_i32_185 = arith.constant 0 : i32
    %153 = tpu.memref_slice %arg19[%c0_i32_184, %c0_i32_185] : memref<16x32xf32, #tpu.memory_space<vmem>> -> memref<1x32xf32, #tpu.memory_space<vmem>>
    %154 = tpu.memref_slice %arg21[%c4_i32_181, %0] : memref<6x2x!tpu.dma_semaphore, #tpu.memory_space<semaphore_mem>> -> memref<1x1x!tpu.dma_semaphore, #tpu.memory_space<semaphore_mem>>
    %155 = tpu.memref_squeeze %154 : memref<1x1x!tpu.dma_semaphore, #tpu.memory_space<semaphore_mem>> -> memref<!tpu.dma_semaphore, #tpu.memory_space<semaphore_mem>>
    tpu.wait_dma2 semaphore(%155 : memref<!tpu.dma_semaphore, #tpu.memory_space<semaphore_mem>>) src(%152 : memref<1x32xf32, #tpu.memory_space<any>>) dst(%153 : memref<1x32xf32, #tpu.memory_space<vmem>>)
    %c4_i32_186 = arith.constant 4 : i32
    %c0_i32_187 = arith.constant 0 : i32
    %c0_i32_188 = arith.constant 0 : i32
    %156 = tpu.memref_slice %arg8[%c0_i32_187, %c0_i32_188] : memref<100x32xf32, #tpu.memory_space<any>> -> memref<1x32xf32, #tpu.memory_space<any>>
    %c0_i32_189 = arith.constant 0 : i32
    %c0_i32_190 = arith.constant 0 : i32
    %157 = tpu.memref_slice %arg19[%c0_i32_189, %c0_i32_190] : memref<16x32xf32, #tpu.memory_space<vmem>> -> memref<1x32xf32, #tpu.memory_space<vmem>>
    %158 = tpu.memref_slice %arg21[%c4_i32_186, %0] : memref<6x2x!tpu.dma_semaphore, #tpu.memory_space<semaphore_mem>> -> memref<1x1x!tpu.dma_semaphore, #tpu.memory_space<semaphore_mem>>
    %159 = tpu.memref_squeeze %158 : memref<1x1x!tpu.dma_semaphore, #tpu.memory_space<semaphore_mem>> -> memref<!tpu.dma_semaphore, #tpu.memory_space<semaphore_mem>>
    tpu.wait_dma2 semaphore(%159 : memref<!tpu.dma_semaphore, #tpu.memory_space<semaphore_mem>>) src(%156 : memref<1x32xf32, #tpu.memory_space<any>>) dst(%157 : memref<1x32xf32, #tpu.memory_space<vmem>>)
    %c4_i32_191 = arith.constant 4 : i32
    %c0_i32_192 = arith.constant 0 : i32
    %c0_i32_193 = arith.constant 0 : i32
    %160 = tpu.memref_slice %arg8[%c0_i32_192, %c0_i32_193] : memref<100x32xf32, #tpu.memory_space<any>> -> memref<1x32xf32, #tpu.memory_space<any>>
    %c0_i32_194 = arith.constant 0 : i32
    %c0_i32_195 = arith.constant 0 : i32
    %161 = tpu.memref_slice %arg19[%c0_i32_194, %c0_i32_195] : memref<16x32xf32, #tpu.memory_space<vmem>> -> memref<1x32xf32, #tpu.memory_space<vmem>>
    %162 = tpu.memref_slice %arg21[%c4_i32_191, %0] : memref<6x2x!tpu.dma_semaphore, #tpu.memory_space<semaphore_mem>> -> memref<1x1x!tpu.dma_semaphore, #tpu.memory_space<semaphore_mem>>
    %163 = tpu.memref_squeeze %162 : memref<1x1x!tpu.dma_semaphore, #tpu.memory_space<semaphore_mem>> -> memref<!tpu.dma_semaphore, #tpu.memory_space<semaphore_mem>>
    tpu.wait_dma2 semaphore(%163 : memref<!tpu.dma_semaphore, #tpu.memory_space<semaphore_mem>>) src(%160 : memref<1x32xf32, #tpu.memory_space<any>>) dst(%161 : memref<1x32xf32, #tpu.memory_space<vmem>>)
    %c4_i32_196 = arith.constant 4 : i32
    %c0_i32_197 = arith.constant 0 : i32
    %c0_i32_198 = arith.constant 0 : i32
    %164 = tpu.memref_slice %arg8[%c0_i32_197, %c0_i32_198] : memref<100x32xf32, #tpu.memory_space<any>> -> memref<1x32xf32, #tpu.memory_space<any>>
    %c0_i32_199 = arith.constant 0 : i32
    %c0_i32_200 = arith.constant 0 : i32
    %165 = tpu.memref_slice %arg19[%c0_i32_199, %c0_i32_200] : memref<16x32xf32, #tpu.memory_space<vmem>> -> memref<1x32xf32, #tpu.memory_space<vmem>>
    %166 = tpu.memref_slice %arg21[%c4_i32_196, %0] : memref<6x2x!tpu.dma_semaphore, #tpu.memory_space<semaphore_mem>> -> memref<1x1x!tpu.dma_semaphore, #tpu.memory_space<semaphore_mem>>
    %167 = tpu.memref_squeeze %166 : memref<1x1x!tpu.dma_semaphore, #tpu.memory_space<semaphore_mem>> -> memref<!tpu.dma_semaphore, #tpu.memory_space<semaphore_mem>>
    tpu.wait_dma2 semaphore(%167 : memref<!tpu.dma_semaphore, #tpu.memory_space<semaphore_mem>>) src(%164 : memref<1x32xf32, #tpu.memory_space<any>>) dst(%165 : memref<1x32xf32, #tpu.memory_space<vmem>>)
    %c5_i32 = arith.constant 5 : i32
    %c0_i32_201 = arith.constant 0 : i32
    %c0_i32_202 = arith.constant 0 : i32
    %168 = tpu.memref_slice %arg9[%c0_i32_201, %c0_i32_202] : memref<100x32xf32, #tpu.memory_space<any>> -> memref<1x32xf32, #tpu.memory_space<any>>
    %c0_i32_203 = arith.constant 0 : i32
    %c0_i32_204 = arith.constant 0 : i32
    %169 = tpu.memref_slice %arg20[%c0_i32_203, %c0_i32_204] : memref<16x32xf32, #tpu.memory_space<vmem>> -> memref<1x32xf32, #tpu.memory_space<vmem>>
    %170 = tpu.memref_slice %arg21[%c5_i32, %0] : memref<6x2x!tpu.dma_semaphore, #tpu.memory_space<semaphore_mem>> -> memref<1x1x!tpu.dma_semaphore, #tpu.memory_space<semaphore_mem>>
    %171 = tpu.memref_squeeze %170 : memref<1x1x!tpu.dma_semaphore, #tpu.memory_space<semaphore_mem>> -> memref<!tpu.dma_semaphore, #tpu.memory_space<semaphore_mem>>
    tpu.wait_dma2 semaphore(%171 : memref<!tpu.dma_semaphore, #tpu.memory_space<semaphore_mem>>) src(%168 : memref<1x32xf32, #tpu.memory_space<any>>) dst(%169 : memref<1x32xf32, #tpu.memory_space<vmem>>)
    %c5_i32_205 = arith.constant 5 : i32
    %c0_i32_206 = arith.constant 0 : i32
    %c0_i32_207 = arith.constant 0 : i32
    %172 = tpu.memref_slice %arg9[%c0_i32_206, %c0_i32_207] : memref<100x32xf32, #tpu.memory_space<any>> -> memref<1x32xf32, #tpu.memory_space<any>>
    %c0_i32_208 = arith.constant 0 : i32
    %c0_i32_209 = arith.constant 0 : i32
    %173 = tpu.memref_slice %arg20[%c0_i32_208, %c0_i32_209] : memref<16x32xf32, #tpu.memory_space<vmem>> -> memref<1x32xf32, #tpu.memory_space<vmem>>
    %174 = tpu.memref_slice %arg21[%c5_i32_205, %0] : memref<6x2x!tpu.dma_semaphore, #tpu.memory_space<semaphore_mem>> -> memref<1x1x!tpu.dma_semaphore, #tpu.memory_space<semaphore_mem>>
    %175 = tpu.memref_squeeze %174 : memref<1x1x!tpu.dma_semaphore, #tpu.memory_space<semaphore_mem>> -> memref<!tpu.dma_semaphore, #tpu.memory_space<semaphore_mem>>
    tpu.wait_dma2 semaphore(%175 : memref<!tpu.dma_semaphore, #tpu.memory_space<semaphore_mem>>) src(%172 : memref<1x32xf32, #tpu.memory_space<any>>) dst(%173 : memref<1x32xf32, #tpu.memory_space<vmem>>)
    %c5_i32_210 = arith.constant 5 : i32
    %c0_i32_211 = arith.constant 0 : i32
    %c0_i32_212 = arith.constant 0 : i32
    %176 = tpu.memref_slice %arg9[%c0_i32_211, %c0_i32_212] : memref<100x32xf32, #tpu.memory_space<any>> -> memref<1x32xf32, #tpu.memory_space<any>>
    %c0_i32_213 = arith.constant 0 : i32
    %c0_i32_214 = arith.constant 0 : i32
    %177 = tpu.memref_slice %arg20[%c0_i32_213, %c0_i32_214] : memref<16x32xf32, #tpu.memory_space<vmem>> -> memref<1x32xf32, #tpu.memory_space<vmem>>
    %178 = tpu.memref_slice %arg21[%c5_i32_210, %0] : memref<6x2x!tpu.dma_semaphore, #tpu.memory_space<semaphore_mem>> -> memref<1x1x!tpu.dma_semaphore, #tpu.memory_space<semaphore_mem>>
    %179 = tpu.memref_squeeze %178 : memref<1x1x!tpu.dma_semaphore, #tpu.memory_space<semaphore_mem>> -> memref<!tpu.dma_semaphore, #tpu.memory_space<semaphore_mem>>
    tpu.wait_dma2 semaphore(%179 : memref<!tpu.dma_semaphore, #tpu.memory_space<semaphore_mem>>) src(%176 : memref<1x32xf32, #tpu.memory_space<any>>) dst(%177 : memref<1x32xf32, #tpu.memory_space<vmem>>)
    %c5_i32_215 = arith.constant 5 : i32
    %c0_i32_216 = arith.constant 0 : i32
    %c0_i32_217 = arith.constant 0 : i32
    %180 = tpu.memref_slice %arg9[%c0_i32_216, %c0_i32_217] : memref<100x32xf32, #tpu.memory_space<any>> -> memref<1x32xf32, #tpu.memory_space<any>>
    %c0_i32_218 = arith.constant 0 : i32
    %c0_i32_219 = arith.constant 0 : i32
    %181 = tpu.memref_slice %arg20[%c0_i32_218, %c0_i32_219] : memref<16x32xf32, #tpu.memory_space<vmem>> -> memref<1x32xf32, #tpu.memory_space<vmem>>
    %182 = tpu.memref_slice %arg21[%c5_i32_215, %0] : memref<6x2x!tpu.dma_semaphore, #tpu.memory_space<semaphore_mem>> -> memref<1x1x!tpu.dma_semaphore, #tpu.memory_space<semaphore_mem>>
    %183 = tpu.memref_squeeze %182 : memref<1x1x!tpu.dma_semaphore, #tpu.memory_space<semaphore_mem>> -> memref<!tpu.dma_semaphore, #tpu.memory_space<semaphore_mem>>
    tpu.wait_dma2 semaphore(%183 : memref<!tpu.dma_semaphore, #tpu.memory_space<semaphore_mem>>) src(%180 : memref<1x32xf32, #tpu.memory_space<any>>) dst(%181 : memref<1x32xf32, #tpu.memory_space<vmem>>)
    %c5_i32_220 = arith.constant 5 : i32
    %c0_i32_221 = arith.constant 0 : i32
    %c0_i32_222 = arith.constant 0 : i32
    %184 = tpu.memref_slice %arg9[%c0_i32_221, %c0_i32_222] : memref<100x32xf32, #tpu.memory_space<any>> -> memref<1x32xf32, #tpu.memory_space<any>>
    %c0_i32_223 = arith.constant 0 : i32
    %c0_i32_224 = arith.constant 0 : i32
    %185 = tpu.memref_slice %arg20[%c0_i32_223, %c0_i32_224] : memref<16x32xf32, #tpu.memory_space<vmem>> -> memref<1x32xf32, #tpu.memory_space<vmem>>
    %186 = tpu.memref_slice %arg21[%c5_i32_220, %0] : memref<6x2x!tpu.dma_semaphore, #tpu.memory_space<semaphore_mem>> -> memref<1x1x!tpu.dma_semaphore, #tpu.memory_space<semaphore_mem>>
    %187 = tpu.memref_squeeze %186 : memref<1x1x!tpu.dma_semaphore, #tpu.memory_space<semaphore_mem>> -> memref<!tpu.dma_semaphore, #tpu.memory_space<semaphore_mem>>
    tpu.wait_dma2 semaphore(%187 : memref<!tpu.dma_semaphore, #tpu.memory_space<semaphore_mem>>) src(%184 : memref<1x32xf32, #tpu.memory_space<any>>) dst(%185 : memref<1x32xf32, #tpu.memory_space<vmem>>)
    %c5_i32_225 = arith.constant 5 : i32
    %c0_i32_226 = arith.constant 0 : i32
    %c0_i32_227 = arith.constant 0 : i32
    %188 = tpu.memref_slice %arg9[%c0_i32_226, %c0_i32_227] : memref<100x32xf32, #tpu.memory_space<any>> -> memref<1x32xf32, #tpu.memory_space<any>>
    %c0_i32_228 = arith.constant 0 : i32
    %c0_i32_229 = arith.constant 0 : i32
    %189 = tpu.memref_slice %arg20[%c0_i32_228, %c0_i32_229] : memref<16x32xf32, #tpu.memory_space<vmem>> -> memref<1x32xf32, #tpu.memory_space<vmem>>
    %190 = tpu.memref_slice %arg21[%c5_i32_225, %0] : memref<6x2x!tpu.dma_semaphore, #tpu.memory_space<semaphore_mem>> -> memref<1x1x!tpu.dma_semaphore, #tpu.memory_space<semaphore_mem>>
    %191 = tpu.memref_squeeze %190 : memref<1x1x!tpu.dma_semaphore, #tpu.memory_space<semaphore_mem>> -> memref<!tpu.dma_semaphore, #tpu.memory_space<semaphore_mem>>
    tpu.wait_dma2 semaphore(%191 : memref<!tpu.dma_semaphore, #tpu.memory_space<semaphore_mem>>) src(%188 : memref<1x32xf32, #tpu.memory_space<any>>) dst(%189 : memref<1x32xf32, #tpu.memory_space<vmem>>)
    %c5_i32_230 = arith.constant 5 : i32
    %c0_i32_231 = arith.constant 0 : i32
    %c0_i32_232 = arith.constant 0 : i32
    %192 = tpu.memref_slice %arg9[%c0_i32_231, %c0_i32_232] : memref<100x32xf32, #tpu.memory_space<any>> -> memref<1x32xf32, #tpu.memory_space<any>>
    %c0_i32_233 = arith.constant 0 : i32
    %c0_i32_234 = arith.constant 0 : i32
    %193 = tpu.memref_slice %arg20[%c0_i32_233, %c0_i32_234] : memref<16x32xf32, #tpu.memory_space<vmem>> -> memref<1x32xf32, #tpu.memory_space<vmem>>
    %194 = tpu.memref_slice %arg21[%c5_i32_230, %0] : memref<6x2x!tpu.dma_semaphore, #tpu.memory_space<semaphore_mem>> -> memref<1x1x!tpu.dma_semaphore, #tpu.memory_space<semaphore_mem>>
    %195 = tpu.memref_squeeze %194 : memref<1x1x!tpu.dma_semaphore, #tpu.memory_space<semaphore_mem>> -> memref<!tpu.dma_semaphore, #tpu.memory_space<semaphore_mem>>
    tpu.wait_dma2 semaphore(%195 : memref<!tpu.dma_semaphore, #tpu.memory_space<semaphore_mem>>) src(%192 : memref<1x32xf32, #tpu.memory_space<any>>) dst(%193 : memref<1x32xf32, #tpu.memory_space<vmem>>)
    %c5_i32_235 = arith.constant 5 : i32
    %c0_i32_236 = arith.constant 0 : i32
    %c0_i32_237 = arith.constant 0 : i32
    %196 = tpu.memref_slice %arg9[%c0_i32_236, %c0_i32_237] : memref<100x32xf32, #tpu.memory_space<any>> -> memref<1x32xf32, #tpu.memory_space<any>>
    %c0_i32_238 = arith.constant 0 : i32
    %c0_i32_239 = arith.constant 0 : i32
    %197 = tpu.memref_slice %arg20[%c0_i32_238, %c0_i32_239] : memref<16x32xf32, #tpu.memory_space<vmem>> -> memref<1x32xf32, #tpu.memory_space<vmem>>
    %198 = tpu.memref_slice %arg21[%c5_i32_235, %0] : memref<6x2x!tpu.dma_semaphore, #tpu.memory_space<semaphore_mem>> -> memref<1x1x!tpu.dma_semaphore, #tpu.memory_space<semaphore_mem>>
    %199 = tpu.memref_squeeze %198 : memref<1x1x!tpu.dma_semaphore, #tpu.memory_space<semaphore_mem>> -> memref<!tpu.dma_semaphore, #tpu.memory_space<semaphore_mem>>
    tpu.wait_dma2 semaphore(%199 : memref<!tpu.dma_semaphore, #tpu.memory_space<semaphore_mem>>) src(%196 : memref<1x32xf32, #tpu.memory_space<any>>) dst(%197 : memref<1x32xf32, #tpu.memory_space<vmem>>)
    %c0_i32_240 = arith.constant 0 : i32
    %200 = arith.cmpi eq, %arg0, %c0_i32_240 : i32
    %201 = arith.extui %200 : i1 to i32
    %c0_i32_241 = arith.constant 0 : i32
    %202 = arith.cmpi ne, %201, %c0_i32_241 : i32
    scf.if %202 {
      %cst_267 = arith.constant 0.000000e+00 : f32
      %271 = vector.broadcast %cst_267 : f32 to vector<1x1xf32>
      %c0_268 = arith.constant 0 : index
      %c0_269 = arith.constant 0 : index
      %272 = vector.load %arg22[%c0_268, %c0_269] : memref<1x1xf32, #tpu.memory_space<vmem>>, vector<1x1xf32>
      tpu.vector_store %arg22[%c0_268, %c0_269], %271 {strides = array<i32>} : memref<1x1xf32, #tpu.memory_space<vmem>>, vector<1x1xf32>,
    } else {
    }
    %c8_i32 = arith.constant 8 : i32
    %203 = arith.muli %0, %c8_i32 : i32
    %204 = tpu.assume_multiple %203, 8 : i32
    %205 = arith.index_cast %204 : i32 to index
    %c0 = arith.constant 0 : index
    %206 = vector.load %arg15[%205, %c0] : memref<16x32xf32, #tpu.memory_space<vmem>>, vector<8x32xf32>
    %207 = arith.index_cast %204 : i32 to index
    %c0_242 = arith.constant 0 : index
    %208 = vector.load %arg16[%207, %c0_242] : memref<16x32xf32, #tpu.memory_space<vmem>>, vector<8x32xf32>
    %209 = arith.index_cast %204 : i32 to index
    %c0_243 = arith.constant 0 : index
    %210 = vector.load %arg17[%209, %c0_243] : memref<16x32xf32, #tpu.memory_space<vmem>>, vector<8x32xf32>
    %211 = arith.index_cast %204 : i32 to index
    %c0_244 = arith.constant 0 : index
    %212 = vector.load %arg19[%211, %c0_244] : memref<16x32xf32, #tpu.memory_space<vmem>>, vector<8x32xf32>
    %213 = arith.subf %210, %212 : vector<8x32xf32>
    %214 = arith.index_cast %204 : i32 to index
    %c0_245 = arith.constant 0 : index
    %215 = vector.load %arg18[%214, %c0_245] : memref<16x32xf32, #tpu.memory_space<vmem>>, vector<8x32xf32>
    %216 = arith.index_cast %204 : i32 to index
    %c0_246 = arith.constant 0 : index
    %217 = vector.load %arg20[%216, %c0_246] : memref<16x32xf32, #tpu.memory_space<vmem>>, vector<8x32xf32>
    %218 = arith.subf %215, %217 : vector<8x32xf32>
    %219 = arith.mulf %206, %213 : vector<8x32xf32>
    %cst = arith.constant dense<0.000000e+00> : vector<8xf32>
    %220 = vector.multi_reduction <add>, %219, %cst [1] : vector<8x32xf32> to vector<8xf32>
    %221 = vector.shape_cast %220 : vector<8xf32> to vector<8x1xf32>
    %222 = arith.mulf %208, %218 : vector<8x32xf32>
    %cst_247 = arith.constant dense<0.000000e+00> : vector<8xf32>
    %223 = vector.multi_reduction <add>, %222, %cst_247 [1] : vector<8x32xf32> to vector<8xf32>
    %224 = vector.shape_cast %223 : vector<8xf32> to vector<8x1xf32>
    %225 = arith.addf %221, %224 : vector<8x1xf32>
    %c0_248 = arith.constant 0 : index
    %c0_249 = arith.constant 0 : index
    %226 = vector.load %arg4[%c0_248, %c0_249] : memref<8x1xf32, #tpu.memory_space<vmem>>, vector<8x1xf32>
    %c0_250 = arith.constant 0 : index
    %c0_251 = arith.constant 0 : index
    %227 = vector.load %arg5[%c0_250, %c0_251] : memref<8x1xf32, #tpu.memory_space<vmem>>, vector<8x1xf32>
    %cst_252 = arith.constant 0.000000e+00 : f32
    %228 = vector.broadcast %cst_252 : f32 to vector<8x1xf32>
    %229 = arith.minimumf %221, %228 : vector<8x1xf32>
    %230 = math.absf %221 : vector<8x1xf32>
    %cst_253 = arith.constant 0.000000e+00 : f32
    %231 = vector.broadcast %cst_253 : f32 to vector<8x1xf32>
    %232 = arith.subf %231, %230 : vector<8x1xf32>
    %233 = math.exp %232 : vector<8x1xf32>
    %234 = math.log1p %233 : vector<8x1xf32>
    %235 = arith.subf %229, %234 : vector<8x1xf32>
    %cst_254 = arith.constant 0.000000e+00 : f32
    %236 = vector.broadcast %cst_254 : f32 to vector<8x1xf32>
    %237 = arith.minimumf %224, %236 : vector<8x1xf32>
    %238 = math.absf %224 : vector<8x1xf32>
    %cst_255 = arith.constant 0.000000e+00 : f32
    %239 = vector.broadcast %cst_255 : f32 to vector<8x1xf32>
    %240 = arith.subf %239, %238 : vector<8x1xf32>
    %241 = math.exp %240 : vector<8x1xf32>
    %242 = math.log1p %241 : vector<8x1xf32>
    %243 = arith.subf %237, %242 : vector<8x1xf32>
    %cst_256 = arith.constant 0.000000e+00 : f32
    %244 = vector.broadcast %cst_256 : f32 to vector<8x1xf32>
    %245 = arith.minimumf %225, %244 : vector<8x1xf32>
    %246 = math.absf %225 : vector<8x1xf32>
    %cst_257 = arith.constant 0.000000e+00 : f32
    %247 = vector.broadcast %cst_257 : f32 to vector<8x1xf32>
    %248 = arith.subf %247, %246 : vector<8x1xf32>
    %249 = math.exp %248 : vector<8x1xf32>
    %250 = math.log1p %249 : vector<8x1xf32>
    %251 = arith.subf %245, %250 : vector<8x1xf32>
    %252 = arith.mulf %226, %224 : vector<8x1xf32>
    %253 = arith.mulf %227, %243 : vector<8x1xf32>
    %254 = arith.subf %252, %253 : vector<8x1xf32>
    %cst_258 = arith.constant 1.000000e-01 : f32
    %255 = vector.broadcast %cst_258 : f32 to vector<8x1xf32>
    %256 = arith.mulf %255, %254 : vector<8x1xf32>
    %257 = arith.mulf %226, %235 : vector<8x1xf32>
    %cst_259 = arith.constant 1.000000e-01 : f32
    %258 = vector.broadcast %cst_259 : f32 to vector<8x1xf32>
    %259 = arith.mulf %258, %257 : vector<8x1xf32>
    %260 = arith.subf %256, %259 : vector<8x1xf32>
    %261 = arith.mulf %227, %251 : vector<8x1xf32>
    %262 = arith.subf %260, %261 : vector<8x1xf32>
    %c0_260 = arith.constant 0 : index
    %c0_261 = arith.constant 0 : index
    %263 = vector.load %arg22[%c0_260, %c0_261] : memref<1x1xf32, #tpu.memory_space<vmem>>, vector<1x1xf32>
    %cst_262 = arith.constant dense<0.000000e+00> : vector<1xf32>
    %264 = vector.multi_reduction <add>, %262, %cst_262 [0] : vector<8x1xf32> to vector<1xf32>
    %265 = vector.shape_cast %264 : vector<1xf32> to vector<1x1xf32>
    %266 = arith.addf %263, %265 : vector<1x1xf32>
    %c0_263 = arith.constant 0 : index
    %c0_264 = arith.constant 0 : index
    %267 = vector.load %arg22[%c0_263, %c0_264] : memref<1x1xf32, #tpu.memory_space<vmem>>, vector<1x1xf32>
    tpu.vector_store %arg22[%c0_263, %c0_264], %266 {strides = array<i32>} : memref<1x1xf32, #tpu.memory_space<vmem>>, vector<1x1xf32>,
    %c3_i32_265 = arith.constant 3 : i32
    %268 = arith.cmpi eq, %arg0, %c3_i32_265 : i32
    %269 = arith.extui %268 : i1 to i32
    %c0_i32_266 = arith.constant 0 : i32
    %270 = arith.cmpi ne, %269, %c0_i32_266 : i32
    scf.if %270 {
      %c0_267 = arith.constant 0 : index
      %c0_268 = arith.constant 0 : index
      %271 = vector.load %arg10[%c0_267, %c0_268] : memref<48x32xf32, #tpu.memory_space<vmem>>, vector<48x32xf32>
      %c0_269 = arith.constant 0 : index
      %c0_270 = arith.constant 0 : index
      %272 = vector.load %arg11[%c0_269, %c0_270] : memref<48x32xf32, #tpu.memory_space<vmem>>, vector<48x32xf32>
      %273 = arith.subf %271, %272 : vector<48x32xf32>
      %c0_271 = arith.constant 0 : index
      %c0_272 = arith.constant 0 : index
      %274 = vector.load %arg12[%c0_271, %c0_272] : memref<32x32xf32, #tpu.memory_space<vmem>>, vector<32x32xf32>
      %c0_273 = arith.constant 0 : index
      %c0_274 = arith.constant 0 : index
      %275 = vector.load %arg13[%c0_273, %c0_274] : memref<32x32xf32, #tpu.memory_space<vmem>>, vector<32x32xf32>
      %276 = arith.subf %274, %275 : vector<32x32xf32>
      %277 = arith.mulf %273, %273 : vector<48x32xf32>
      %278 = vector.shape_cast %277 : vector<48x32xf32> to vector<1x48x32xf32>
      %cst_275 = arith.constant dense<0.000000e+00> : vector<1xf32>
      %279 = vector.multi_reduction <add>, %278, %cst_275 [1, 2] : vector<1x48x32xf32> to vector<1xf32>
      %280 = vector.shape_cast %279 : vector<1xf32> to vector<1x1x1xf32>
      %281 = vector.extract %280[0, 0, 0] : f32 from vector<1x1x1xf32>
      %282 = vector.broadcast %281 : f32 to vector<1x1xf32>
      %cst_276 = arith.constant 6.51041686E-4 : f32
      %283 = vector.broadcast %cst_276 : f32 to vector<1x1xf32>
      %284 = arith.mulf %282, %283 : vector<1x1xf32>
      %285 = arith.mulf %276, %276 : vector<32x32xf32>
      %286 = vector.shape_cast %285 : vector<32x32xf32> to vector<1x32x32xf32>
      %cst_277 = arith.constant dense<0.000000e+00> : vector<1xf32>
      %287 = vector.multi_reduction <add>, %286, %cst_277 [1, 2] : vector<1x32x32xf32> to vector<1xf32>
      %288 = vector.shape_cast %287 : vector<1xf32> to vector<1x1x1xf32>
      %289 = vector.extract %288[0, 0, 0] : f32 from vector<1x1x1xf32>
      %290 = vector.broadcast %289 : f32 to vector<1x1xf32>
      %cst_278 = arith.constant 0.00115740742 : f32
      %291 = vector.broadcast %cst_278 : f32 to vector<1x1xf32>
      %292 = arith.mulf %290, %291 : vector<1x1xf32>
      %293 = arith.addf %284, %292 : vector<1x1xf32>
      %c0_279 = arith.constant 0 : index
      %c0_280 = arith.constant 0 : index
      %294 = vector.load %arg22[%c0_279, %c0_280] : memref<1x1xf32, #tpu.memory_space<vmem>>, vector<1x1xf32>
      %cst_281 = arith.constant 3.125000e-02 : f32
      %295 = vector.broadcast %cst_281 : f32 to vector<1x1xf32>
      %296 = arith.mulf %294, %295 : vector<1x1xf32>
      %cst_282 = arith.constant 0.00999999977 : f32
      %297 = vector.broadcast %cst_282 : f32 to vector<1x1xf32>
      %298 = arith.mulf %297, %293 : vector<1x1xf32>
      %299 = arith.subf %296, %298 : vector<1x1xf32>
      %c0_283 = arith.constant 0 : index
      %c0_284 = arith.constant 0 : index
      %300 = vector.load %arg14[%c0_283, %c0_284] : memref<1x1xf32, #tpu.memory_space<vmem>>, vector<1x1xf32>
      tpu.vector_store %arg14[%c0_283, %c0_284], %299 {strides = array<i32>} : memref<1x1xf32, #tpu.memory_space<vmem>>, vector<1x1xf32>,
    } else {
    }
    return
  }
  func.func @transform_0(%arg0: i32, %arg1: memref<32xi32, #tpu.memory_space<smem>>, %arg2: memref<32xi32, #tpu.memory_space<smem>>, %arg3: memref<32xi32, #tpu.memory_space<smem>>) -> (i32, i32) {
    %c0_i32 = arith.constant 0 : i32
    %c0_i32_0 = arith.constant 0 : i32
    return %arg0, %c0_i32 : i32, i32
  }
  func.func @transform_1(%arg0: i32, %arg1: memref<32xi32, #tpu.memory_space<smem>>, %arg2: memref<32xi32, #tpu.memory_space<smem>>, %arg3: memref<32xi32, #tpu.memory_space<smem>>) -> (i32, i32) {
    %c0_i32 = arith.constant 0 : i32
    %c0_i32_0 = arith.constant 0 : i32
    return %arg0, %c0_i32 : i32, i32
  }
  func.func @transform_6(%arg0: i32, %arg1: memref<32xi32, #tpu.memory_space<smem>>, %arg2: memref<32xi32, #tpu.memory_space<smem>>, %arg3: memref<32xi32, #tpu.memory_space<smem>>) -> (i32, i32) {
    %c0_i32 = arith.constant 0 : i32
    %c0_i32_0 = arith.constant 0 : i32
    %c0_i32_1 = arith.constant 0 : i32
    return %c0_i32, %c0_i32_0 : i32, i32
  }
  func.func @transform_7(%arg0: i32, %arg1: memref<32xi32, #tpu.memory_space<smem>>, %arg2: memref<32xi32, #tpu.memory_space<smem>>, %arg3: memref<32xi32, #tpu.memory_space<smem>>) -> (i32, i32) {
    %c0_i32 = arith.constant 0 : i32
    %c0_i32_0 = arith.constant 0 : i32
    %c0_i32_1 = arith.constant 0 : i32
    return %c0_i32, %c0_i32_0 : i32, i32
  }
  func.func @transform_8(%arg0: i32, %arg1: memref<32xi32, #tpu.memory_space<smem>>, %arg2: memref<32xi32, #tpu.memory_space<smem>>, %arg3: memref<32xi32, #tpu.memory_space<smem>>) -> (i32, i32) {
    %c0_i32 = arith.constant 0 : i32
    %c0_i32_0 = arith.constant 0 : i32
    %c0_i32_1 = arith.constant 0 : i32
    return %c0_i32, %c0_i32_0 : i32, i32
  }
  func.func @transform_9(%arg0: i32, %arg1: memref<32xi32, #tpu.memory_space<smem>>, %arg2: memref<32xi32, #tpu.memory_space<smem>>, %arg3: memref<32xi32, #tpu.memory_space<smem>>) -> (i32, i32) {
    %c0_i32 = arith.constant 0 : i32
    %c0_i32_0 = arith.constant 0 : i32
    %c0_i32_1 = arith.constant 0 : i32
    return %c0_i32, %c0_i32_0 : i32, i32
  }
  func.func @transform_10(%arg0: i32, %arg1: memref<32xi32, #tpu.memory_space<smem>>, %arg2: memref<32xi32, #tpu.memory_space<smem>>, %arg3: memref<32xi32, #tpu.memory_space<smem>>) -> (i32, i32) {
    %c0_i32 = arith.constant 0 : i32
    %c0_i32_0 = arith.constant 0 : i32
    %c0_i32_1 = arith.constant 0 : i32
    return %c0_i32, %c0_i32_0 : i32, i32
  }
}

</mosaic_0001>

<bundles_post_ra>
// kernel: tpu_custom_call.1
= control target key start
LH: loop header
LB: loop body
LE: loop exit
PB: predicated region body
PF: predicated region fallthrough
CT: control target
= control target key end

     0   :  { %s7918_s0 = inlined_call_operand.vmem [shape: s32[32], index: 0, kind: input, shape index: {}]   ;;  %s7919_s3 = inlined_call_operand.vmem [shape: f32[32,1], index: 3, kind: input, shape index: {}]   ;;  %s7920_s4 = inlined_call_operand.vmem [shape: f32[32,1], index: 4, kind: input, shape index: {}]   ;;  %s7921_s5 = inlined_call_operand.vmem [shape: f32[50,32], index: 5, kind: input, shape index: {}]   ;;  %s7922_s6 = inlined_call_operand.vmem [shape: f32[50,32], index: 6, kind: input, shape index: {}]   ;;  %s7923_s7 = inlined_call_operand.vmem [shape: f32[100,32], index: 7, kind: input, shape index: {}]   ;;  %s7924_s8 = inlined_call_operand.vmem [shape: f32[100,32], index: 8, kind: input, shape index: {}]   ;;  %s7925_s9 = inlined_call_operand.vmem [shape: f32[48,32], index: 9, kind: input, shape index: {}]   ;;  %s7926_s10 = inlined_call_operand.vmem [shape: f32[48,32], index: 10, kind: input, shape index: {}]   ;;  %s7927_s11 = inlined_call_operand.vmem [shape: f32[32,32], index: 11, kind: input, shape index: {}]   ;;  %s7928_s12 = inlined_call_operand.vmem [shape: f32[32,32], index: 12, kind: input, shape index: {}]   ;;  %s7929_s13 = inlined_call_operand.hbm [shape: f32[1,1], index: 13, kind: output, shape index: {}]   ;;  %s7930_s1 = inlined_call_operand.vmem [shape: s32[32], index: 1, kind: input, shape index: {}]   ;;  %s7931_s2 = inlined_call_operand.vmem [shape: s32[32], index: 2, kind: input, shape index: {}]  }
   0x1   :  { %7938 = sst [smem:[#allocation123_spill]] %s7919_s3  ;;  %s18_s27 = sshll.u32 %s7918_s0, 4  ;;  %s19_s27 = int_to_ptr.vmem [resolvable:$true] %s18_s27 }
   0x2   :  { %7939 = sst [smem:[#allocation124_spill]] %s7920_s4  ;;  %s22_s30 = sshll.u32 %s7930_s1, 4  ;;  %s23_s30 = int_to_ptr.vmem [resolvable:$true] %s22_s30 }
   0x3   :  { %7940 = sst [smem:[#allocation125_spill]] %s7925_s9  ;;  %s7020_s14 = scalar_lea.vmem %s19_s27, 16 }
   0x4   :  { %7941 = sst [smem:[#allocation126_spill]] %s7926_s10  ;;  %p7021_p0 = scmp.ne.s32.totalorder %s19_s27, %s7020_s14 }
   0x5   :  { %7942 = sst [smem:[#allocation127_spill]] %s7927_s11  ;;  %p7025_p1 = scmp.lt.s32.totalorder %s19_s27, %s19_s27 }
   0x6   :  { %7943 = sst [smem:[#allocation128_spill]] %s7928_s12  ;;  %p7026_p2 = scmp.lt.s32.totalorder %s7020_s14, %s7020_s14 }
   0x7   :  { %7944 = sst [smem:[#allocation129_spill]] %s7929_s13 }
   0x8   :  { %p7027_p3 = por %p7026_p2, %p7025_p1 }
   0xa   :  { %p7028_p4 = pnand %p7027_p3, %p7021_p0 }
   0xc   :  { %7031 = shalt.err (!%p7028_p4)  }
   0xd   :  { %s7108_s15 = smov [#allocation11]   ;;  %s7032_s16 = scalar_lea.vmem %s23_s30, 16 }
   0xe   :  { %21 = dma.vmem_to_smem %s19_s27, 16, %s7108_s15, [#allocation10] }
   0xf   :  { %p7033_p5 = scmp.ne.s32.totalorder %s23_s30, %s7032_s16  ;;  %p7037_p6 = scmp.lt.s32.totalorder %s23_s30, %s23_s30 }
  0x10   :  { %p7038_p7 = scmp.lt.s32.totalorder %s7032_s16, %s7032_s16 }
  0x12   :  { %p7039_p8 = por %p7038_p7, %p7037_p6 }
  0x14   :  { %p7040_p9 = pnand %p7039_p8, %p7033_p5 }
  0x16   :  { %7043 = shalt.err (!%p7040_p9)  }
  0x17   :  { %s7109_s0 = smov [#allocation12]   ;;  %s26_s18 = sshll.u32 %s7931_s2, 4  ;;  %s27_s18 = int_to_ptr.vmem [resolvable:$true] %s26_s18 }
  0x18   :  { %25 = dma.vmem_to_smem %s23_s30, 16, %s7109_s0, [#allocation10] }
  0x19   :  { %s7044_s19 = scalar_lea.vmem %s27_s18, 16  ;;  %p7049_p11 = scmp.lt.s32.totalorder %s27_s18, %s27_s18 }
  0x1a   :  { %p7045_p10 = scmp.ne.s32.totalorder %s27_s18, %s7044_s19  ;;  %p7050_p12 = scmp.lt.s32.totalorder %s7044_s19, %s7044_s19 }
  0x1c   :  { %p7051_p13 = por %p7050_p12, %p7049_p11 }
  0x1e   :  { %p7052_p0 = pnand %p7051_p13, %p7045_p10 }
  0x20   :  { %7055 = shalt.err (!%p7052_p0)  }
  0x21   :  { %s7110_s20 = smov [#allocation13]  }
  0x22   :  { %29 = dma.vmem_to_smem %s27_s18, 16, %s7110_s20, [#allocation10] }
  0x23   :  { %7086 = dma.done.wait [#allocation10], 48 }
  0x24   :  { %7087 = vsyncadd [#allocation10], 4294967248 }
  0x25   :  { %31 = sfence }
  0x26   :  { %32 = vsyncpa [#allocation15], 0  ;;  %s7192_s21 = smov 0  }
  0x27 LB: > { %7945 = sst [smem:[#allocation120_spill]] %s7106_s21  ;;  %s7198_s2 = sadd.s32 4294967295, %s7106_s21   ;;  %s7106_s21 = sphi %s7192_s21, %s38_s21  }
  0x28   : > { %p6703_p1 = scmp.ge.s32.totalorder %s7106_s21, 1  ;;  %p237_p2 = scmp.lt.s32.totalorder %s7106_s21, 5 }
  0x2a   : > { %p238_p3 = pnand %p6703_p1, %p237_p2 }
  0x2c   : > { %241 = sbr.rel (%p238_p3) target bundleno = 932 (0x3a4), region = 44 }
  0x33   : > { %p265_p4 = scmp.lt.s32.totalorder %s7198_s2, 3  ;;  %s7204_s22 = sand.u32 1, %s7198_s2 }
  0x34   : > { %s7946_s3 = sld [smem:[#allocation123_spill]]  ;;  %s7948_s4 = sld [smem:[#allocation124_spill]] }
  0x35   : > { %s266_s23 = scalar_select %p265_p4, %s7198_s2, 3 }
  0x36   : > { %p6706_p5 = scmp.ne.s32.totalorder %s7198_s2, 0 }
  0x37   : > { %s6704_s24 = sshll.u32 %s266_s23, 3  ;;  %s7221_s14 = sshll.u32 (!%p6706_p5), %s7198_s2, 3 }
  0x38   : > { %277 = sbr.rel (%p6706_p5) target bundleno = 256 (0x100), region = 48  ;;  %s280_s15 = sld [smem:[#allocation11 + %s7221_s14]] (!%p6706_p5) }
  0x39   : > { %s281_s16 = sld [smem:[#allocation12 + %s7221_s14]] (!%p6706_p5)  ;;  %s7229_s1 = sshll.u32 (!%p6706_p5), %s7204_s22, 3 }
  0x3a   : > { %s7210_s27 = scalar_lea.vmem %s7946_s3, %s6704_s24  ;;  %s7215_s30 = scalar_lea.vmem %s7948_s4, %s6704_s24 }
  0x3b   : > { %7947 = sst [smem:[#allocation121_spill]] %s7210_s27  ;;  %s7235_s20 = scalar_lea.vmem (!%p6706_p5), [#allocation2], %s7229_s1 }
  0x3c   : > { %7949 = sst [smem:[#allocation122_spill]] %s7215_s30  ;;  %s7239_s23 = scalar_lea.sflag (!%p6706_p5), [#allocation8], %s7204_s22 }
  0x3d   : > { %s7226_s0 = sld [smem:[#allocation13 + %s7221_s14]] (!%p6706_p5) }
  0x3e   : > { %s283_s19 = scalar_lea.vmem (!%p6706_p5), %s7921_s5, %s280_s15 }
  0x3f   : > { %v303_v0 = vld [vmem:[%s283_s19] sm:$0x1] }
  0x40   : > { %304 = vst [vmem:[%s7235_s20] sm:$0x1] %v303_v0 }
  0x41   : > { %329 = vsyncadd %s7239_s23, 16  ;;  %s330_s26 = scalar_lea.vmem %s7922_s6, %s280_s15  ;;  %s7246_s28 = scalar_lea.sflag %s7239_s23, 2 [#allocation8] }
  0x42   : > { %v351_v1 = vld [vmem:[%s330_s26] sm:$0x1]  ;;  %s7249_s29 = scalar_lea.vmem [#allocation3], %s7229_s1 }
  0x43   : > { %352 = vst [vmem:[%s7249_s29] sm:$0x1] %v351_v1 }
  0x44   : > { %377 = vsyncadd %s7246_s28, 16  ;;  %s378_s19 = scalar_lea.vmem %s7923_s7, %s281_s16  ;;  %s7257_s3 = scalar_lea.sflag %s7239_s23, 4 [#allocation8] }
  0x45   : > { %v399_v2 = vld [vmem:[%s378_s19] sm:$0x1]  ;;  %s7260_s15 = scalar_lea.vmem [#allocation4], %s7229_s1 }
  0x46   : > { %400 = vst [vmem:[%s7260_s15] sm:$0x1] %v399_v2 }
  0x47   : > { %425 = vsyncadd %s7257_s3, 16  ;;  %s426_s26 = scalar_lea.vmem %s7924_s8, %s281_s16  ;;  %s7268_s4 = scalar_lea.sflag %s7239_s23, 6 [#allocation8] }
  0x48   : > { %v447_v3 = vld [vmem:[%s426_s26] sm:$0x1]  ;;  %s7271_s17 = scalar_lea.vmem [#allocation5], %s7229_s1 }
  0x49   : > { %448 = vst [vmem:[%s7271_s17] sm:$0x1] %v447_v3 }
  0x4a   : > { %473 = vsyncadd %s7268_s4, 16  ;;  %s474_s21 = scalar_lea.vmem %s7923_s7, %s7226_s0  ;;  %s7280_s24 = scalar_lea.sflag %s7239_s23, 8 [#allocation8] }
  0x4b   : > { %v495_v4 = vld [vmem:[%s474_s21] sm:$0x1]  ;;  %s7283_s16 = scalar_lea.vmem [#allocation6], %s7229_s1 }
  0x4c   : > { %496 = vst [vmem:[%s7283_s16] sm:$0x1] %v495_v4 }
  0x4d   : > { %521 = vsyncadd %s7280_s24, 16  ;;  %s522_s13 = scalar_lea.vmem %s7924_s8, %s7226_s0  ;;  %s7292_s18 = scalar_lea.sflag %s7239_s23, 10 [#allocation8] }
  0x4e   : > { %v543_v5 = vld [vmem:[%s522_s13] sm:$0x1]  ;;  %s7295_s19 = scalar_lea.vmem [#allocation7], %s7229_s1 }
  0x4f   : > { %544 = vst [vmem:[%s7295_s19] sm:$0x1] %v543_v5 }
  0x50   : > { %569 = vsyncadd %s7292_s18, 16  ;;  %s570_s21 = sadd.s32 1, %s7221_s14 }
  0x51   : > { %s571_s12 = sld [smem:[#allocation11 + %s570_s21]] }
  0x52   : > { %s572_s11 = sld [smem:[#allocation12 + %s570_s21]] }
  0x53   : > { %s573_s10 = sld [smem:[#allocation13 + %s570_s21]] }
  0x57   : > { %s575_s0 = scalar_lea.vmem %s7921_s5, %s571_s12 }
  0x58   : > { %v594_v6 = vld [vmem:[%s575_s0] sm:$0x1] }
  0x59   : > { %6711 = vst [vmem:[%s7235_s20 + $0x1] sm:$0x1] %v594_v6 }
  0x5a   : > { %620 = vsyncadd %s7239_s23, 16  ;;  %s621_s9 = scalar_lea.vmem %s7922_s6, %s571_s12 }
  0x5b   : > { %v640_v7 = vld [vmem:[%s621_s9] sm:$0x1] }
  0x5c   : > { %6714 = vst [vmem:[%s7249_s29 + $0x1] sm:$0x1] %v640_v7 }
  0x5d   : > { %666 = vsyncadd %s7246_s28, 16  ;;  %s667_s21 = scalar_lea.vmem %s7923_s7, %s572_s11 }
  0x5e   : > { %v686_v8 = vld [vmem:[%s667_s21] sm:$0x1] }
  0x5f   : > { %6717 = vst [vmem:[%s7260_s15 + $0x1] sm:$0x1] %v686_v8 }
  0x60   : > { %712 = vsyncadd %s7257_s3, 16  ;;  %s713_s0 = scalar_lea.vmem %s7924_s8, %s572_s11 }
  0x61   : > { %v732_v9 = vld [vmem:[%s713_s0] sm:$0x1] }
  0x62   : > { %6720 = vst [vmem:[%s7271_s17 + $0x1] sm:$0x1] %v732_v9 }
  0x63   : > { %758 = vsyncadd %s7268_s4, 16  ;;  %s759_s27 = scalar_lea.vmem %s7923_s7, %s573_s10 }
  0x64   : > { %v778_v10 = vld [vmem:[%s759_s27] sm:$0x1] }
  0x65   : > { %6723 = vst [vmem:[%s7283_s16 + $0x1] sm:$0x1] %v778_v10 }
  0x66   : > { %804 = vsyncadd %s7280_s24, 16  ;;  %s805_s1 = scalar_lea.vmem %s7924_s8, %s573_s10 }
  0x67   : > { %v824_v11 = vld [vmem:[%s805_s1] sm:$0x1] }
  0x68   : > { %6726 = vst [vmem:[%s7295_s19 + $0x1] sm:$0x1] %v824_v11 }
  0x69   : > { %850 = vsyncadd %s7292_s18, 16  ;;  %s851_s11 = sadd.s32 2, %s7221_s14 }
  0x6a   : > { %s852_s21 = sld [smem:[#allocation11 + %s851_s11]] }
  0x6b   : > { %s853_s25 = sld [smem:[#allocation12 + %s851_s11]] }
  0x6c   : > { %s854_s26 = sld [smem:[#allocation13 + %s851_s11]] }
  0x70   : > { %s856_s12 = scalar_lea.vmem %s7921_s5, %s852_s21 }
  0x71   : > { %v875_v12 = vld [vmem:[%s856_s12] sm:$0x1] }
  0x72   : > { %6729 = vst [vmem:[%s7235_s20 + $0x2] sm:$0x1] %v875_v12 }
  0x73   : > { %901 = vsyncadd %s7239_s23, 16  ;;  %s902_s10 = scalar_lea.vmem %s7922_s6, %s852_s21 }
  0x74   : > { %v921_v13 = vld [vmem:[%s902_s10] sm:$0x1] }
  0x75   : > { %6732 = vst [vmem:[%s7249_s29 + $0x2] sm:$0x1] %v921_v13 }
  0x76   : > { %947 = vsyncadd %s7246_s28, 16  ;;  %s948_s11 = scalar_lea.vmem %s7923_s7, %s853_s25 }
  0x77   : > { %v967_v14 = vld [vmem:[%s948_s11] sm:$0x1] }
  0x78   : > { %6735 = vst [vmem:[%s7260_s15 + $0x2] sm:$0x1] %v967_v14 }
  0x79   : > { %993 = vsyncadd %s7257_s3, 16  ;;  %s994_s12 = scalar_lea.vmem %s7924_s8, %s853_s25 }
  0x7a   : > { %v1013_v15 = vld [vmem:[%s994_s12] sm:$0x1] }
  0x7b   : > { %6738 = vst [vmem:[%s7271_s17 + $0x2] sm:$0x1] %v1013_v15 }
  0x7c   : > { %1039 = vsyncadd %s7268_s4, 16  ;;  %s1040_s30 = scalar_lea.vmem %s7923_s7, %s854_s26 }
  0x7d   : > { %v1059_v16 = vld [vmem:[%s1040_s30] sm:$0x1] }
  0x7e   : > { %6741 = vst [vmem:[%s7283_s16 + $0x2] sm:$0x1] %v1059_v16 }
  0x7f   : > { %1085 = vsyncadd %s7280_s24, 16  ;;  %s1086_s1 = scalar_lea.vmem %s7924_s8, %s854_s26 }
  0x80   : > { %v1105_v17 = vld [vmem:[%s1086_s1] sm:$0x1] }
  0x81   : > { %6744 = vst [vmem:[%s7295_s19 + $0x2] sm:$0x1] %v1105_v17 }
  0x82   : > { %1131 = vsyncadd %s7292_s18, 16  ;;  %s1132_s25 = sadd.s32 3, %s7221_s14 }
  0x83   : > { %s1133_s11 = sld [smem:[#allocation11 + %s1132_s25]] }
  0x84   : > { %s1134_s0 = sld [smem:[#allocation12 + %s1132_s25]] }
  0x85   : > { %s1135_s9 = sld [smem:[#allocation13 + %s1132_s25]] }
  0x89   : > { %s1137_s27 = scalar_lea.vmem %s7921_s5, %s1133_s11 }
  0x8a   : > { %v1156_v18 = vld [vmem:[%s1137_s27] sm:$0x1] }
  0x8b   : > { %6747 = vst [vmem:[%s7235_s20 + $0x3] sm:$0x1] %v1156_v18 }
  0x8c   : > { %1182 = vsyncadd %s7239_s23, 16  ;;  %s1183_s26 = scalar_lea.vmem %s7922_s6, %s1133_s11 }
  0x8d   : > { %v1202_v19 = vld [vmem:[%s1183_s26] sm:$0x1] }
  0x8e   : > { %6750 = vst [vmem:[%s7249_s29 + $0x3] sm:$0x1] %v1202_v19 }
  0x8f   : > { %1228 = vsyncadd %s7246_s28, 16  ;;  %s1229_s25 = scalar_lea.vmem %s7923_s7, %s1134_s0 }
  0x90   : > { %v1248_v20 = vld [vmem:[%s1229_s25] sm:$0x1] }
  0x91   : > { %6753 = vst [vmem:[%s7260_s15 + $0x3] sm:$0x1] %v1248_v20 }
  0x92   : > { %1274 = vsyncadd %s7257_s3, 16  ;;  %s1275_s27 = scalar_lea.vmem %s7924_s8, %s1134_s0 }
  0x93   : > { %v1294_v21 = vld [vmem:[%s1275_s27] sm:$0x1] }
  0x94   : > { %6756 = vst [vmem:[%s7271_s17 + $0x3] sm:$0x1] %v1294_v21 }
  0x95   : > { %1320 = vsyncadd %s7268_s4, 16  ;;  %s1321_s10 = scalar_lea.vmem %s7923_s7, %s1135_s9 }
  0x96   : > { %v1340_v22 = vld [vmem:[%s1321_s10] sm:$0x1] }
  0x97   : > { %6759 = vst [vmem:[%s7283_s16 + $0x3] sm:$0x1] %v1340_v22 }
  0x98   : > { %1366 = vsyncadd %s7280_s24, 16  ;;  %s1367_s1 = scalar_lea.vmem %s7924_s8, %s1135_s9 }
  0x99   : > { %v1386_v23 = vld [vmem:[%s1367_s1] sm:$0x1] }
  0x9a   : > { %6762 = vst [vmem:[%s7295_s19 + $0x3] sm:$0x1] %v1386_v23 }
  0x9b   : > { %1412 = vsyncadd %s7292_s18, 16  ;;  %s1413_s0 = sadd.s32 4, %s7221_s14 }
  0x9c   : > { %s1414_s25 = sld [smem:[#allocation11 + %s1413_s0]] }
  0x9d   : > { %s1415_s12 = sld [smem:[#allocation12 + %s1413_s0]] }
  0x9e   : > { %s1416_s21 = sld [smem:[#allocation13 + %s1413_s0]] }
  0xa2   : > { %s1418_s30 = scalar_lea.vmem %s7921_s5, %s1414_s25 }
  0xa3   : > { %v1437_v24 = vld [vmem:[%s1418_s30] sm:$0x1] }
  0xa4   : > { %6765 = vst [vmem:[%s7235_s20 + $0x4] sm:$0x1] %v1437_v24 }
  0xa5   : > { %1463 = vsyncadd %s7239_s23, 16  ;;  %s1464_s9 = scalar_lea.vmem %s7922_s6, %s1414_s25 }
  0xa6   : > { %v1483_v25 = vld [vmem:[%s1464_s9] sm:$0x1] }
  0xa7   : > { %6768 = vst [vmem:[%s7249_s29 + $0x4] sm:$0x1] %v1483_v25 }
  0xa8   : > { %1509 = vsyncadd %s7246_s28, 16  ;;  %s1510_s0 = scalar_lea.vmem %s7923_s7, %s1415_s12 }
  0xa9   : > { %v1529_v26 = vld [vmem:[%s1510_s0] sm:$0x1] }
  0xaa   : > { %6771 = vst [vmem:[%s7260_s15 + $0x4] sm:$0x1] %v1529_v26 }
  0xab   : > { %1555 = vsyncadd %s7257_s3, 16  ;;  %s1556_s30 = scalar_lea.vmem %s7924_s8, %s1415_s12 }
  0xac   : > { %v1575_v27 = vld [vmem:[%s1556_s30] sm:$0x1] }
  0xad   : > { %6774 = vst [vmem:[%s7271_s17 + $0x4] sm:$0x1] %v1575_v27 }
  0xae   : > { %1601 = vsyncadd %s7268_s4, 16  ;;  %s1602_s26 = scalar_lea.vmem %s7923_s7, %s1416_s21 }
  0xaf   : > { %v1621_v28 = vld [vmem:[%s1602_s26] sm:$0x1] }
  0xb0   : > { %6777 = vst [vmem:[%s7283_s16 + $0x4] sm:$0x1] %v1621_v28 }
  0xb1   : > { %1647 = vsyncadd %s7280_s24, 16  ;;  %s1648_s1 = scalar_lea.vmem %s7924_s8, %s1416_s21 }
  0xb2   : > { %v1667_v29 = vld [vmem:[%s1648_s1] sm:$0x1] }
  0xb3   : > { %6780 = vst [vmem:[%s7295_s19 + $0x4] sm:$0x1] %v1667_v29 }
  0xb4   : > { %1693 = vsyncadd %s7292_s18, 16  ;;  %s1694_s12 = sadd.s32 5, %s7221_s14 }
  0xb5   : > { %s1695_s0 = sld [smem:[#allocation11 + %s1694_s12]] }
  0xb6   : > { %s1696_s27 = sld [smem:[#allocation12 + %s1694_s12]] }
  0xb7   : > { %s1697_s11 = sld [smem:[#allocation13 + %s1694_s12]] }
  0xbb   : > { %s1699_s10 = scalar_lea.vmem %s7921_s5, %s1695_s0 }
  0xbc   : > { %v1718_v30 = vld [vmem:[%s1699_s10] sm:$0x1] }
  0xbd   : > { %6783 = vst [vmem:[%s7235_s20 + $0x5] sm:$0x1] %v1718_v30 }
  0xbe   : > { %1744 = vsyncadd %s7239_s23, 16  ;;  %s1745_s21 = scalar_lea.vmem %s7922_s6, %s1695_s0 }
  0xbf   : > { %v1764_v31 = vld [vmem:[%s1745_s21] sm:$0x1] }
  0xc0   : > { %6786 = vst [vmem:[%s7249_s29 + $0x5] sm:$0x1] %v1764_v31 }
  0xc1   : > { %1790 = vsyncadd %s7246_s28, 16  ;;  %s1791_s12 = scalar_lea.vmem %s7923_s7, %s1696_s27 }
  0xc2   : > { %v1810_v32 = vld [vmem:[%s1791_s12] sm:$0x1] }
  0xc3   : > { %6789 = vst [vmem:[%s7260_s15 + $0x5] sm:$0x1] %v1810_v32 }
  0xc4   : > { %1836 = vsyncadd %s7257_s3, 16  ;;  %s1837_s10 = scalar_lea.vmem %s7924_s8, %s1696_s27 }
  0xc5   : > { %v1856_v33 = vld [vmem:[%s1837_s10] sm:$0x1] }
  0xc6   : > { %6792 = vst [vmem:[%s7271_s17 + $0x5] sm:$0x1] %v1856_v33 }
  0xc7   : > { %1882 = vsyncadd %s7268_s4, 16  ;;  %s1883_s9 = scalar_lea.vmem %s7923_s7, %s1697_s11 }
  0xc8   : > { %v1902_v34 = vld [vmem:[%s1883_s9] sm:$0x1] }
  0xc9   : > { %6795 = vst [vmem:[%s7283_s16 + $0x5] sm:$0x1] %v1902_v34 }
  0xca   : > { %1928 = vsyncadd %s7280_s24, 16  ;;  %s1929_s1 = scalar_lea.vmem %s7924_s8, %s1697_s11 }
  0xcb   : > { %v1948_v35 = vld [vmem:[%s1929_s1] sm:$0x1] }
  0xcc   : > { %6798 = vst [vmem:[%s7295_s19 + $0x5] sm:$0x1] %v1948_v35 }
  0xcd   : > { %1974 = vsyncadd %s7292_s18, 16  ;;  %s1975_s27 = sadd.s32 6, %s7221_s14 }
  0xce   : > { %s1976_s12 = sld [smem:[#allocation11 + %s1975_s27]] }
  0xcf   : > { %s1977_s30 = sld [smem:[#allocation12 + %s1975_s27]] }
  0xd0   : > { %s1978_s25 = sld [smem:[#allocation13 + %s1975_s27]] }
  0xd4   : > { %s1980_s26 = scalar_lea.vmem %s7921_s5, %s1976_s12 }
  0xd5   : > { %v1999_v36 = vld [vmem:[%s1980_s26] sm:$0x1] }
  0xd6   : > { %6801 = vst [vmem:[%s7235_s20 + $0x6] sm:$0x1] %v1999_v36 }
  0xd7   : > { %2025 = vsyncadd %s7239_s23, 16  ;;  %s2026_s11 = scalar_lea.vmem %s7922_s6, %s1976_s12 }
  0xd8   : > { %v2045_v37 = vld [vmem:[%s2026_s11] sm:$0x1] }
  0xd9   : > { %6804 = vst [vmem:[%s7249_s29 + $0x6] sm:$0x1] %v2045_v37 }
  0xda   : > { %2071 = vsyncadd %s7246_s28, 16  ;;  %s2072_s27 = scalar_lea.vmem %s7923_s7, %s1977_s30 }
  0xdb   : > { %v2091_v38 = vld [vmem:[%s2072_s27] sm:$0x1] }
  0xdc   : > { %6807 = vst [vmem:[%s7260_s15 + $0x6] sm:$0x1] %v2091_v38 }
  0xdd   : > { %2117 = vsyncadd %s7257_s3, 16  ;;  %s2118_s26 = scalar_lea.vmem %s7924_s8, %s1977_s30 }
  0xde   : > { %v2137_v39 = vld [vmem:[%s2118_s26] sm:$0x1] }
  0xdf   : > { %6810 = vst [vmem:[%s7271_s17 + $0x6] sm:$0x1] %v2137_v39 }
  0xe0   : > { %2163 = vsyncadd %s7268_s4, 16  ;;  %s2164_s21 = scalar_lea.vmem %s7923_s7, %s1978_s25 }
  0xe1   : > { %v2183_v40 = vld [vmem:[%s2164_s21] sm:$0x1] }
  0xe2   : > { %6813 = vst [vmem:[%s7283_s16 + $0x6] sm:$0x1] %v2183_v40 }
  0xe3   : > { %2209 = vsyncadd %s7280_s24, 16  ;;  %s2210_s1 = scalar_lea.vmem %s7924_s8, %s1978_s25 }
  0xe4   : > { %v2229_v41 = vld [vmem:[%s2210_s1] sm:$0x1] }
  0xe5   : > { %6816 = vst [vmem:[%s7295_s19 + $0x6] sm:$0x1] %v2229_v41 }
  0xe6   : > { %2255 = vsyncadd %s7292_s18, 16  ;;  %s2256_s30 = sadd.s32 7, %s7221_s14 }
  0xe7   : > { %s2257_s27 = sld [smem:[#allocation11 + %s2256_s30]] }
  0xe8   : > { %s2258_s10 = sld [smem:[#allocation12 + %s2256_s30]] }
  0xe9   : > { %s2259_s0 = sld [smem:[#allocation13 + %s2256_s30]] }
  0xed   : > { %s2261_s9 = scalar_lea.vmem %s7921_s5, %s2257_s27 }
  0xee   : > { %v2280_v42 = vld [vmem:[%s2261_s9] sm:$0x1] }
  0xef   : > { %6819 = vst [vmem:[%s7235_s20 + $0x7] sm:$0x1] %v2280_v42 }
  0xf0   : > { %2306 = vsyncadd %s7239_s23, 16  ;;  %s2307_s25 = scalar_lea.vmem %s7922_s6, %s2257_s27 }
  0xf1   : > { %v2326_v43 = vld [vmem:[%s2307_s25] sm:$0x1] }
  0xf2   : > { %6822 = vst [vmem:[%s7249_s29 + $0x7] sm:$0x1] %v2326_v43 }
  0xf3   : > { %2352 = vsyncadd %s7246_s28, 16  ;;  %s2353_s1 = scalar_lea.vmem %s7923_s7, %s2258_s10 }
  0xf4   : > { %v2372_v44 = vld [vmem:[%s2353_s1] sm:$0x1] }
  0xf5   : > { %6825 = vst [vmem:[%s7260_s15 + $0x7] sm:$0x1] %v2372_v44 }
  0xf6   : > { %2398 = vsyncadd %s7257_s3, 16  ;;  %s2399_s30 = scalar_lea.vmem %s7924_s8, %s2258_s10 }
  0xf7   : > { %v2418_v45 = vld [vmem:[%s2399_s30] sm:$0x1] }
  0xf8   : > { %6828 = vst [vmem:[%s7271_s17 + $0x7] sm:$0x1] %v2418_v45 }
  0xf9   : > { %2444 = vsyncadd %s7268_s4, 16  ;;  %s2445_s27 = scalar_lea.vmem %s7923_s7, %s2259_s0 }
  0xfa   : > { %v2464_v46 = vld [vmem:[%s2445_s27] sm:$0x1] }
  0xfb   : > { %6831 = vst [vmem:[%s7283_s16 + $0x7] sm:$0x1] %v2464_v46 }
  0xfc   : > { %2490 = vsyncadd %s7280_s24, 16  ;;  %s2491_s26 = scalar_lea.vmem %s7924_s8, %s2259_s0 }
  0xfd   : > { %v2510_v47 = vld [vmem:[%s2491_s26] sm:$0x1] }
  0xfe   : > { %6834 = vst [vmem:[%s7295_s19 + $0x7] sm:$0x1] %v2510_v47 }
  0xff   : > { %2536 = vsyncadd %s7292_s18, 16 }
 0x100 PF: > { %s2537_s4 = sadd.s32 1, %s7198_s2 }
 0x101   : > { %p6835_p6 = scmp.ge.s32.totalorder %s2537_s4, 4 }
 0x102   : > { %s6983_s17 = sshll.u32 (!%p6835_p6), %s7198_s2, 3  ;;  %s2542_s10 = sand.u32 (!%p6835_p6), 1, %s2537_s4 }
 0x103   : > { %2541 = sbr.rel (%p6835_p6) target bundleno = 460 (0x1cc), region = 1492  ;;  %s7518_s12 = sadd.s32 (!%p6835_p6), 8, %s6983_s17 }
 0x104   : > { %s2545_s24 = sld [smem:[#allocation11 + %s7518_s12]] (!%p6835_p6)  ;;  %s7525_s0 = sshll.u32 (!%p6835_p6), %s2542_s10, 3 }
 0x105   : > { %s2546_s16 = sld [smem:[#allocation12 + %s7518_s12]] (!%p6835_p6)  ;;  %s7531_s11 = scalar_lea.vmem (!%p6835_p6), [#allocation2], %s7525_s0 }
 0x106   : > { %s7523_s9 = sld [smem:[#allocation13 + %s7518_s12]] (!%p6835_p6)  ;;  %s7534_s25 = scalar_lea.sflag (!%p6835_p6), [#allocation8], %s2542_s10 }
 0x10a   : > { %s2548_s21 = scalar_lea.vmem %s7921_s5, %s2545_s24 }
 0x10b   : > { %v2568_v48 = vld [vmem:[%s2548_s21] sm:$0x1] }
 0x10c   : > { %2569 = vst [vmem:[%s7531_s11] sm:$0x1] %v2568_v48 }
 0x10d   : > { %2594 = vsyncadd %s7534_s25, 16  ;;  %s2595_s1 = scalar_lea.vmem %s7922_s6, %s2545_s24  ;;  %s7541_s20 = scalar_lea.sflag %s7534_s25, 2 [#allocation8] }
 0x10e   : > { %v2616_v49 = vld [vmem:[%s2595_s1] sm:$0x1]  ;;  %s7544_s23 = scalar_lea.vmem [#allocation3], %s7525_s0 }
 0x10f   : > { %2617 = vst [vmem:[%s7544_s23] sm:$0x1] %v2616_v49 }
 0x110   : > { %2642 = vsyncadd %s7541_s20, 16  ;;  %s2643_s28 = scalar_lea.vmem %s7923_s7, %s2546_s16  ;;  %s7552_s27 = scalar_lea.sflag %s7534_s25, 4 [#allocation8] }
 0x111   : > { %v2664_v50 = vld [vmem:[%s2643_s28] sm:$0x1]  ;;  %s7555_s15 = scalar_lea.vmem [#allocation4], %s7525_s0 }
 0x112   : > { %2665 = vst [vmem:[%s7555_s15] sm:$0x1] %v2664_v50 }
 0x113   : > { %2690 = vsyncadd %s7552_s27, 16  ;;  %s2691_s4 = scalar_lea.vmem %s7924_s8, %s2546_s16  ;;  %s7563_s17 = scalar_lea.sflag %s7534_s25, 6 [#allocation8] }
 0x114   : > { %v2712_v51 = vld [vmem:[%s2691_s4] sm:$0x1]  ;;  %s7566_s10 = scalar_lea.vmem [#allocation5], %s7525_s0 }
 0x115   : > { %2713 = vst [vmem:[%s7566_s10] sm:$0x1] %v2712_v51 }
 0x116   : > { %2738 = vsyncadd %s7563_s17, 16  ;;  %s2739_s19 = scalar_lea.vmem %s7923_s7, %s7523_s9  ;;  %s7575_s21 = scalar_lea.sflag %s7534_s25, 8 [#allocation8] }
 0x117   : > { %v2760_v52 = vld [vmem:[%s2739_s19] sm:$0x1]  ;;  %s7578_s16 = scalar_lea.vmem [#allocation6], %s7525_s0 }
 0x118   : > { %2761 = vst [vmem:[%s7578_s16] sm:$0x1] %v2760_v52 }
 0x119   : > { %2786 = vsyncadd %s7575_s21, 16  ;;  %s2787_s1 = scalar_lea.vmem %s7924_s8, %s7523_s9  ;;  %s7587_s30 = scalar_lea.sflag %s7534_s25, 10 [#allocation8] }
 0x11a   : > { %v2808_v53 = vld [vmem:[%s2787_s1] sm:$0x1]  ;;  %s7590_s29 = scalar_lea.vmem [#allocation7], %s7525_s0 }
 0x11b   : > { %2809 = vst [vmem:[%s7590_s29] sm:$0x1] %v2808_v53 }
 0x11c   : > { %2834 = vsyncadd %s7587_s30, 16  ;;  %s2835_s28 = sadd.s32 1, %s7518_s12 }
 0x11d   : > { %s2836_s3 = sld [smem:[#allocation11 + %s2835_s28]] }
 0x11e   : > { %s2837_s26 = sld [smem:[#allocation12 + %s2835_s28]] }
 0x11f   : > { %s2838_s4 = sld [smem:[#allocation13 + %s2835_s28]] }
 0x123   : > { %s2840_s9 = scalar_lea.vmem %s7921_s5, %s2836_s3 }
 0x124   : > { %v2859_v54 = vld [vmem:[%s2840_s9] sm:$0x1] }
 0x125   : > { %6840 = vst [vmem:[%s7531_s11 + $0x1] sm:$0x1] %v2859_v54 }
 0x126   : > { %2885 = vsyncadd %s7534_s25, 16  ;;  %s2886_s14 = scalar_lea.vmem %s7922_s6, %s2836_s3 }
 0x127   : > { %v2905_v55 = vld [vmem:[%s2886_s14] sm:$0x1] }
 0x128   : > { %6843 = vst [vmem:[%s7544_s23 + $0x1] sm:$0x1] %v2905_v55 }
 0x129   : > { %2931 = vsyncadd %s7541_s20, 16  ;;  %s2932_s28 = scalar_lea.vmem %s7923_s7, %s2837_s26 }
 0x12a   : > { %v2951_v56 = vld [vmem:[%s2932_s28] sm:$0x1] }
 0x12b   : > { %6846 = vst [vmem:[%s7555_s15 + $0x1] sm:$0x1] %v2951_v56 }
 0x12c   : > { %2977 = vsyncadd %s7552_s27, 16  ;;  %s2978_s9 = scalar_lea.vmem %s7924_s8, %s2837_s26 }
 0x12d   : > { %v2997_v57 = vld [vmem:[%s2978_s9] sm:$0x1] }
 0x12e   : > { %6849 = vst [vmem:[%s7566_s10 + $0x1] sm:$0x1] %v2997_v57 }
 0x12f   : > { %3023 = vsyncadd %s7563_s17, 16  ;;  %s3024_s0 = scalar_lea.vmem %s7923_s7, %s2838_s4 }
 0x130   : > { %v3043_v58 = vld [vmem:[%s3024_s0] sm:$0x1] }
 0x131   : > { %6852 = vst [vmem:[%s7578_s16 + $0x1] sm:$0x1] %v3043_v58 }
 0x132   : > { %3069 = vsyncadd %s7575_s21, 16  ;;  %s3070_s1 = scalar_lea.vmem %s7924_s8, %s2838_s4 }
 0x133   : > { %v3089_v59 = vld [vmem:[%s3070_s1] sm:$0x1] }
 0x134   : > { %6855 = vst [vmem:[%s7590_s29 + $0x1] sm:$0x1] %v3089_v59 }
 0x135   : > { %3115 = vsyncadd %s7587_s30, 16  ;;  %s3116_s26 = sadd.s32 2, %s7518_s12 }
 0x136   : > { %s3117_s28 = sld [smem:[#allocation11 + %s3116_s26]] }
 0x137   : > { %s3118_s24 = sld [smem:[#allocation12 + %s3116_s26]] }
 0x138   : > { %s3119_s18 = sld [smem:[#allocation13 + %s3116_s26]] }
 0x13c   : > { %s3121_s19 = scalar_lea.vmem %s7921_s5, %s3117_s28 }
 0x13d   : > { %v3140_v60 = vld [vmem:[%s3121_s19] sm:$0x1] }
 0x13e   : > { %6858 = vst [vmem:[%s7531_s11 + $0x2] sm:$0x1] %v3140_v60 }
 0x13f   : > { %3166 = vsyncadd %s7534_s25, 16  ;;  %s3167_s4 = scalar_lea.vmem %s7922_s6, %s3117_s28 }
 0x140   : > { %v3186_v61 = vld [vmem:[%s3167_s4] sm:$0x1] }
 0x141   : > { %6861 = vst [vmem:[%s7544_s23 + $0x2] sm:$0x1] %v3186_v61 }
 0x142   : > { %3212 = vsyncadd %s7541_s20, 16  ;;  %s3213_s26 = scalar_lea.vmem %s7923_s7, %s3118_s24 }
 0x143   : > { %v3232_v62 = vld [vmem:[%s3213_s26] sm:$0x1] }
 0x144   : > { %6864 = vst [vmem:[%s7555_s15 + $0x2] sm:$0x1] %v3232_v62 }
 0x145   : > { %3258 = vsyncadd %s7552_s27, 16  ;;  %s3259_s19 = scalar_lea.vmem %s7924_s8, %s3118_s24 }
 0x146   : > { %v3278_v63 = vld [vmem:[%s3259_s19] sm:$0x1] }
 0x147   : > { %6867 = vst [vmem:[%s7566_s10 + $0x2] sm:$0x1] %v3278_v63 }
 0x148   : > { %3304 = vsyncadd %s7563_s17, 16  ;;  %s3305_s14 = scalar_lea.vmem %s7923_s7, %s3119_s18 }
 0x149   : > { %v3324_v0 = vld [vmem:[%s3305_s14] sm:$0x1] }
 0x14a   : > { %6870 = vst [vmem:[%s7578_s16 + $0x2] sm:$0x1] %v3324_v0 }
 0x14b   : > { %3350 = vsyncadd %s7575_s21, 16  ;;  %s3351_s1 = scalar_lea.vmem %s7924_s8, %s3119_s18 }
 0x14c   : > { %v3370_v1 = vld [vmem:[%s3351_s1] sm:$0x1] }
 0x14d   : > { %6873 = vst [vmem:[%s7590_s29 + $0x2] sm:$0x1] %v3370_v1 }
 0x14e   : > { %3396 = vsyncadd %s7587_s30, 16  ;;  %s3397_s24 = sadd.s32 3, %s7518_s12 }
 0x14f   : > { %s3398_s26 = sld [smem:[#allocation11 + %s3397_s24]] }
 0x150   : > { %s3399_s9 = sld [smem:[#allocation12 + %s3397_s24]] }
 0x151   : > { %s3400_s3 = sld [smem:[#allocation13 + %s3397_s24]] }
 0x155   : > { %s3402_s0 = scalar_lea.vmem %s7921_s5, %s3398_s26 }
 0x156   : > { %v3421_v2 = vld [vmem:[%s3402_s0] sm:$0x1] }
 0x157   : > { %6876 = vst [vmem:[%s7531_s11 + $0x3] sm:$0x1] %v3421_v2 }
 0x158   : > { %3447 = vsyncadd %s7534_s25, 16  ;;  %s3448_s18 = scalar_lea.vmem %s7922_s6, %s3398_s26 }
 0x159   : > { %v3467_v3 = vld [vmem:[%s3448_s18] sm:$0x1] }
 0x15a   : > { %6879 = vst [vmem:[%s7544_s23 + $0x3] sm:$0x1] %v3467_v3 }
 0x15b   : > { %3493 = vsyncadd %s7541_s20, 16  ;;  %s3494_s24 = scalar_lea.vmem %s7923_s7, %s3399_s9 }
 0x15c   : > { %v3513_v4 = vld [vmem:[%s3494_s24] sm:$0x1] }
 0x15d   : > { %6882 = vst [vmem:[%s7555_s15 + $0x3] sm:$0x1] %v3513_v4 }
 0x15e   : > { %3539 = vsyncadd %s7552_s27, 16  ;;  %s3540_s0 = scalar_lea.vmem %s7924_s8, %s3399_s9 }
 0x15f   : > { %v3559_v5 = vld [vmem:[%s3540_s0] sm:$0x1] }
 0x160   : > { %6885 = vst [vmem:[%s7566_s10 + $0x3] sm:$0x1] %v3559_v5 }
 0x161   : > { %3585 = vsyncadd %s7563_s17, 16  ;;  %s3586_s4 = scalar_lea.vmem %s7923_s7, %s3400_s3 }
 0x162   : > { %v3605_v6 = vld [vmem:[%s3586_s4] sm:$0x1] }
 0x163   : > { %6888 = vst [vmem:[%s7578_s16 + $0x3] sm:$0x1] %v3605_v6 }
 0x164   : > { %3631 = vsyncadd %s7575_s21, 16  ;;  %s3632_s1 = scalar_lea.vmem %s7924_s8, %s3400_s3 }
 0x165   : > { %v3651_v7 = vld [vmem:[%s3632_s1] sm:$0x1] }
 0x166   : > { %6891 = vst [vmem:[%s7590_s29 + $0x3] sm:$0x1] %v3651_v7 }
 0x167   : > { %3677 = vsyncadd %s7587_s30, 16  ;;  %s3678_s9 = sadd.s32 4, %s7518_s12 }
 0x168   : > { %s3679_s24 = sld [smem:[#allocation11 + %s3678_s9]] }
 0x169   : > { %s3680_s19 = sld [smem:[#allocation12 + %s3678_s9]] }
 0x16a   : > { %s3681_s28 = sld [smem:[#allocation13 + %s3678_s9]] }
 0x16e   : > { %s3683_s14 = scalar_lea.vmem %s7921_s5, %s3679_s24 }
 0x16f   : > { %v3702_v8 = vld [vmem:[%s3683_s14] sm:$0x1] }
 0x170   : > { %6894 = vst [vmem:[%s7531_s11 + $0x4] sm:$0x1] %v3702_v8 }
 0x171   : > { %3728 = vsyncadd %s7534_s25, 16  ;;  %s3729_s3 = scalar_lea.vmem %s7922_s6, %s3679_s24 }
 0x172   : > { %v3748_v9 = vld [vmem:[%s3729_s3] sm:$0x1] }
 0x173   : > { %6897 = vst [vmem:[%s7544_s23 + $0x4] sm:$0x1] %v3748_v9 }
 0x174   : > { %3774 = vsyncadd %s7541_s20, 16  ;;  %s3775_s9 = scalar_lea.vmem %s7923_s7, %s3680_s19 }
 0x175   : > { %v3794_v10 = vld [vmem:[%s3775_s9] sm:$0x1] }
 0x176   : > { %6900 = vst [vmem:[%s7555_s15 + $0x4] sm:$0x1] %v3794_v10 }
 0x177   : > { %3820 = vsyncadd %s7552_s27, 16  ;;  %s3821_s14 = scalar_lea.vmem %s7924_s8, %s3680_s19 }
 0x178   : > { %v3840_v11 = vld [vmem:[%s3821_s14] sm:$0x1] }
 0x179   : > { %6903 = vst [vmem:[%s7566_s10 + $0x4] sm:$0x1] %v3840_v11 }
 0x17a   : > { %3866 = vsyncadd %s7563_s17, 16  ;;  %s3867_s18 = scalar_lea.vmem %s7923_s7, %s3681_s28 }
 0x17b   : > { %v3886_v12 = vld [vmem:[%s3867_s18] sm:$0x1] }
 0x17c   : > { %6906 = vst [vmem:[%s7578_s16 + $0x4] sm:$0x1] %v3886_v12 }
 0x17d   : > { %3912 = vsyncadd %s7575_s21, 16  ;;  %s3913_s1 = scalar_lea.vmem %s7924_s8, %s3681_s28 }
 0x17e   : > { %v3932_v13 = vld [vmem:[%s3913_s1] sm:$0x1] }
 0x17f   : > { %6909 = vst [vmem:[%s7590_s29 + $0x4] sm:$0x1] %v3932_v13 }
 0x180   : > { %3958 = vsyncadd %s7587_s30, 16  ;;  %s3959_s19 = sadd.s32 5, %s7518_s12 }
 0x181   : > { %s3960_s9 = sld [smem:[#allocation11 + %s3959_s19]] }
 0x182   : > { %s3961_s0 = sld [smem:[#allocation12 + %s3959_s19]] }
 0x183   : > { %s3962_s26 = sld [smem:[#allocation13 + %s3959_s19]] }
 0x187   : > { %s3964_s4 = scalar_lea.vmem %s7921_s5, %s3960_s9 }
 0x188   : > { %v3983_v14 = vld [vmem:[%s3964_s4] sm:$0x1] }
 0x189   : > { %6912 = vst [vmem:[%s7531_s11 + $0x5] sm:$0x1] %v3983_v14 }
 0x18a   : > { %4009 = vsyncadd %s7534_s25, 16  ;;  %s4010_s28 = scalar_lea.vmem %s7922_s6, %s3960_s9 }
 0x18b   : > { %v4029_v15 = vld [vmem:[%s4010_s28] sm:$0x1] }
 0x18c   : > { %6915 = vst [vmem:[%s7544_s23 + $0x5] sm:$0x1] %v4029_v15 }
 0x18d   : > { %4055 = vsyncadd %s7541_s20, 16  ;;  %s4056_s19 = scalar_lea.vmem %s7923_s7, %s3961_s0 }
 0x18e   : > { %v4075_v16 = vld [vmem:[%s4056_s19] sm:$0x1] }
 0x18f   : > { %6918 = vst [vmem:[%s7555_s15 + $0x5] sm:$0x1] %v4075_v16 }
 0x190   : > { %4101 = vsyncadd %s7552_s27, 16  ;;  %s4102_s4 = scalar_lea.vmem %s7924_s8, %s3961_s0 }
 0x191   : > { %v4121_v17 = vld [vmem:[%s4102_s4] sm:$0x1] }
 0x192   : > { %6921 = vst [vmem:[%s7566_s10 + $0x5] sm:$0x1] %v4121_v17 }
 0x193   : > { %4147 = vsyncadd %s7563_s17, 16  ;;  %s4148_s3 = scalar_lea.vmem %s7923_s7, %s3962_s26 }
 0x194   : > { %v4167_v18 = vld [vmem:[%s4148_s3] sm:$0x1] }
 0x195   : > { %6924 = vst [vmem:[%s7578_s16 + $0x5] sm:$0x1] %v4167_v18 }
 0x196   : > { %4193 = vsyncadd %s7575_s21, 16  ;;  %s4194_s1 = scalar_lea.vmem %s7924_s8, %s3962_s26 }
 0x197   : > { %v4213_v19 = vld [vmem:[%s4194_s1] sm:$0x1] }
 0x198   : > { %6927 = vst [vmem:[%s7590_s29 + $0x5] sm:$0x1] %v4213_v19 }
 0x199   : > { %4239 = vsyncadd %s7587_s30, 16  ;;  %s4240_s0 = sadd.s32 6, %s7518_s12 }
 0x19a   : > { %s4241_s19 = sld [smem:[#allocation11 + %s4240_s0]] }
 0x19b   : > { %s4242_s14 = sld [smem:[#allocation12 + %s4240_s0]] }
 0x19c   : > { %s4243_s24 = sld [smem:[#allocation13 + %s4240_s0]] }
 0x1a0   : > { %s4245_s18 = scalar_lea.vmem %s7921_s5, %s4241_s19 }
 0x1a1   : > { %v4264_v20 = vld [vmem:[%s4245_s18] sm:$0x1] }
 0x1a2   : > { %6930 = vst [vmem:[%s7531_s11 + $0x6] sm:$0x1] %v4264_v20 }
 0x1a3   : > { %4290 = vsyncadd %s7534_s25, 16  ;;  %s4291_s26 = scalar_lea.vmem %s7922_s6, %s4241_s19 }
 0x1a4   : > { %v4310_v21 = vld [vmem:[%s4291_s26] sm:$0x1] }
 0x1a5   : > { %6933 = vst [vmem:[%s7544_s23 + $0x6] sm:$0x1] %v4310_v21 }
 0x1a6   : > { %4336 = vsyncadd %s7541_s20, 16  ;;  %s4337_s0 = scalar_lea.vmem %s7923_s7, %s4242_s14 }
 0x1a7   : > { %v4356_v22 = vld [vmem:[%s4337_s0] sm:$0x1] }
 0x1a8   : > { %6936 = vst [vmem:[%s7555_s15 + $0x6] sm:$0x1] %v4356_v22 }
 0x1a9   : > { %4382 = vsyncadd %s7552_s27, 16  ;;  %s4383_s18 = scalar_lea.vmem %s7924_s8, %s4242_s14 }
 0x1aa   : > { %v4402_v23 = vld [vmem:[%s4383_s18] sm:$0x1] }
 0x1ab   : > { %6939 = vst [vmem:[%s7566_s10 + $0x6] sm:$0x1] %v4402_v23 }
 0x1ac   : > { %4428 = vsyncadd %s7563_s17, 16  ;;  %s4429_s28 = scalar_lea.vmem %s7923_s7, %s4243_s24 }
 0x1ad   : > { %v4448_v24 = vld [vmem:[%s4429_s28] sm:$0x1] }
 0x1ae   : > { %6942 = vst [vmem:[%s7578_s16 + $0x6] sm:$0x1] %v4448_v24 }
 0x1af   : > { %4474 = vsyncadd %s7575_s21, 16  ;;  %s4475_s1 = scalar_lea.vmem %s7924_s8, %s4243_s24 }
 0x1b0   : > { %v4494_v25 = vld [vmem:[%s4475_s1] sm:$0x1] }
 0x1b1   : > { %6945 = vst [vmem:[%s7590_s29 + $0x6] sm:$0x1] %v4494_v25 }
 0x1b2   : > { %4520 = vsyncadd %s7587_s30, 16  ;;  %s4521_s14 = sadd.s32 7, %s7518_s12 }
 0x1b3   : > { %s4522_s0 = sld [smem:[#allocation11 + %s4521_s14]] }
 0x1b4   : > { %s4523_s4 = sld [smem:[#allocation12 + %s4521_s14]] }
 0x1b5   : > { %s4524_s9 = sld [smem:[#allocation13 + %s4521_s14]] }
 0x1b9   : > { %s4526_s3 = scalar_lea.vmem %s7921_s5, %s4522_s0 }
 0x1ba   : > { %v4545_v26 = vld [vmem:[%s4526_s3] sm:$0x1] }
 0x1bb   : > { %6948 = vst [vmem:[%s7531_s11 + $0x7] sm:$0x1] %v4545_v26 }
 0x1bc   : > { %4571 = vsyncadd %s7534_s25, 16  ;;  %s4572_s24 = scalar_lea.vmem %s7922_s6, %s4522_s0 }
 0x1bd   : > { %v4591_v27 = vld [vmem:[%s4572_s24] sm:$0x1] }
 0x1be   : > { %6951 = vst [vmem:[%s7544_s23 + $0x7] sm:$0x1] %v4591_v27 }
 0x1bf   : > { %4617 = vsyncadd %s7541_s20, 16  ;;  %s4618_s1 = scalar_lea.vmem %s7923_s7, %s4523_s4 }
 0x1c0   : > { %v4637_v28 = vld [vmem:[%s4618_s1] sm:$0x1] }
 0x1c1   : > { %6954 = vst [vmem:[%s7555_s15 + $0x7] sm:$0x1] %v4637_v28 }
 0x1c2   : > { %4663 = vsyncadd %s7552_s27, 16  ;;  %s4664_s14 = scalar_lea.vmem %s7924_s8, %s4523_s4 }
 0x1c3   : > { %v4683_v29 = vld [vmem:[%s4664_s14] sm:$0x1] }
 0x1c4   : > { %6957 = vst [vmem:[%s7566_s10 + $0x7] sm:$0x1] %v4683_v29 }
 0x1c5   : > { %4709 = vsyncadd %s7563_s17, 16  ;;  %s4710_s0 = scalar_lea.vmem %s7923_s7, %s4524_s9 }
 0x1c6   : > { %v4729_v30 = vld [vmem:[%s4710_s0] sm:$0x1] }
 0x1c7   : > { %6960 = vst [vmem:[%s7578_s16 + $0x7] sm:$0x1] %v4729_v30 }
 0x1c8   : > { %4755 = vsyncadd %s7575_s21, 16  ;;  %s4756_s18 = scalar_lea.vmem %s7924_s8, %s4524_s9 }
 0x1c9   : > { %v4775_v31 = vld [vmem:[%s4756_s18] sm:$0x1] }
 0x1ca   : > { %6963 = vst [vmem:[%s7590_s29 + $0x7] sm:$0x1] %v4775_v31 }
 0x1cb   : > { %4801 = vsyncadd %s7587_s30, 16 }
 0x1cc PF: > { %s4802_s17 = scalar_lea.sflag [#allocation8], %s7204_s22 }
 0x1cd   : > { %7088 = dma.done.wait %s4802_s17, 128 }
 0x1ce   : > { %7089 = vsyncadd %s4802_s17, 4294967168  ;;  %s5888_s10 = scalar_lea.sflag %s4802_s17, 2 [#allocation8] }
 0x1cf   : > { %7090 = dma.done.wait %s5888_s10, 128 }
 0x1d0   : > { %7091 = vsyncadd %s5888_s10, 4294967168  ;;  %s5890_s4 = scalar_lea.sflag %s4802_s17, 4 [#allocation8] }
 0x1d1   : > { %7092 = dma.done.wait %s5890_s4, 128 }
 0x1d2   : > { %7093 = vsyncadd %s5890_s4, 4294967168  ;;  %s5892_s21 = scalar_lea.sflag %s4802_s17, 6 [#allocation8] }
 0x1d3   : > { %7094 = dma.done.wait %s5892_s21, 128 }
 0x1d4   : > { %7095 = vsyncadd %s5892_s21, 4294967168  ;;  %s5894_s16 = scalar_lea.sflag %s4802_s17, 8 [#allocation8] }
 0x1d5   : > { %7096 = dma.done.wait %s5894_s16, 128 }
 0x1d6   : > { %7097 = vsyncadd %s5894_s16, 4294967168  ;;  %s5896_s9 = scalar_lea.sflag %s4802_s17, 10 [#allocation8] }
 0x1d7   : > { %7098 = dma.done.wait %s5896_s9, 128 }
 0x1d8   : > { %7099 = vsyncadd %s5896_s9, 4294967168  ;;  %4912 = sbr.rel (%p6706_p5) target bundleno = 479 (0x1df), region = 2936  ;;  %vm4913_vm0 = vcmask (!%p6706_p5), 0   ;;  %v7111_v32 = vmov (!%p6706_p5), 0.0  }
 0x1d9   : > { %4914 = vst.msk [vmem:[#allocation9] sm:$0x1] (!%p6706_p5), %vm4913_vm0, %v7111_v32 }
 0x1df PF: > { %s6965_s30 = sshll.u32 %s7204_s22, 3  ;;  %vm4931_vm1 = vcmask 261120   ;;  %s7950_s22 = sld [smem:[#allocation121_spill]]  ;;  %vm4997_vm5 = vcmask 7168   ;;  %vm5006_vm6 = vcmask 0  }
 0x1e0   : > { %s4925_s29 = scalar_lea.vmem [#allocation5], %s6965_s30  ;;  %s4918_s19 = scalar_lea.vmem [#allocation3], %s6965_s30 }
 0x1e1   : > { %v4926_v33 = vld [vmem:[%s4925_s29] sm:$0xff]  ;;  %s4927_s3 = scalar_lea.vmem [#allocation7], %s6965_s30  ;;  %s4916_s28 = scalar_lea.vmem [#allocation2], %s6965_s30 }
 0x1e2   : > { %v4919_v34 = vld [vmem:[%s4918_s19] sm:$0xff]  ;;  %v4917_v37 = vld [vmem:[%s4916_s28] sm:$0xff]  ;;  %s4920_s26 = scalar_lea.vmem [#allocation4], %s6965_s30  ;;  %s4922_s24 = scalar_lea.vmem [#allocation6], %s6965_s30 }
 0x1e3   : > { %v4928_v35 = vld [vmem:[%s4927_s3] sm:$0xff]  ;;  %v4921_v38 = vld [vmem:[%s4920_s26] sm:$0xff]  ;;  %s7951_s12 = sld [smem:[#allocation122_spill]]  ;;  %p6966_p7 = scmp.ne.s32.totalorder %s7198_s2, 3 }
 0x1e4   : > { %v4929_v36 = vsub.f32 %v4926_v33, %v4928_v35  ;;  %v4923_v39 = vld [vmem:[%s4922_s24] sm:$0xff]  ;;  %s7952_s11 = sld [smem:[#allocation125_spill]] (!%p6966_p7)  ;;  %s7953_s16 = sld [smem:[#allocation126_spill]] (!%p6966_p7) }
 0x1e5   : > { %v4924_v40 = vsub.f32 %v4921_v38, %v4923_v39  ;;  %v4940_v10 = vld [vmem:[%s7950_s22] sm:$0xff]  ;;  %s7954_s25 = sld [smem:[#allocation127_spill]] (!%p6966_p7)  ;;  %s7955_s18 = sld [smem:[#allocation128_spill]] (!%p6966_p7) }
 0x1e6   : > { %v4935_v41 = vmul.f32 %v4929_v36, %v4919_v34 }
 0x1e7   : > { %v4930_v42 = vmul.f32 %v4924_v40, %v4917_v37 }
 0x1e8   : > { %v4936_v43 = vsel %vm4931_vm1, %v4935_v41, 0.0 }
 0x1e9   : > { %4937 = vadd.xlane.f32.xlu0 %v4936_v43  ;;  %v4932_v44 = vsel %vm4931_vm1, %v4930_v42, 0.0  ;;  %v4941_v11 = vld [vmem:[%s7951_s12] sm:$0xff] }
 0x1ea   : > { %v4996_v43 = vld [vmem:[#allocation9] sm:$0x1] }
 0x1ed   : > { %4933 = vadd.xlane.f32.xlu0 %v4932_v44 }
 0x276   : > { %v4938_v45 = vpop.xlane.xlu0 %4937 }
 0x277   : > { %v4958_v46 = vand.u32 2147483647, %v4938_v45  ;;  %v4957_v8 = vmin.f32 %v4938_v45, 0.0  ;;  %v4987_v20 = vmul.f32 %v4940_v10, %v4938_v45 }
 0x279   : > { %v4959_v47 = vsub.f32 0.0, %v4958_v46  ;;  %v5012_v46 = vld [vmem:[%s7952_s11] sm:$0xff] (!%p6966_p7) }
 0x27a   : > { %v4934_v48 = vpop.xlane.xlu0 %4933 }
 0x27b   : > { %v4960_v49 = vmul.f32 1.442695, %v4959_v47  ;;  %v4939_v50 = vadd.f32 %v4938_v45, %v4934_v48  ;;  %v4943_v51 = vand.u32 2147483647, %v4934_v48  ;;  %v4942_v22 = vmin.f32 %v4934_v48, 0.0  ;;  %v5013_v47 = vld [vmem:[%s7952_s11 + $0x8] sm:$0xff] (!%p6966_p7) }
 0x27c   : > { %v5014_v48 = vld [vmem:[%s7952_s11 + $0x10] sm:$0xff] (!%p6966_p7) }
 0x27d   : > { %7008 = vpow2.f32 %v4960_v49  ;;  %v4944_v52 = vsub.f32 0.0, %v4943_v51  ;;  %v4973_v53 = vand.u32 2147483647, %v4939_v50  ;;  %v4972_v28 = vmin.f32 %v4939_v50, 0.0  ;;  %v5015_v49 = vld [vmem:[%s7952_s11 + $0x18] sm:$0xff] (!%p6966_p7)  ;;  %v5016_v50 = vld [vmem:[%s7952_s11 + $0x20] sm:$0xff] (!%p6966_p7) }
 0x27e   : > { %v5017_v51 = vld [vmem:[%s7952_s11 + $0x28] sm:$0xff] (!%p6966_p7) }
 0x27f   : > { %v4945_v54 = vmul.f32 1.442695, %v4944_v52  ;;  %v4974_v55 = vsub.f32 0.0, %v4973_v53  ;;  %v5018_v52 = vld [vmem:[%s7953_s16] sm:$0xff] (!%p6966_p7)  ;;  %v5019_v53 = vld [vmem:[%s7953_s16 + $0x8] sm:$0xff] (!%p6966_p7) }
 0x281   : > { %7010 = vpow2.f32 %v4945_v54  ;;  %v4975_v56 = vmul.f32 1.442695, %v4974_v55  ;;  %v5020_v54 = vld [vmem:[%s7953_s16 + $0x10] sm:$0xff] (!%p6966_p7)  ;;  %v5021_v55 = vld [vmem:[%s7953_s16 + $0x18] sm:$0xff] (!%p6966_p7) }
 0x283   : > { %7012 = vpow2.f32 %v4975_v56  ;;  %v5022_v56 = vld [vmem:[%s7953_s16 + $0x20] sm:$0xff] (!%p6966_p7) }
 0x287   : > { %v7009_v57 = vpop.eup %7008 }
 0x288   : > { %v4962_v58 = vadd.f32 1.0, %v7009_v57  ;;  %v4965_v62 = vmul.f32 -0.5, %v7009_v57  ;;  %v4968_v2 = vand.u32 2147483647, %v7009_v57 }
 0x28a   : > { %7014 = vlog2.f32 %v4962_v58  ;;  %v4966_v0 = vadd.f32 1.0, %v4965_v62  ;;  %vm4969_vm2 = vcmp.lt.f32.partialorder %v4968_v2, 0.0004427343  ;;  %v5024_v58 = vsub.f32 (!%p6966_p7), %v5012_v46, %v5018_v52 }
 0x28b   : > { %v7011_v59 = vpop.eup %7010  ;;  %v5028_v62 = vsub.f32 (!%p6966_p7), %v5016_v50, %v5022_v56 }
 0x28c   : > { %v4947_v60 = vadd.f32 1.0, %v7011_v59  ;;  %v4950_v1 = vmul.f32 -0.5, %v7011_v59  ;;  %v4967_v6 = vmul.f32 %v7009_v57, %v4966_v0  ;;  %v4953_v9 = vand.u32 2147483647, %v7011_v59  ;;  %v5023_v57 = vld [vmem:[%s7953_s16 + $0x28] sm:$0xff] (!%p6966_p7)  ;;  %v5030_v0 = vld [vmem:[%s7954_s25] sm:$0xff] (!%p6966_p7) }
 0x28d   : > { %v7013_v61 = vpop.eup %7012  ;;  %v5042_v2 = vmul.f32 (!%p6966_p7), %v5024_v58, %v5024_v58 }
 0x28e   : > { %7016 = vlog2.f32 %v4947_v60  ;;  %v4977_v63 = vadd.f32 1.0, %v7013_v61  ;;  %v4980_v3 = vmul.f32 -0.5, %v7013_v61  ;;  %v4951_v7 = vadd.f32 1.0, %v4950_v1  ;;  %v5031_v1 = vld [vmem:[%s7954_s25 + $0x8] sm:$0xff] (!%p6966_p7) }
 0x28f   : > { %v4983_v16 = vand.u32 2147483647, %v7013_v61  ;;  %vm4954_vm3 = vcmp.lt.f32.partialorder %v4953_v9, 0.0004427343  ;;  %v5026_v60 = vsub.f32 (!%p6966_p7), %v5014_v48, %v5020_v54  ;;  %v5046_v9 = vmul.f32 (!%p6966_p7), %v5028_v62, %v5028_v62 }
 0x290   : > { %7018 = vlog2.f32 %v4977_v63  ;;  %v4981_v13 = vadd.f32 1.0, %v4980_v3  ;;  %v4952_v18 = vmul.f32 %v7011_v59, %v4951_v7  ;;  %v5025_v59 = vsub.f32 (!%p6966_p7), %v5013_v47, %v5019_v53  ;;  %v5035_v7 = vld [vmem:[%s7955_s18 + $0x8] sm:$0xff] (!%p6966_p7) }
 0x291   : > { %vm4984_vm4 = vcmp.lt.f32.partialorder %v4983_v16, 0.0004427343  ;;  %v5029_v63 = vsub.f32 (!%p6966_p7), %v5017_v51, %v5023_v57 }
 0x292   : > { %v4982_v25 = vmul.f32 %v7013_v61, %v4981_v13  ;;  %v5027_v61 = vsub.f32 (!%p6966_p7), %v5015_v49, %v5021_v55  ;;  %v5043_v3 = vmul.f32 (!%p6966_p7), %v5025_v59, %v5025_v59 }
 0x294   : > { %v7015_v4 = vpop.eup %7014 }
 0x295   : > { %v4964_v5 = vmul.f32 0.6931472, %v7015_v4  ;;  %v5044_v4 = vmul.f32 (!%p6966_p7), %v5026_v60, %v5026_v60 }
 0x297   : > { %v4970_v12 = vsel %vm4969_vm2, %v4967_v6, %v4964_v5  ;;  %v5032_v5 = vld [vmem:[%s7954_s25 + $0x10] sm:$0xff] (!%p6966_p7)  ;;  %v5034_v6 = vld [vmem:[%s7955_s18] sm:$0xff] (!%p6966_p7)  ;;  %v5051_v16 = vsel (!%p6966_p7), %vm4931_vm1, %v5044_v4, 0.0 }
 0x298   : > { %v7017_v14 = vpop.eup %7016  ;;  %v4971_v15 = vsub.f32 %v4957_v8, %v4970_v12  ;;  %v5045_v8 = vmul.f32 (!%p6966_p7), %v5027_v61, %v5027_v61  ;;  %v5037_v12 = vld [vmem:[%s7955_s18 + $0x18] sm:$0xff] (!%p6966_p7)  ;;  %v5038_v13 = vsub.f32 (!%p6966_p7), %v5030_v0, %v5034_v6 }
 0x299   : > { %v4949_v17 = vmul.f32 0.6931472, %v7017_v14  ;;  %v5048_v14 = vsel (!%p6966_p7), %vm4931_vm1, %v5042_v2, 0.0 }
 0x29a   : > { %v7019_v19 = vpop.eup %7018  ;;  %v4988_v21 = vmul.f32 %v4971_v15, %v4941_v11  ;;  %v5049_v15 = vsel (!%p6966_p7), %vm4931_vm1, %v5043_v3, 0.0 }
 0x29b   : > { %v4955_v23 = vsel %vm4954_vm3, %v4952_v18, %v4949_v17  ;;  %v4979_v24 = vmul.f32 0.6931472, %v7019_v19  ;;  %v5039_v17 = vsub.f32 (!%p6966_p7), %v5031_v1, %v5035_v7  ;;  %v5047_v18 = vmul.f32 (!%p6966_p7), %v5029_v63, %v5029_v63 }
 0x29c   : > { %v4989_v26 = vsub.f32 %v4987_v20, %v4988_v21  ;;  %v4956_v27 = vsub.f32 %v4942_v22, %v4955_v23  ;;  %v5050_v19 = vadd.f32 (!%p6966_p7), %v5049_v15, %v5048_v14  ;;  %v5053_v20 = vsel (!%p6966_p7), %vm4931_vm1, %v5045_v8, 0.0 }
 0x29d   : > { %v4985_v29 = vsel %vm4984_vm4, %v4982_v25, %v4979_v24  ;;  %v5070_v23 = vmul.f32 (!%p6966_p7), %v5038_v13, %v5038_v13  ;;  %v5071_v24 = vmul.f32 (!%p6966_p7), %v5039_v17, %v5039_v17 }
 0x29e   : > { %v4986_v30 = vsub.f32 %v4972_v28, %v4985_v29  ;;  %v4991_v31 = vmul.f32 %v4956_v27, %v4940_v10  ;;  %v4990_v32 = vmul.f32 0.1, %v4989_v26  ;;  %v5033_v10 = vld [vmem:[%s7954_s25 + $0x18] sm:$0xff] (!%p6966_p7)  ;;  %v5052_v25 = vadd.f32 (!%p6966_p7), %v5051_v16, %v5050_v19 }
 0x29f   : > { %v5041_v22 = vsub.f32 (!%p6966_p7), %v5033_v10, %v5037_v12  ;;  %v5055_v26 = vsel (!%p6966_p7), %vm4931_vm1, %v5046_v9, 0.0  ;;  %v5074_v29 = vsel (!%p6966_p7), %vm4931_vm1, %v5070_v23, 0.0 }
 0x2a0   : > { %v4992_v33 = vmul.f32 0.1, %v4991_v31  ;;  %v4994_v35 = vmul.f32 %v4986_v30, %v4941_v11  ;;  %v5036_v11 = vld [vmem:[%s7955_s18 + $0x10] sm:$0xff] (!%p6966_p7)  ;;  %v5075_v30 = vsel (!%p6966_p7), %vm4931_vm1, %v5071_v24, 0.0  ;;  %v5054_v31 = vadd.f32 (!%p6966_p7), %v5053_v20, %v5052_v25 }
 0x2a1   : > { %v5040_v21 = vsub.f32 (!%p6966_p7), %v5032_v5, %v5036_v11  ;;  %v5073_v28 = vmul.f32 (!%p6966_p7), %v5041_v22, %v5041_v22 }
 0x2a2   : > { %v4993_v34 = vsub.f32 %v4990_v32, %v4992_v33  ;;  %v5076_v32 = vadd.f32 (!%p6966_p7), %v5075_v30, %v5074_v29  ;;  %v5057_v33 = vsel (!%p6966_p7), %vm4931_vm1, %v5047_v18, 0.0 }
 0x2a3   : > { %v5072_v27 = vmul.f32 (!%p6966_p7), %v5040_v21, %v5040_v21 }
 0x2a4   : > { %v4995_v36 = vsub.f32 %v4993_v34, %v4994_v35  ;;  %v5056_v35 = vadd.f32 (!%p6966_p7), %v5055_v26, %v5054_v31 }
 0x2a5   : > { %v5077_v34 = vsel (!%p6966_p7), %vm4931_vm1, %v5072_v27, 0.0 }
 0x2a6   : > { %v4998_v37 = vsel %vm4997_vm5, %v4995_v36, 0.0  ;;  %v5078_v36 = vadd.f32 (!%p6966_p7), %v5077_v34, %v5076_v32 }
 0x2a7   : > { %v4999_v38 = vrot.slane %v4998_v37, 4 }
 0x2a9   : > { %v5000_v39 = vadd.f32 %v4999_v38, %v4998_v37  ;;  %v5079_v37 = vsel (!%p6966_p7), %vm4931_vm1, %v5073_v28, 0.0  ;;  %v5058_v38 = vadd.f32 (!%p6966_p7), %v5057_v33, %v5056_v35 }
 0x2ab   : > { %v5001_v40 = vrot.slane %v5000_v39, 2  ;;  %5059 = vadd.xlane.f32.xlu0 (!%p6966_p7), %v5058_v38 }
 0x2ad   : > { %v5002_v41 = vadd.f32 %v5001_v40, %v5000_v39  ;;  %v5080_v39 = vadd.f32 (!%p6966_p7), %v5079_v37, %v5078_v36 }
 0x2af   : > { %v5003_v42 = vrot.slane %v5002_v41, 1  ;;  %5011 = sbr.rel (%p6966_p7) target bundleno = 901 (0x385), region = 2940  ;;  %5081 = vadd.xlane.f32.xlu0 (!%p6966_p7), %v5080_v39 }
 0x2b1   : > { %v5004_v44 = vadd.f32 %v5003_v42, %v5002_v41 }
 0x2b3   : > { %v5005_v45 = vadd.f32 %v5004_v44, %v4996_v43 }
 0x2b5   : > { %5007 = vst.msk [vmem:[#allocation9] sm:$0x1] %vm5006_vm6, %v5005_v45 }
 0x2bc   : > { %v5093_v56 = vld [vmem:[#allocation9] sm:$0x1] }
 0x2bd   : > { %v5094_v60 = vmul.f32 0.03125, %v5093_v56 }
 0x338   : > { %v5060_v40 = vpop.xlane.xlu0 %5059 }
 0x339   : > { %v5061_v41 = vrot.slane %v5060_v40, 4 }
 0x33b   : > { %v5062_v42 = vadd.f32 %v5061_v41, %v5060_v40 }
 0x33c   : > { %v5082_v43 = vpop.xlane.xlu0 %5081 }
 0x33d   : > { %v5063_v44 = vrot.slane %v5062_v42, 2  ;;  %v5083_v45 = vrot.slane %v5082_v43, 4 }
 0x33f   : > { %v5084_v46 = vadd.f32 %v5083_v45, %v5082_v43  ;;  %v5064_v47 = vadd.f32 %v5063_v44, %v5062_v42 }
 0x341   : > { %v5085_v48 = vrot.slane %v5084_v46, 2  ;;  %v5065_v49 = vrot.slane %v5064_v47, 1 }
 0x343   : > { %v5086_v50 = vadd.f32 %v5085_v48, %v5084_v46  ;;  %v5066_v51 = vadd.f32 %v5065_v49, %v5064_v47 }
 0x345   : > { %6985 = vpush %v5066_v51  ;;  %v5087_v52 = vrot.slane %v5086_v50, 1 }
 0x347   : > { %v5088_v53 = vadd.f32 %v5087_v52, %v5086_v50 }
 0x349   : > { %6987 = vpush %v5088_v53 }
 0x376   : > { %s6986_s3 = spop %6985 }
 0x377   : > { %v5068_v54 = vstv %s6986_s3 }
 0x378   : > { %v5069_v57 = vmul.f32 0.0006510417, %v5068_v54 }
 0x37a   : > { %s6988_s28 = spop %6987 }
 0x37b   : > { %v5090_v55 = vstv %s6988_s28 }
 0x37c   : > { %v5091_v58 = vmul.f32 0.0011574074, %v5090_v55 }
 0x37e   : > { %v5092_v59 = vadd.f32 %v5091_v58, %v5069_v57 }
 0x380   : > { %v5095_v61 = vmul.f32 0.01, %v5092_v59 }
 0x382   : > { %v5096_v62 = vsub.f32 %v5094_v60, %v5095_v61 }
 0x384   : > { %5097 = vst.msk [vmem:[#allocation14] sm:$0x1] %vm5006_vm6, %v5096_v62 }
 0x385 PF: > { %p6993_p8 = scmp.eq.s32.totalorder %s7198_s2, 3  ;;  %s7112_s26 = smov [#allocation14]  }
 0x386   : > { %s5105_s24 = sshll.u32 %s7112_s26, 4  ;;  %s5106_s24 = int_to_ptr.vmem [resolvable:$true] %s5105_s24 }
 0x387   : > { %s7056_s22 = scalar_lea.vmem %s5106_s24, 16  ;;  %s7062_s12 = scalar_lea.vmem %s5106_s24, 32 }
 0x388   : > { %p7057_p9 = scmp.ne.s32.totalorder %s5106_s24, %s7056_s22  ;;  %p7063_p12 = scmp.lt.s32.totalorder %s5106_s24, %s5106_s24 }
 0x389   : > { %p7064_p13 = scmp.lt.s32.totalorder %s7062_s12, %s7056_s22 }
 0x38a   : > { %p7058_p10 = pnand %p7057_p9, %p6993_p8 }
 0x38b   : > { %p7065_p0 = por %p7064_p13, %p7063_p12 }
 0x38c   : > { %p7059_p11 = pneg %p7058_p10 }
 0x38e   : > { %p7066_p1 = pnand %p7065_p0, %p7059_p11 }
 0x390   : > { %7069 = shalt.err (!%p7066_p1)
}
 0x391   : > { %s7956_s14 = sld [smem:[#allocation129_spill]] }
 0x397   : > { %s7070_s23 = scalar_lea.hbm %s7956_s14, 16 }
 0x398   : > { %p7071_p2 = scmp.ne.s32.totalorder %s7956_s14, %s7070_s23  ;;  %p7076_p5 = scmp.lt.u32.totalorder %s7070_s23, %s7956_s14 }
 0x39a   : > { %p7072_p3 = pnand %p7071_p2, %p6993_p8 }
 0x39c   : > { %p7073_p4 = pneg %p7072_p3 }
 0x39e   : > { %p7078_p6 = pnand %p7076_p5, %p7073_p4 }
 0x3a0   : > { %7081 = shalt.err (!%p7078_p6)
}
 0x3a1   : > { %6990 = dma.vmem_to_hbm [thread:$0]  (%p6993_p8), %s5106_s24, 16, %s7956_s14, [#allocation15]  }
 0x3a2   : > { %7101 = dma.done.wait (%p6993_p8), [#allocation15], 16  }
 0x3a3   : > { %7103 = vsyncadd (%p6993_p8), [#allocation15], 4294967280 }
 0x3a4 PF: > { %s7957_s4 = sld [smem:[#allocation120_spill]] }
 0x3aa   : > { %s38_s21 = sadd.s32 1, %s7957_s4  }
 0x3ab   : > { %p35_p7 = scmp.ge.s32.totalorder %s38_s21, 6  }
 0x3ad   :  { %37 = sbr.rel (!%p35_p7) target bundleno = 39 (0x27), region = 4157 }
 0x3b4   :  { %5118 = vsyncpa [#allocation15], 1 }
 0x3b5   :  { %5120 = vsyncpa [#allocation15 + $0x1], 1 }
 0x3b6   :  { %5121 = vsyncmov [#allocation8] }
 0x3b9   :  { %s5122_s9 = vpop.sfrf %5121 }
 0x3ba   :  { %p6971_p9 = scmp.ne.s32.totalorder %s5122_s9, 0 }
 0x3bc   :  { %5126 = shalt.err (%p6971_p9)  }
 0x3bd   :  { %5128 = vsyncmov [#allocation8 + $0x1] }
 0x3c0   :  { %s5129_s30 = vpop.sfrf %5128 }
 0x3c1   :  { %p6972_p10 = scmp.ne.s32.totalorder %s5129_s30, 0 }
 0x3c3   :  { %5133 = shalt.err (%p6972_p10)  }
 0x3c4   :  { %5135 = vsyncmov [#allocation8 + $0x2] }
 0x3c7   :  { %s5136_s2 = vpop.sfrf %5135 }
 0x3c8   :  { %p6973_p8 = scmp.ne.s32.totalorder %s5136_s2, 0 }
 0x3ca   :  { %5140 = shalt.err (%p6973_p8)  }
 0x3cb   :  { %5142 = vsyncmov [#allocation8 + $0x3] }
 0x3ce   :  { %s5143_s29 = vpop.sfrf %5142 }
 0x3cf   :  { %p6974_p11 = scmp.ne.s32.totalorder %s5143_s29, 0 }
 0x3d1   :  { %5147 = shalt.err (%p6974_p11)  }
 0x3d2   :  { %5149 = vsyncmov [#allocation8 + $0x4] }
 0x3d5   :  { %s5150_s21 = vpop.sfrf %5149 }
 0x3d6   :  { %p6975_p12 = scmp.ne.s32.totalorder %s5150_s21, 0 }
 0x3d8   :  { %5154 = shalt.err (%p6975_p12)  }
 0x3d9   :  { %5156 = vsyncmov [#allocation8 + $0x5] }
 0x3dc   :  { %s5157_s5 = vpop.sfrf %5156 }
 0x3dd   :  { %p6976_p13 = scmp.ne.s32.totalorder %s5157_s5, 0 }
 0x3df   :  { %5161 = shalt.err (%p6976_p13)  }
 0x3e0   :  { %5163 = vsyncmov [#allocation8 + $0x6] }
 0x3e3   :  { %s5164_s6 = vpop.sfrf %5163 }
 0x3e4   :  { %p6977_p0 = scmp.ne.s32.totalorder %s5164_s6, 0 }
 0x3e6   :  { %5168 = shalt.err (%p6977_p0)  }
 0x3e7   :  { %5170 = vsyncmov [#allocation8 + $0x7] }
 0x3ea   :  { %s5171_s7 = vpop.sfrf %5170 }
 0x3eb   :  { %p6978_p1 = scmp.ne.s32.totalorder %s5171_s7, 0 }
 0x3ed   :  { %5175 = shalt.err (%p6978_p1)  }
 0x3ee   :  { %5177 = vsyncmov [#allocation8 + $0x8] }
 0x3f1   :  { %s5178_s8 = vpop.sfrf %5177 }
 0x3f2   :  { %p6979_p2 = scmp.ne.s32.totalorder %s5178_s8, 0 }
 0x3f4   :  { %5182 = shalt.err (%p6979_p2)  }
 0x3f5   :  { %5184 = vsyncmov [#allocation8 + $0x9] }
 0x3f8   :  { %s5185_s11 = vpop.sfrf %5184 }
 0x3f9   :  { %p6980_p3 = scmp.ne.s32.totalorder %s5185_s11, 0 }
 0x3fb   :  { %5189 = shalt.err (%p6980_p3)  }
 0x3fc   :  { %5191 = vsyncmov [#allocation8 + $0xa] }
 0x3ff   :  { %s5192_s16 = vpop.sfrf %5191 }
 0x400   :  { %p6981_p4 = scmp.ne.s32.totalorder %s5192_s16, 0 }
 0x402   :  { %5196 = shalt.err (%p6981_p4)  }
 0x403   :  { %5198 = vsyncmov [#allocation8 + $0xb] }
 0x406   :  { %s5199_s25 = vpop.sfrf %5198 }
 0x407   :  { %p6982_p5 = scmp.ne.s32.totalorder %s5199_s25, 0 }
 0x409   :  { %5203 = shalt.err (%p6982_p5)  }

</bundles_post_ra>
